<compile_context>
chip_gen: v7x
topology: tpu7x:2x2x1
jax: 0.10.0
libtpu: 0.0.40
codegen_flags: <defaults>
</compile_context>

<pallas_src>
import functools
import math

import jax
import jax.numpy as jnp
from jax.experimental import pallas as pl
from jax.experimental.pallas import tpu as pltpu

MATMUL_DTYPE = jnp.bfloat16   # MXU operand dtype; accumulation stays f32


# ----------------------------------------------------------------------------
# Pallas kernel: all CLIP layers + final LayerNorm, gridded over (layer,)
# ----------------------------------------------------------------------------
def _layernorm(x, g, b, eps=1e-5):
    # x: (R, D); g, b: (1, D)  -- all f32
    mean = jnp.mean(x, axis=-1, keepdims=True)
    var = jnp.mean(jnp.square(x - mean), axis=-1, keepdims=True)
    return (x - mean) * jax.lax.rsqrt(var + eps) * g + b


def clip_layers_kernel(x_ref,
                       ln1_g, ln1_b, wqkv, bqkv, wo, bo,
                       ln2_g, ln2_b, w1, b1, w2, b2,
                       lnf_g, lnf_b,
                       o_ref, *, n_head):
    l = pl.program_id(0)
    n_layers = pl.num_programs(0)

    # Residual-stream state is carried in the output block, which stays
    # VMEM-resident across the (arbitrary) layer axis.  Load the fresh input
    # only on the first layer step.
    @pl.when(l == 0)
    def _():
        o_ref[...] = x_ref[...]

    xb = o_ref[...]                                # (B, S, D) f32 state
    B, S, D = xb.shape
    dh = D // n_head
    scale = 1.0 / math.sqrt(dh)
    x = xb.reshape(B * S, D)                       # fold batch into MXU M dim

    # ---- LayerNorm 1 (f32) ----
    h = _layernorm(x, ln1_g[0], ln1_b[0])

    # ---- fused QKV projection (bf16 operands, f32 accumulation) ----
    qkv = jnp.dot(h.astype(MATMUL_DTYPE), wqkv[0],
                  preferred_element_type=jnp.float32) + bqkv[0]
    q = qkv[:, 0 * D:1 * D]                        # (B*S, D) f32
    k = qkv[:, 1 * D:2 * D]
    v = qkv[:, 2 * D:3 * D]

    # Additive causal mask, built once per layer step (also masks any
    # zero-padded key rows, since padded keys always have col > real row).
    row = jax.lax.broadcasted_iota(jnp.int32, (S, S), 0)
    col = jax.lax.broadcasted_iota(jnp.int32, (S, S), 1)
    mask_add = jnp.where(col > row, jnp.float32(-1e30), jnp.float32(0.0))

    # Contract the last dims of q/k directly -> no materialized k transpose.
    dn = (((1,), (1,)), ((), ()))
    attn_rows = []
    for b in range(B):                             # small static loops
        r0 = b * S
        heads = []
        for hh in range(n_head):
            c0 = hh * dh
            qh = q[r0:r0 + S, c0:c0 + dh].astype(MATMUL_DTYPE)
            kh = k[r0:r0 + S, c0:c0 + dh].astype(MATMUL_DTYPE)
            vh = v[r0:r0 + S, c0:c0 + dh].astype(MATMUL_DTYPE)
            s = jax.lax.dot_general(qh, kh, dn,
                                    preferred_element_type=jnp.float32)
            s = s * scale + mask_add               # scale AFTER dot (matches ref)
            s = s - jnp.max(s, axis=-1, keepdims=True)
            p = jnp.exp(s)
            p = p / jnp.sum(p, axis=-1, keepdims=True)   # exact softmax
            heads.append(jnp.dot(p.astype(MATMUL_DTYPE), vh,
                                 preferred_element_type=jnp.float32))
        attn_rows.append(jnp.concatenate(heads, axis=-1))     # (S, D)
    attn = jnp.concatenate(attn_rows, axis=0)                 # (B*S, D) f32

    # Single K=D output projection (one big MXU matmul).
    x = x + jnp.dot(attn.astype(MATMUL_DTYPE), wo[0],
                    preferred_element_type=jnp.float32) + bo[0]

    # ---- LayerNorm 2 + MLP (quick-GELU) + residual ----
    h2 = _layernorm(x, ln2_g[0], ln2_b[0])
    y = jnp.dot(h2.astype(MATMUL_DTYPE), w1[0],
                preferred_element_type=jnp.float32) + b1[0]
    y = y * jax.nn.sigmoid(1.702 * y)              # quick-GELU in f32
    y = jnp.dot(y.astype(MATMUL_DTYPE), w2[0],
                preferred_element_type=jnp.float32) + b2[0]
    x = x + y

    # Carry the state; fuse the final LayerNorm into the last layer step.
    @pl.when(l < n_layers - 1)
    def _():
        o_ref[...] = x.reshape(B, S, D)

    @pl.when(l == n_layers - 1)
    def _():
        o_ref[...] = _layernorm(x, lnf_g[...], lnf_b[...]).reshape(B, S, D)


# ----------------------------------------------------------------------------
# One-time weight preparation (stacking + bf16 cast hoisted out of forward)
# ----------------------------------------------------------------------------
_WEIGHT_ORDER = ("ln1_g", "ln1_b", "wqkv", "bqkv", "wo", "bo",
                 "ln2_g", "ln2_b", "w1", "b1", "w2", "b2")


def prepare_clip_weights(params):
    layers = params["layers"]

    def stack(name, dtype=jnp.float32):
        return jnp.stack([lp[name] for lp in layers]).astype(dtype)

    stacked = {
        "ln1_g": stack("ln1_g"), "ln1_b": stack("ln1_b"),
        "wqkv": stack("wqkv", MATMUL_DTYPE), "bqkv": stack("bqkv"),
        "wo": stack("wo", MATMUL_DTYPE), "bo": stack("bo"),
        "ln2_g": stack("ln2_g"), "ln2_b": stack("ln2_b"),
        "w1": stack("w1", MATMUL_DTYPE), "b1": stack("b1"),
        "w2": stack("w2", MATMUL_DTYPE), "b2": stack("b2"),
    }
    return {
        "tok_emb": params["tok_emb"],
        "pos_emb": params["pos_emb"],
        "lnf_g": params["lnf_g"],
        "lnf_b": params["lnf_b"],
        "stacked": stacked,
    }


# ----------------------------------------------------------------------------
# Wrapper: one pallas_call over grid=(L,) -- weights streamed once per layer
# ----------------------------------------------------------------------------
def clip_layers_pallas(x, prepared, n_head):
    B, S, D = x.shape
    stacked = [prepared["stacked"][n] for n in _WEIGHT_ORDER]
    L = stacked[0].shape[0]

    def layer_spec(arr):
        nd = arr.ndim
        return pl.BlockSpec((1,) + arr.shape[1:],
                            lambda l, nd=nd: (l,) + (0,) * (nd - 1))

    in_specs = [pl.BlockSpec((B, S, D), lambda l: (0, 0, 0))]      # x (fetched once)
    in_specs += [layer_spec(a) for a in stacked]                   # per-layer weights
    in_specs += [pl.BlockSpec((1, D), lambda l: (0, 0))] * 2       # final LN

    return pl.pallas_call(
        functools.partial(clip_layers_kernel, n_head=n_head),
        out_shape=jax.ShapeDtypeStruct((B, S, D), jnp.float32),
        grid=(L,),
        in_specs=in_specs,
        out_specs=pl.BlockSpec((B, S, D), lambda l: (0, 0, 0)),
        compiler_params=pltpu.CompilerParams(
            # layer axis carries the residual accumulator -> "arbitrary";
            # whole batch on one core (no weight re-streaming per core).
            dimension_semantics=("arbitrary",),
            # double-buffered bf16 layer weights + activations at D=768 need
            # more than the scoped default; keep <= ~56 MiB for v7x's 64 MiB.
            vmem_limit_bytes=56 * 1024 * 1024),
    )(x, *stacked, prepared["lnf_g"], prepared["lnf_b"])


def clip_forward(tokens, prepared, n_head):
    tokens = tokens.astype(jnp.int32)
    # TODO(synk): token-embedding gather is data-dependent; kept in plain JAX.
    x = jnp.take(prepared["tok_emb"], tokens, axis=0) + prepared["pos_emb"][None]
    B, S, D = x.shape
    pad = (-S) % 8                        # sublane-align the sequence dim
    if pad:
        # Zero pad rows: as keys they are masked by the causal mask; as
        # queries they only produce rows that are sliced off below.
        x = jnp.pad(x, ((0, 0), (0, pad), (0, 0)))
    out = clip_layers_pallas(x, prepared, n_head)
    return out[:, :S] if pad else out


# ----------------------------------------------------------------------------
# Pure-JAX reference mirroring the PyTorch forward.  `matmul_dtype` lets us
# emulate the kernel's bf16 MXU-operand rounding (f32 accumulation) exactly;
# with float32 it is the exact PyTorch-equivalent reference.
# ----------------------------------------------------------------------------
def _ref_layer(x, lp, n_head, dt):
    B, S, D = x.shape
    dh = D // n_head
    r = lambda a: a.astype(dt).astype(jnp.float32)   # operand rounding only

    def ln(v, g, b):
        m = jnp.mean(v, axis=-1, keepdims=True)
        var = jnp.mean(jnp.square(v - m), axis=-1, keepdims=True)
        return (v - m) / jnp.sqrt(var + 1e-5) * g + b

    h = ln(x, lp["ln1_g"], lp["ln1_b"])
    qkv = r(h) @ r(lp["wqkv"]) + lp["bqkv"]
    q, k, v = jnp.split(qkv, 3, axis=-1)
    q = q.reshape(B, S, n_head, dh).transpose(0, 2, 1, 3)
    k = k.reshape(B, S, n_head, dh).transpose(0, 2, 1, 3)
    v = v.reshape(B, S, n_head, dh).transpose(0, 2, 1, 3)
    w = jnp.einsum("bhqd,bhkd->bhqk", r(q), r(k))
    mask = jnp.triu(jnp.ones((S, S), bool), 1)
    w = jnp.where(mask, -1e30, w) / math.sqrt(dh)
    w = jax.nn.softmax(w, axis=-1)
    o = jnp.einsum("bhqk,bhkd->bhqd", r(w), r(v))
    o = o.transpose(0, 2, 1, 3).reshape(B, S, D)
    x = x + (r(o) @ r(lp["wo"]) + lp["bo"])
    h2 = ln(x, lp["ln2_g"], lp["ln2_b"])
    y = r(h2) @ r(lp["w1"]) + lp["b1"]
    y = y * jax.nn.sigmoid(1.702 * y)
    y = r(y) @ r(lp["w2"]) + lp["b2"]
    return x + y


def clip_reference(tokens, params, n_head, matmul_dtype=jnp.float32):
    x = jnp.take(params["tok_emb"], tokens.astype(jnp.int32), axis=0)
    x = x + params["pos_emb"][None]
    for lp in params["layers"]:
        x = _ref_layer(x, lp, n_head, matmul_dtype)
    m = jnp.mean(x, axis=-1, keepdims=True)
    var = jnp.mean(jnp.square(x - m), axis=-1, keepdims=True)
    return (x - m) / jnp.sqrt(var + 1e-5) * params["lnf_g"] + params["lnf_b"]


# ----------------------------------------------------------------------------
# Deterministic parameter construction
# ----------------------------------------------------------------------------
def make_params(key, n_vocab, n_embd, n_token, n_layers):
    D = n_embd
    keys = jax.random.split(key, 2 + 8 * n_layers)
    ki = iter(keys)

    def nrm(k, shape, scale=0.02):
        return (scale * jax.random.normal(k, shape)).astype(jnp.float32)

    params = {
        "tok_emb": nrm(next(ki), (n_vocab, D), 0.02),
        "pos_emb": nrm(next(ki), (n_token, D), 0.01),
        "lnf_g": jnp.ones((1, D), jnp.float32),
        "lnf_b": jnp.zeros((1, D), jnp.float32),
        "layers": [],
    }
    for _ in range(n_layers):
        lp = {
            "ln1_g": jnp.ones((1, D), jnp.float32),
            "ln1_b": jnp.zeros((1, D), jnp.float32),
            "wqkv": nrm(next(ki), (D, 3 * D)),
            "bqkv": nrm(next(ki), (1, 3 * D), 0.01),
            "wo": nrm(next(ki), (D, D)),
            "bo": nrm(next(ki), (1, D), 0.01),
            "ln2_g": jnp.ones((1, D), jnp.float32),
            "ln2_b": jnp.zeros((1, D), jnp.float32),
            "w1": nrm(next(ki), (D, 4 * D)),
            "b1": nrm(next(ki), (1, 4 * D), 0.01),
            "w2": nrm(next(ki), (4 * D, D)),
            "b2": nrm(next(ki), (1, D), 0.01),
        }
        params["layers"].append(lp)
    return params


# ----------------------------------------------------------------------------
if __name__ == "__main__":
    # Small config structurally identical to CLIP(49408, 768, 77, 12 heads, 12 layers)
    B, S, D, H, V, L = 2, 16, 128, 4, 512, 2

    key = jax.random.PRNGKey(0)
    k_par, k_tok = jax.random.split(key)
    params = make_params(k_par, V, D, S, L)
    tokens = jax.random.randint(k_tok, (B, S), 0, V, dtype=jnp.int32)

    # Weight stacking / bf16 casting happens once, outside the forward path.
    prepared = prepare_clip_weights(params)

    out = jax.block_until_ready(clip_forward(tokens, prepared, H))
    ref_mixed = jax.block_until_ready(clip_reference(tokens, params, H, jnp.bfloat16))
    ref_f32 = jax.block_until_ready(clip_reference(tokens, params, H, jnp.float32))

    assert out.shape == (B, S, D), out.shape
    # Check vs. a reference using the same bf16 matmul-operand rounding.
    assert jnp.allclose(out, ref_mixed, atol=2e-2, rtol=2e-2), (
        float(jnp.max(jnp.abs(out - ref_mixed))))
    # Looser sanity check vs. the exact f32 (PyTorch-mirroring) reference.
    assert jnp.allclose(out, ref_f32, atol=5e-2, rtol=5e-2), (
        float(jnp.max(jnp.abs(out - ref_f32))))
    print("KERNEL_OK")
</pallas_src>

<mosaic_0001>
module attributes {stable_mosaic.version = 11 : i64} {
  func.func @clip_layers_kernel(%arg0: i32, %arg1: memref<2x16x128xf32, #tpu.memory_space<vmem>>, %arg2: memref<1x1x128xf32, #tpu.memory_space<vmem>>, %arg3: memref<1x1x128xf32, #tpu.memory_space<vmem>>, %arg4: memref<1x128x384xbf16, #tpu.memory_space<vmem>>, %arg5: memref<1x1x384xf32, #tpu.memory_space<vmem>>, %arg6: memref<1x128x128xbf16, #tpu.memory_space<vmem>>, %arg7: memref<1x1x128xf32, #tpu.memory_space<vmem>>, %arg8: memref<1x1x128xf32, #tpu.memory_space<vmem>>, %arg9: memref<1x1x128xf32, #tpu.memory_space<vmem>>, %arg10: memref<1x128x512xbf16, #tpu.memory_space<vmem>>, %arg11: memref<1x1x512xf32, #tpu.memory_space<vmem>>, %arg12: memref<1x512x128xbf16, #tpu.memory_space<vmem>>, %arg13: memref<1x1x128xf32, #tpu.memory_space<vmem>>, %arg14: memref<1x128xf32, #tpu.memory_space<vmem>>, %arg15: memref<1x128xf32, #tpu.memory_space<vmem>>, %arg16: memref<2x16x128xf32, #tpu.memory_space<vmem>>) attributes {dimension_semantics = [#tpu.dimension_semantics<arbitrary>], iteration_bounds = array<i64: 2>, scalar_prefetch = 0 : i64, scratch_operands = 0 : i64, tpu.core_type = #tpu.core_type<tc>, window_params = [{pipeline_mode = #tpu.pipeline_mode<synchronous>, transform_indices = @transform_0, window_bounds = array<i64: 2, 16, 128>}, {transform_indices = @transform_1, window_bounds = array<i64: 1, 1, 128>}, {transform_indices = @transform_2, window_bounds = array<i64: 1, 1, 128>}, {transform_indices = @transform_3, window_bounds = array<i64: 1, 128, 384>}, {transform_indices = @transform_4, window_bounds = array<i64: 1, 1, 384>}, {transform_indices = @transform_5, window_bounds = array<i64: 1, 128, 128>}, {transform_indices = @transform_6, window_bounds = array<i64: 1, 1, 128>}, {transform_indices = @transform_7, window_bounds = array<i64: 1, 1, 128>}, {transform_indices = @transform_8, window_bounds = array<i64: 1, 1, 128>}, {transform_indices = @transform_9, window_bounds = array<i64: 1, 128, 512>}, {transform_indices = @transform_10, window_bounds = array<i64: 1, 1, 512>}, {transform_indices = @transform_11, window_bounds = array<i64: 1, 512, 128>}, {transform_indices = @transform_12, window_bounds = array<i64: 1, 1, 128>}, {pipeline_mode = #tpu.pipeline_mode<synchronous>, transform_indices = @transform_13, window_bounds = array<i64: 1, 128>}, {pipeline_mode = #tpu.pipeline_mode<synchronous>, transform_indices = @transform_14, window_bounds = array<i64: 1, 128>}, {pipeline_mode = #tpu.pipeline_mode<synchronous>, transform_indices = @transform_15, window_bounds = array<i64: 2, 16, 128>}]} {
    %c0_i32 = arith.constant 0 : i32
    %0 = arith.cmpi eq, %arg0, %c0_i32 : i32
    %1 = arith.extui %0 : i1 to i32
    %c0_i32_0 = arith.constant 0 : i32
    %2 = arith.cmpi ne, %1, %c0_i32_0 : i32
    scf.if %2 {
      %c0_99 = arith.constant 0 : index
      %c0_100 = arith.constant 0 : index
      %c0_101 = arith.constant 0 : index
      %285 = vector.load %arg1[%c0_99, %c0_100, %c0_101] : memref<2x16x128xf32, #tpu.memory_space<vmem>>, vector<2x16x128xf32>
      %c0_102 = arith.constant 0 : index
      %c0_103 = arith.constant 0 : index
      %c0_104 = arith.constant 0 : index
      %286 = vector.load %arg16[%c0_102, %c0_103, %c0_104] : memref<2x16x128xf32, #tpu.memory_space<vmem>>, vector<2x16x128xf32>
      tpu.vector_store %arg16[%c0_102, %c0_103, %c0_104], %285 {strides = array<i32>} : memref<2x16x128xf32, #tpu.memory_space<vmem>>, vector<2x16x128xf32>,
    } else {
    }
    %c0 = arith.constant 0 : index
    %c0_1 = arith.constant 0 : index
    %c0_2 = arith.constant 0 : index
    %3 = vector.load %arg16[%c0, %c0_1, %c0_2] : memref<2x16x128xf32, #tpu.memory_space<vmem>>, vector<2x16x128xf32>
    %4 = vector.shape_cast %3 : vector<2x16x128xf32> to vector<32x128xf32>
    %c0_3 = arith.constant 0 : index
    %c0_4 = arith.constant 0 : index
    %c0_5 = arith.constant 0 : index
    %5 = vector.load %arg2[%c0_3, %c0_4, %c0_5] : memref<1x1x128xf32, #tpu.memory_space<vmem>>, vector<1x1x128xf32>
    %6 = vector.shape_cast %5 : vector<1x1x128xf32> to vector<1x128xf32>
    %c0_6 = arith.constant 0 : index
    %c0_7 = arith.constant 0 : index
    %c0_8 = arith.constant 0 : index
    %7 = vector.load %arg3[%c0_6, %c0_7, %c0_8] : memref<1x1x128xf32, #tpu.memory_space<vmem>>, vector<1x1x128xf32>
    %8 = vector.shape_cast %7 : vector<1x1x128xf32> to vector<1x128xf32>
    %cst = arith.constant dense<0.000000e+00> : vector<32xf32>
    %9 = vector.multi_reduction <add>, %4, %cst [1] : vector<32x128xf32> to vector<32xf32>
    %10 = vector.shape_cast %9 : vector<32xf32> to vector<32x1xf32>
    %cst_9 = arith.constant 1.280000e+02 : f32
    %11 = vector.broadcast %cst_9 : f32 to vector<32x1xf32>
    %12 = arith.divf %10, %11 : vector<32x1xf32>
    %13 = vector.broadcast %12 : vector<32x1xf32> to vector<32x128xf32>
    %14 = arith.subf %4, %13 : vector<32x128xf32>
    %15 = arith.mulf %14, %14 : vector<32x128xf32>
    %cst_10 = arith.constant dense<0.000000e+00> : vector<32xf32>
    %16 = vector.multi_reduction <add>, %15, %cst_10 [1] : vector<32x128xf32> to vector<32xf32>
    %17 = vector.shape_cast %16 : vector<32xf32> to vector<32x1xf32>
    %cst_11 = arith.constant 1.280000e+02 : f32
    %18 = vector.broadcast %cst_11 : f32 to vector<32x1xf32>
    %19 = arith.divf %17, %18 : vector<32x1xf32>
    %20 = vector.broadcast %12 : vector<32x1xf32> to vector<32x128xf32>
    %21 = arith.subf %4, %20 : vector<32x128xf32>
    %cst_12 = arith.constant 9.99999974E-6 : f32
    %22 = vector.broadcast %cst_12 : f32 to vector<32x1xf32>
    %23 = arith.addf %19, %22 : vector<32x1xf32>
    %24 = math.rsqrt %23 : vector<32x1xf32>
    %25 = vector.broadcast %24 : vector<32x1xf32> to vector<32x128xf32>
    %26 = arith.mulf %21, %25 : vector<32x128xf32>
    %27 = vector.broadcast %6 : vector<1x128xf32> to vector<32x128xf32>
    %28 = arith.mulf %26, %27 : vector<32x128xf32>
    %29 = vector.broadcast %8 : vector<1x128xf32> to vector<32x128xf32>
    %30 = arith.addf %28, %29 : vector<32x128xf32>
    %31 = arith.truncf %30 : vector<32x128xf32> to vector<32x128xbf16>
    %c0_13 = arith.constant 0 : index
    %c0_14 = arith.constant 0 : index
    %c0_15 = arith.constant 0 : index
    %32 = vector.load %arg4[%c0_13, %c0_14, %c0_15] : memref<1x128x384xbf16, #tpu.memory_space<vmem>>, vector<1x128x384xbf16>
    %33 = vector.shape_cast %32 : vector<1x128x384xbf16> to vector<128x384xbf16>
    %cst_16 = arith.constant dense<0.000000e+00> : vector<32x384xf32>
    %34 = tpu.matmul %31, %33, %cst_16 {dimension_numbers = #tpu.dot_dimension_numbers<[1], [0], [0], [1], [0, 0, 1, 1], [], []>} : vector<32x128xbf16>, vector<128x384xbf16>, vector<32x384xf32> -> vector<32x384xf32>
    %c0_17 = arith.constant 0 : index
    %c0_18 = arith.constant 0 : index
    %c0_19 = arith.constant 0 : index
    %35 = vector.load %arg5[%c0_17, %c0_18, %c0_19] : memref<1x1x384xf32, #tpu.memory_space<vmem>>, vector<1x1x384xf32>
    %36 = vector.shape_cast %35 : vector<1x1x384xf32> to vector<1x384xf32>
    %37 = vector.broadcast %36 : vector<1x384xf32> to vector<32x384xf32>
    %38 = arith.addf %34, %37 : vector<32x384xf32>
    %39 = vector.extract_strided_slice %38 {offsets = [0, 0], sizes = [32, 128], strides = [1, 1]} : vector<32x384xf32> to vector<32x128xf32>
    %40 = vector.extract_strided_slice %38 {offsets = [0, 128], sizes = [32, 128], strides = [1, 1]} : vector<32x384xf32> to vector<32x128xf32>
    %41 = vector.extract_strided_slice %38 {offsets = [0, 256], sizes = [32, 128], strides = [1, 1]} : vector<32x384xf32> to vector<32x128xf32>
    %42 = tpu.iota {dimensions = array<i32: 0>} : vector<16x16xi32>
    %43 = tpu.iota {dimensions = array<i32: 1>} : vector<16x16xi32>
    %44 = arith.cmpi sgt, %43, %42 : vector<16x16xi32>
    %cst_20 = arith.constant -1.000000e+30 : f32
    %cst_21 = arith.constant 0.000000e+00 : f32
    %45 = vector.broadcast %cst_20 : f32 to vector<16x16xf32>
    %46 = vector.broadcast %cst_21 : f32 to vector<16x16xf32>
    %47 = arith.select %44, %45, %46 : vector<16x16xi1>, vector<16x16xf32>
    %48 = vector.extract_strided_slice %39 {offsets = [0, 0], sizes = [16, 32], strides = [1, 1]} : vector<32x128xf32> to vector<16x32xf32>
    %49 = arith.truncf %48 : vector<16x32xf32> to vector<16x32xbf16>
    %50 = vector.extract_strided_slice %40 {offsets = [0, 0], sizes = [16, 32], strides = [1, 1]} : vector<32x128xf32> to vector<16x32xf32>
    %51 = arith.truncf %50 : vector<16x32xf32> to vector<16x32xbf16>
    %52 = vector.extract_strided_slice %41 {offsets = [0, 0], sizes = [16, 32], strides = [1, 1]} : vector<32x128xf32> to vector<16x32xf32>
    %53 = arith.truncf %52 : vector<16x32xf32> to vector<16x32xbf16>
    %cst_22 = arith.constant dense<0.000000e+00> : vector<16x16xf32>
    %54 = tpu.matmul %49, %51, %cst_22 {dimension_numbers = #tpu.dot_dimension_numbers<[1], [1], [0], [0], [0, 0, 1, 0], [], []>} : vector<16x32xbf16>, vector<16x32xbf16>, vector<16x16xf32> -> vector<16x16xf32>
    %cst_23 = arith.constant 0.176776692 : f32
    %55 = vector.broadcast %cst_23 : f32 to vector<16x16xf32>
    %56 = arith.mulf %54, %55 : vector<16x16xf32>
    %57 = arith.addf %56, %47 : vector<16x16xf32>
    %cst_24 = arith.constant dense<0xFF800000> : vector<16xf32>
    %58 = vector.multi_reduction <maximumf>, %57, %cst_24 [1] : vector<16x16xf32> to vector<16xf32>
    %59 = vector.shape_cast %58 : vector<16xf32> to vector<16x1xf32>
    %60 = vector.broadcast %59 : vector<16x1xf32> to vector<16x16xf32>
    %61 = arith.subf %57, %60 : vector<16x16xf32>
    %62 = math.exp %61 : vector<16x16xf32>
    %cst_25 = arith.constant dense<0.000000e+00> : vector<16xf32>
    %63 = vector.multi_reduction <add>, %62, %cst_25 [1] : vector<16x16xf32> to vector<16xf32>
    %64 = vector.shape_cast %63 : vector<16xf32> to vector<16x1xf32>
    %65 = vector.broadcast %64 : vector<16x1xf32> to vector<16x16xf32>
    %66 = arith.divf %62, %65 : vector<16x16xf32>
    %67 = arith.truncf %66 : vector<16x16xf32> to vector<16x16xbf16>
    %cst_26 = arith.constant dense<0.000000e+00> : vector<16x32xf32>
    %68 = tpu.matmul %67, %53, %cst_26 {dimension_numbers = #tpu.dot_dimension_numbers<[1], [0], [0], [1], [0, 0, 1, 1], [], []>} : vector<16x16xbf16>, vector<16x32xbf16>, vector<16x32xf32> -> vector<16x32xf32>
    %69 = vector.extract_strided_slice %39 {offsets = [0, 32], sizes = [16, 32], strides = [1, 1]} : vector<32x128xf32> to vector<16x32xf32>
    %70 = arith.truncf %69 : vector<16x32xf32> to vector<16x32xbf16>
    %71 = vector.extract_strided_slice %40 {offsets = [0, 32], sizes = [16, 32], strides = [1, 1]} : vector<32x128xf32> to vector<16x32xf32>
    %72 = arith.truncf %71 : vector<16x32xf32> to vector<16x32xbf16>
    %73 = vector.extract_strided_slice %41 {offsets = [0, 32], sizes = [16, 32], strides = [1, 1]} : vector<32x128xf32> to vector<16x32xf32>
    %74 = arith.truncf %73 : vector<16x32xf32> to vector<16x32xbf16>
    %cst_27 = arith.constant dense<0.000000e+00> : vector<16x16xf32>
    %75 = tpu.matmul %70, %72, %cst_27 {dimension_numbers = #tpu.dot_dimension_numbers<[1], [1], [0], [0], [0, 0, 1, 0], [], []>} : vector<16x32xbf16>, vector<16x32xbf16>, vector<16x16xf32> -> vector<16x16xf32>
    %cst_28 = arith.constant 0.176776692 : f32
    %76 = vector.broadcast %cst_28 : f32 to vector<16x16xf32>
    %77 = arith.mulf %75, %76 : vector<16x16xf32>
    %78 = arith.addf %77, %47 : vector<16x16xf32>
    %cst_29 = arith.constant dense<0xFF800000> : vector<16xf32>
    %79 = vector.multi_reduction <maximumf>, %78, %cst_29 [1] : vector<16x16xf32> to vector<16xf32>
    %80 = vector.shape_cast %79 : vector<16xf32> to vector<16x1xf32>
    %81 = vector.broadcast %80 : vector<16x1xf32> to vector<16x16xf32>
    %82 = arith.subf %78, %81 : vector<16x16xf32>
    %83 = math.exp %82 : vector<16x16xf32>
    %cst_30 = arith.constant dense<0.000000e+00> : vector<16xf32>
    %84 = vector.multi_reduction <add>, %83, %cst_30 [1] : vector<16x16xf32> to vector<16xf32>
    %85 = vector.shape_cast %84 : vector<16xf32> to vector<16x1xf32>
    %86 = vector.broadcast %85 : vector<16x1xf32> to vector<16x16xf32>
    %87 = arith.divf %83, %86 : vector<16x16xf32>
    %88 = arith.truncf %87 : vector<16x16xf32> to vector<16x16xbf16>
    %cst_31 = arith.constant dense<0.000000e+00> : vector<16x32xf32>
    %89 = tpu.matmul %88, %74, %cst_31 {dimension_numbers = #tpu.dot_dimension_numbers<[1], [0], [0], [1], [0, 0, 1, 1], [], []>} : vector<16x16xbf16>, vector<16x32xbf16>, vector<16x32xf32> -> vector<16x32xf32>
    %90 = vector.extract_strided_slice %39 {offsets = [0, 64], sizes = [16, 32], strides = [1, 1]} : vector<32x128xf32> to vector<16x32xf32>
    %91 = arith.truncf %90 : vector<16x32xf32> to vector<16x32xbf16>
    %92 = vector.extract_strided_slice %40 {offsets = [0, 64], sizes = [16, 32], strides = [1, 1]} : vector<32x128xf32> to vector<16x32xf32>
    %93 = arith.truncf %92 : vector<16x32xf32> to vector<16x32xbf16>
    %94 = vector.extract_strided_slice %41 {offsets = [0, 64], sizes = [16, 32], strides = [1, 1]} : vector<32x128xf32> to vector<16x32xf32>
    %95 = arith.truncf %94 : vector<16x32xf32> to vector<16x32xbf16>
    %cst_32 = arith.constant dense<0.000000e+00> : vector<16x16xf32>
    %96 = tpu.matmul %91, %93, %cst_32 {dimension_numbers = #tpu.dot_dimension_numbers<[1], [1], [0], [0], [0, 0, 1, 0], [], []>} : vector<16x32xbf16>, vector<16x32xbf16>, vector<16x16xf32> -> vector<16x16xf32>
    %cst_33 = arith.constant 0.176776692 : f32
    %97 = vector.broadcast %cst_33 : f32 to vector<16x16xf32>
    %98 = arith.mulf %96, %97 : vector<16x16xf32>
    %99 = arith.addf %98, %47 : vector<16x16xf32>
    %cst_34 = arith.constant dense<0xFF800000> : vector<16xf32>
    %100 = vector.multi_reduction <maximumf>, %99, %cst_34 [1] : vector<16x16xf32> to vector<16xf32>
    %101 = vector.shape_cast %100 : vector<16xf32> to vector<16x1xf32>
    %102 = vector.broadcast %101 : vector<16x1xf32> to vector<16x16xf32>
    %103 = arith.subf %99, %102 : vector<16x16xf32>
    %104 = math.exp %103 : vector<16x16xf32>
    %cst_35 = arith.constant dense<0.000000e+00> : vector<16xf32>
    %105 = vector.multi_reduction <add>, %104, %cst_35 [1] : vector<16x16xf32> to vector<16xf32>
    %106 = vector.shape_cast %105 : vector<16xf32> to vector<16x1xf32>
    %107 = vector.broadcast %106 : vector<16x1xf32> to vector<16x16xf32>
    %108 = arith.divf %104, %107 : vector<16x16xf32>
    %109 = arith.truncf %108 : vector<16x16xf32> to vector<16x16xbf16>
    %cst_36 = arith.constant dense<0.000000e+00> : vector<16x32xf32>
    %110 = tpu.matmul %109, %95, %cst_36 {dimension_numbers = #tpu.dot_dimension_numbers<[1], [0], [0], [1], [0, 0, 1, 1], [], []>} : vector<16x16xbf16>, vector<16x32xbf16>, vector<16x32xf32> -> vector<16x32xf32>
    %111 = vector.extract_strided_slice %39 {offsets = [0, 96], sizes = [16, 32], strides = [1, 1]} : vector<32x128xf32> to vector<16x32xf32>
    %112 = arith.truncf %111 : vector<16x32xf32> to vector<16x32xbf16>
    %113 = vector.extract_strided_slice %40 {offsets = [0, 96], sizes = [16, 32], strides = [1, 1]} : vector<32x128xf32> to vector<16x32xf32>
    %114 = arith.truncf %113 : vector<16x32xf32> to vector<16x32xbf16>
    %115 = vector.extract_strided_slice %41 {offsets = [0, 96], sizes = [16, 32], strides = [1, 1]} : vector<32x128xf32> to vector<16x32xf32>
    %116 = arith.truncf %115 : vector<16x32xf32> to vector<16x32xbf16>
    %cst_37 = arith.constant dense<0.000000e+00> : vector<16x16xf32>
    %117 = tpu.matmul %112, %114, %cst_37 {dimension_numbers = #tpu.dot_dimension_numbers<[1], [1], [0], [0], [0, 0, 1, 0], [], []>} : vector<16x32xbf16>, vector<16x32xbf16>, vector<16x16xf32> -> vector<16x16xf32>
    %cst_38 = arith.constant 0.176776692 : f32
    %118 = vector.broadcast %cst_38 : f32 to vector<16x16xf32>
    %119 = arith.mulf %117, %118 : vector<16x16xf32>
    %120 = arith.addf %119, %47 : vector<16x16xf32>
    %cst_39 = arith.constant dense<0xFF800000> : vector<16xf32>
    %121 = vector.multi_reduction <maximumf>, %120, %cst_39 [1] : vector<16x16xf32> to vector<16xf32>
    %122 = vector.shape_cast %121 : vector<16xf32> to vector<16x1xf32>
    %123 = vector.broadcast %122 : vector<16x1xf32> to vector<16x16xf32>
    %124 = arith.subf %120, %123 : vector<16x16xf32>
    %125 = math.exp %124 : vector<16x16xf32>
    %cst_40 = arith.constant dense<0.000000e+00> : vector<16xf32>
    %126 = vector.multi_reduction <add>, %125, %cst_40 [1] : vector<16x16xf32> to vector<16xf32>
    %127 = vector.shape_cast %126 : vector<16xf32> to vector<16x1xf32>
    %128 = vector.broadcast %127 : vector<16x1xf32> to vector<16x16xf32>
    %129 = arith.divf %125, %128 : vector<16x16xf32>
    %130 = arith.truncf %129 : vector<16x16xf32> to vector<16x16xbf16>
    %cst_41 = arith.constant dense<0.000000e+00> : vector<16x32xf32>
    %131 = tpu.matmul %130, %116, %cst_41 {dimension_numbers = #tpu.dot_dimension_numbers<[1], [0], [0], [1], [0, 0, 1, 1], [], []>} : vector<16x16xbf16>, vector<16x32xbf16>, vector<16x32xf32> -> vector<16x32xf32>
    %132 = tpu.concatenate %68, %89, %110, %131 in 1 : vector<16x32xf32>, vector<16x32xf32>, vector<16x32xf32>, vector<16x32xf32> -> vector<16x128xf32>
    %133 = vector.extract_strided_slice %39 {offsets = [16, 0], sizes = [16, 32], strides = [1, 1]} : vector<32x128xf32> to vector<16x32xf32>
    %134 = arith.truncf %133 : vector<16x32xf32> to vector<16x32xbf16>
    %135 = vector.extract_strided_slice %40 {offsets = [16, 0], sizes = [16, 32], strides = [1, 1]} : vector<32x128xf32> to vector<16x32xf32>
    %136 = arith.truncf %135 : vector<16x32xf32> to vector<16x32xbf16>
    %137 = vector.extract_strided_slice %41 {offsets = [16, 0], sizes = [16, 32], strides = [1, 1]} : vector<32x128xf32> to vector<16x32xf32>
    %138 = arith.truncf %137 : vector<16x32xf32> to vector<16x32xbf16>
    %cst_42 = arith.constant dense<0.000000e+00> : vector<16x16xf32>
    %139 = tpu.matmul %134, %136, %cst_42 {dimension_numbers = #tpu.dot_dimension_numbers<[1], [1], [0], [0], [0, 0, 1, 0], [], []>} : vector<16x32xbf16>, vector<16x32xbf16>, vector<16x16xf32> -> vector<16x16xf32>
    %cst_43 = arith.constant 0.176776692 : f32
    %140 = vector.broadcast %cst_43 : f32 to vector<16x16xf32>
    %141 = arith.mulf %139, %140 : vector<16x16xf32>
    %142 = arith.addf %141, %47 : vector<16x16xf32>
    %cst_44 = arith.constant dense<0xFF800000> : vector<16xf32>
    %143 = vector.multi_reduction <maximumf>, %142, %cst_44 [1] : vector<16x16xf32> to vector<16xf32>
    %144 = vector.shape_cast %143 : vector<16xf32> to vector<16x1xf32>
    %145 = vector.broadcast %144 : vector<16x1xf32> to vector<16x16xf32>
    %146 = arith.subf %142, %145 : vector<16x16xf32>
    %147 = math.exp %146 : vector<16x16xf32>
    %cst_45 = arith.constant dense<0.000000e+00> : vector<16xf32>
    %148 = vector.multi_reduction <add>, %147, %cst_45 [1] : vector<16x16xf32> to vector<16xf32>
    %149 = vector.shape_cast %148 : vector<16xf32> to vector<16x1xf32>
    %150 = vector.broadcast %149 : vector<16x1xf32> to vector<16x16xf32>
    %151 = arith.divf %147, %150 : vector<16x16xf32>
    %152 = arith.truncf %151 : vector<16x16xf32> to vector<16x16xbf16>
    %cst_46 = arith.constant dense<0.000000e+00> : vector<16x32xf32>
    %153 = tpu.matmul %152, %138, %cst_46 {dimension_numbers = #tpu.dot_dimension_numbers<[1], [0], [0], [1], [0, 0, 1, 1], [], []>} : vector<16x16xbf16>, vector<16x32xbf16>, vector<16x32xf32> -> vector<16x32xf32>
    %154 = vector.extract_strided_slice %39 {offsets = [16, 32], sizes = [16, 32], strides = [1, 1]} : vector<32x128xf32> to vector<16x32xf32>
    %155 = arith.truncf %154 : vector<16x32xf32> to vector<16x32xbf16>
    %156 = vector.extract_strided_slice %40 {offsets = [16, 32], sizes = [16, 32], strides = [1, 1]} : vector<32x128xf32> to vector<16x32xf32>
    %157 = arith.truncf %156 : vector<16x32xf32> to vector<16x32xbf16>
    %158 = vector.extract_strided_slice %41 {offsets = [16, 32], sizes = [16, 32], strides = [1, 1]} : vector<32x128xf32> to vector<16x32xf32>
    %159 = arith.truncf %158 : vector<16x32xf32> to vector<16x32xbf16>
    %cst_47 = arith.constant dense<0.000000e+00> : vector<16x16xf32>
    %160 = tpu.matmul %155, %157, %cst_47 {dimension_numbers = #tpu.dot_dimension_numbers<[1], [1], [0], [0], [0, 0, 1, 0], [], []>} : vector<16x32xbf16>, vector<16x32xbf16>, vector<16x16xf32> -> vector<16x16xf32>
    %cst_48 = arith.constant 0.176776692 : f32
    %161 = vector.broadcast %cst_48 : f32 to vector<16x16xf32>
    %162 = arith.mulf %160, %161 : vector<16x16xf32>
    %163 = arith.addf %162, %47 : vector<16x16xf32>
    %cst_49 = arith.constant dense<0xFF800000> : vector<16xf32>
    %164 = vector.multi_reduction <maximumf>, %163, %cst_49 [1] : vector<16x16xf32> to vector<16xf32>
    %165 = vector.shape_cast %164 : vector<16xf32> to vector<16x1xf32>
    %166 = vector.broadcast %165 : vector<16x1xf32> to vector<16x16xf32>
    %167 = arith.subf %163, %166 : vector<16x16xf32>
    %168 = math.exp %167 : vector<16x16xf32>
    %cst_50 = arith.constant dense<0.000000e+00> : vector<16xf32>
    %169 = vector.multi_reduction <add>, %168, %cst_50 [1] : vector<16x16xf32> to vector<16xf32>
    %170 = vector.shape_cast %169 : vector<16xf32> to vector<16x1xf32>
    %171 = vector.broadcast %170 : vector<16x1xf32> to vector<16x16xf32>
    %172 = arith.divf %168, %171 : vector<16x16xf32>
    %173 = arith.truncf %172 : vector<16x16xf32> to vector<16x16xbf16>
    %cst_51 = arith.constant dense<0.000000e+00> : vector<16x32xf32>
    %174 = tpu.matmul %173, %159, %cst_51 {dimension_numbers = #tpu.dot_dimension_numbers<[1], [0], [0], [1], [0, 0, 1, 1], [], []>} : vector<16x16xbf16>, vector<16x32xbf16>, vector<16x32xf32> -> vector<16x32xf32>
    %175 = vector.extract_strided_slice %39 {offsets = [16, 64], sizes = [16, 32], strides = [1, 1]} : vector<32x128xf32> to vector<16x32xf32>
    %176 = arith.truncf %175 : vector<16x32xf32> to vector<16x32xbf16>
    %177 = vector.extract_strided_slice %40 {offsets = [16, 64], sizes = [16, 32], strides = [1, 1]} : vector<32x128xf32> to vector<16x32xf32>
    %178 = arith.truncf %177 : vector<16x32xf32> to vector<16x32xbf16>
    %179 = vector.extract_strided_slice %41 {offsets = [16, 64], sizes = [16, 32], strides = [1, 1]} : vector<32x128xf32> to vector<16x32xf32>
    %180 = arith.truncf %179 : vector<16x32xf32> to vector<16x32xbf16>
    %cst_52 = arith.constant dense<0.000000e+00> : vector<16x16xf32>
    %181 = tpu.matmul %176, %178, %cst_52 {dimension_numbers = #tpu.dot_dimension_numbers<[1], [1], [0], [0], [0, 0, 1, 0], [], []>} : vector<16x32xbf16>, vector<16x32xbf16>, vector<16x16xf32> -> vector<16x16xf32>
    %cst_53 = arith.constant 0.176776692 : f32
    %182 = vector.broadcast %cst_53 : f32 to vector<16x16xf32>
    %183 = arith.mulf %181, %182 : vector<16x16xf32>
    %184 = arith.addf %183, %47 : vector<16x16xf32>
    %cst_54 = arith.constant dense<0xFF800000> : vector<16xf32>
    %185 = vector.multi_reduction <maximumf>, %184, %cst_54 [1] : vector<16x16xf32> to vector<16xf32>
    %186 = vector.shape_cast %185 : vector<16xf32> to vector<16x1xf32>
    %187 = vector.broadcast %186 : vector<16x1xf32> to vector<16x16xf32>
    %188 = arith.subf %184, %187 : vector<16x16xf32>
    %189 = math.exp %188 : vector<16x16xf32>
    %cst_55 = arith.constant dense<0.000000e+00> : vector<16xf32>
    %190 = vector.multi_reduction <add>, %189, %cst_55 [1] : vector<16x16xf32> to vector<16xf32>
    %191 = vector.shape_cast %190 : vector<16xf32> to vector<16x1xf32>
    %192 = vector.broadcast %191 : vector<16x1xf32> to vector<16x16xf32>
    %193 = arith.divf %189, %192 : vector<16x16xf32>
    %194 = arith.truncf %193 : vector<16x16xf32> to vector<16x16xbf16>
    %cst_56 = arith.constant dense<0.000000e+00> : vector<16x32xf32>
    %195 = tpu.matmul %194, %180, %cst_56 {dimension_numbers = #tpu.dot_dimension_numbers<[1], [0], [0], [1], [0, 0, 1, 1], [], []>} : vector<16x16xbf16>, vector<16x32xbf16>, vector<16x32xf32> -> vector<16x32xf32>
    %196 = vector.extract_strided_slice %39 {offsets = [16, 96], sizes = [16, 32], strides = [1, 1]} : vector<32x128xf32> to vector<16x32xf32>
    %197 = arith.truncf %196 : vector<16x32xf32> to vector<16x32xbf16>
    %198 = vector.extract_strided_slice %40 {offsets = [16, 96], sizes = [16, 32], strides = [1, 1]} : vector<32x128xf32> to vector<16x32xf32>
    %199 = arith.truncf %198 : vector<16x32xf32> to vector<16x32xbf16>
    %200 = vector.extract_strided_slice %41 {offsets = [16, 96], sizes = [16, 32], strides = [1, 1]} : vector<32x128xf32> to vector<16x32xf32>
    %201 = arith.truncf %200 : vector<16x32xf32> to vector<16x32xbf16>
    %cst_57 = arith.constant dense<0.000000e+00> : vector<16x16xf32>
    %202 = tpu.matmul %197, %199, %cst_57 {dimension_numbers = #tpu.dot_dimension_numbers<[1], [1], [0], [0], [0, 0, 1, 0], [], []>} : vector<16x32xbf16>, vector<16x32xbf16>, vector<16x16xf32> -> vector<16x16xf32>
    %cst_58 = arith.constant 0.176776692 : f32
    %203 = vector.broadcast %cst_58 : f32 to vector<16x16xf32>
    %204 = arith.mulf %202, %203 : vector<16x16xf32>
    %205 = arith.addf %204, %47 : vector<16x16xf32>
    %cst_59 = arith.constant dense<0xFF800000> : vector<16xf32>
    %206 = vector.multi_reduction <maximumf>, %205, %cst_59 [1] : vector<16x16xf32> to vector<16xf32>
    %207 = vector.shape_cast %206 : vector<16xf32> to vector<16x1xf32>
    %208 = vector.broadcast %207 : vector<16x1xf32> to vector<16x16xf32>
    %209 = arith.subf %205, %208 : vector<16x16xf32>
    %210 = math.exp %209 : vector<16x16xf32>
    %cst_60 = arith.constant dense<0.000000e+00> : vector<16xf32>
    %211 = vector.multi_reduction <add>, %210, %cst_60 [1] : vector<16x16xf32> to vector<16xf32>
    %212 = vector.shape_cast %211 : vector<16xf32> to vector<16x1xf32>
    %213 = vector.broadcast %212 : vector<16x1xf32> to vector<16x16xf32>
    %214 = arith.divf %210, %213 : vector<16x16xf32>
    %215 = arith.truncf %214 : vector<16x16xf32> to vector<16x16xbf16>
    %cst_61 = arith.constant dense<0.000000e+00> : vector<16x32xf32>
    %216 = tpu.matmul %215, %201, %cst_61 {dimension_numbers = #tpu.dot_dimension_numbers<[1], [0], [0], [1], [0, 0, 1, 1], [], []>} : vector<16x16xbf16>, vector<16x32xbf16>, vector<16x32xf32> -> vector<16x32xf32>
    %217 = tpu.concatenate %153, %174, %195, %216 in 1 : vector<16x32xf32>, vector<16x32xf32>, vector<16x32xf32>, vector<16x32xf32> -> vector<16x128xf32>
    %218 = tpu.concatenate %132, %217 in 0 : vector<16x128xf32>, vector<16x128xf32> -> vector<32x128xf32>
    %219 = arith.truncf %218 : vector<32x128xf32> to vector<32x128xbf16>
    %c0_62 = arith.constant 0 : index
    %c0_63 = arith.constant 0 : index
    %c0_64 = arith.constant 0 : index
    %220 = vector.load %arg6[%c0_62, %c0_63, %c0_64] : memref<1x128x128xbf16, #tpu.memory_space<vmem>>, vector<1x128x128xbf16>
    %221 = vector.shape_cast %220 : vector<1x128x128xbf16> to vector<128x128xbf16>
    %cst_65 = arith.constant dense<0.000000e+00> : vector<32x128xf32>
    %222 = tpu.matmul %219, %221, %cst_65 {dimension_numbers = #tpu.dot_dimension_numbers<[1], [0], [0], [1], [0, 0, 1, 1], [], []>} : vector<32x128xbf16>, vector<128x128xbf16>, vector<32x128xf32> -> vector<32x128xf32>
    %223 = arith.addf %4, %222 : vector<32x128xf32>
    %c0_66 = arith.constant 0 : index
    %c0_67 = arith.constant 0 : index
    %c0_68 = arith.constant 0 : index
    %224 = vector.load %arg7[%c0_66, %c0_67, %c0_68] : memref<1x1x128xf32, #tpu.memory_space<vmem>>, vector<1x1x128xf32>
    %225 = vector.shape_cast %224 : vector<1x1x128xf32> to vector<1x128xf32>
    %226 = vector.broadcast %225 : vector<1x128xf32> to vector<32x128xf32>
    %227 = arith.addf %223, %226 : vector<32x128xf32>
    %c0_69 = arith.constant 0 : index
    %c0_70 = arith.constant 0 : index
    %c0_71 = arith.constant 0 : index
    %228 = vector.load %arg8[%c0_69, %c0_70, %c0_71] : memref<1x1x128xf32, #tpu.memory_space<vmem>>, vector<1x1x128xf32>
    %229 = vector.shape_cast %228 : vector<1x1x128xf32> to vector<1x128xf32>
    %c0_72 = arith.constant 0 : index
    %c0_73 = arith.constant 0 : index
    %c0_74 = arith.constant 0 : index
    %230 = vector.load %arg9[%c0_72, %c0_73, %c0_74] : memref<1x1x128xf32, #tpu.memory_space<vmem>>, vector<1x1x128xf32>
    %231 = vector.shape_cast %230 : vector<1x1x128xf32> to vector<1x128xf32>
    %cst_75 = arith.constant dense<0.000000e+00> : vector<32xf32>
    %232 = vector.multi_reduction <add>, %227, %cst_75 [1] : vector<32x128xf32> to vector<32xf32>
    %233 = vector.shape_cast %232 : vector<32xf32> to vector<32x1xf32>
    %cst_76 = arith.constant 1.280000e+02 : f32
    %234 = vector.broadcast %cst_76 : f32 to vector<32x1xf32>
    %235 = arith.divf %233, %234 : vector<32x1xf32>
    %236 = vector.broadcast %235 : vector<32x1xf32> to vector<32x128xf32>
    %237 = arith.subf %227, %236 : vector<32x128xf32>
    %238 = arith.mulf %237, %237 : vector<32x128xf32>
    %cst_77 = arith.constant dense<0.000000e+00> : vector<32xf32>
    %239 = vector.multi_reduction <add>, %238, %cst_77 [1] : vector<32x128xf32> to vector<32xf32>
    %240 = vector.shape_cast %239 : vector<32xf32> to vector<32x1xf32>
    %cst_78 = arith.constant 1.280000e+02 : f32
    %241 = vector.broadcast %cst_78 : f32 to vector<32x1xf32>
    %242 = arith.divf %240, %241 : vector<32x1xf32>
    %243 = vector.broadcast %235 : vector<32x1xf32> to vector<32x128xf32>
    %244 = arith.subf %227, %243 : vector<32x128xf32>
    %cst_79 = arith.constant 9.99999974E-6 : f32
    %245 = vector.broadcast %cst_79 : f32 to vector<32x1xf32>
    %246 = arith.addf %242, %245 : vector<32x1xf32>
    %247 = math.rsqrt %246 : vector<32x1xf32>
    %248 = vector.broadcast %247 : vector<32x1xf32> to vector<32x128xf32>
    %249 = arith.mulf %244, %248 : vector<32x128xf32>
    %250 = vector.broadcast %229 : vector<1x128xf32> to vector<32x128xf32>
    %251 = arith.mulf %249, %250 : vector<32x128xf32>
    %252 = vector.broadcast %231 : vector<1x128xf32> to vector<32x128xf32>
    %253 = arith.addf %251, %252 : vector<32x128xf32>
    %254 = arith.truncf %253 : vector<32x128xf32> to vector<32x128xbf16>
    %c0_80 = arith.constant 0 : index
    %c0_81 = arith.constant 0 : index
    %c0_82 = arith.constant 0 : index
    %255 = vector.load %arg10[%c0_80, %c0_81, %c0_82] : memref<1x128x512xbf16, #tpu.memory_space<vmem>>, vector<1x128x512xbf16>
    %256 = vector.shape_cast %255 : vector<1x128x512xbf16> to vector<128x512xbf16>
    %cst_83 = arith.constant dense<0.000000e+00> : vector<32x512xf32>
    %257 = tpu.matmul %254, %256, %cst_83 {dimension_numbers = #tpu.dot_dimension_numbers<[1], [0], [0], [1], [0, 0, 1, 1], [], []>} : vector<32x128xbf16>, vector<128x512xbf16>, vector<32x512xf32> -> vector<32x512xf32>
    %c0_84 = arith.constant 0 : index
    %c0_85 = arith.constant 0 : index
    %c0_86 = arith.constant 0 : index
    %258 = vector.load %arg11[%c0_84, %c0_85, %c0_86] : memref<1x1x512xf32, #tpu.memory_space<vmem>>, vector<1x1x512xf32>
    %259 = vector.shape_cast %258 : vector<1x1x512xf32> to vector<1x512xf32>
    %260 = vector.broadcast %259 : vector<1x512xf32> to vector<32x512xf32>
    %261 = arith.addf %257, %260 : vector<32x512xf32>
    %cst_87 = arith.constant 1.702000e+00 : f32
    %262 = vector.broadcast %cst_87 : f32 to vector<32x512xf32>
    %263 = arith.mulf %262, %261 : vector<32x512xf32>
    %264 = arith.negf %263 : vector<32x512xf32>
    %265 = math.exp %264 : vector<32x512xf32>
    %cst_88 = arith.constant 1.000000e+00 : f32
    %266 = vector.broadcast %cst_88 : f32 to vector<32x512xf32>
    %267 = arith.addf %266, %265 : vector<32x512xf32>
    %268 = arith.divf %266, %267 : vector<32x512xf32>
    %269 = arith.mulf %261, %268 : vector<32x512xf32>
    %270 = arith.truncf %269 : vector<32x512xf32> to vector<32x512xbf16>
    %c0_89 = arith.constant 0 : index
    %c0_90 = arith.constant 0 : index
    %c0_91 = arith.constant 0 : index
    %271 = vector.load %arg12[%c0_89, %c0_90, %c0_91] : memref<1x512x128xbf16, #tpu.memory_space<vmem>>, vector<1x512x128xbf16>
    %272 = vector.shape_cast %271 : vector<1x512x128xbf16> to vector<512x128xbf16>
    %cst_92 = arith.constant dense<0.000000e+00> : vector<32x128xf32>
    %273 = tpu.matmul %270, %272, %cst_92 {dimension_numbers = #tpu.dot_dimension_numbers<[1], [0], [0], [1], [0, 0, 1, 1], [], []>} : vector<32x512xbf16>, vector<512x128xbf16>, vector<32x128xf32> -> vector<32x128xf32>
    %c0_93 = arith.constant 0 : index
    %c0_94 = arith.constant 0 : index
    %c0_95 = arith.constant 0 : index
    %274 = vector.load %arg13[%c0_93, %c0_94, %c0_95] : memref<1x1x128xf32, #tpu.memory_space<vmem>>, vector<1x1x128xf32>
    %275 = vector.shape_cast %274 : vector<1x1x128xf32> to vector<1x128xf32>
    %276 = vector.broadcast %275 : vector<1x128xf32> to vector<32x128xf32>
    %277 = arith.addf %273, %276 : vector<32x128xf32>
    %278 = arith.addf %227, %277 : vector<32x128xf32>
    %c1_i32 = arith.constant 1 : i32
    %279 = arith.cmpi slt, %arg0, %c1_i32 : i32
    %280 = arith.extui %279 : i1 to i32
    %c0_i32_96 = arith.constant 0 : i32
    %281 = arith.cmpi ne, %280, %c0_i32_96 : i32
    scf.if %281 {
      %285 = vector.shape_cast %278 : vector<32x128xf32> to vector<2x16x128xf32>
      %c0_99 = arith.constant 0 : index
      %c0_100 = arith.constant 0 : index
      %c0_101 = arith.constant 0 : index
      %286 = vector.load %arg16[%c0_99, %c0_100, %c0_101] : memref<2x16x128xf32, #tpu.memory_space<vmem>>, vector<2x16x128xf32>
      tpu.vector_store %arg16[%c0_99, %c0_100, %c0_101], %285 {strides = array<i32>} : memref<2x16x128xf32, #tpu.memory_space<vmem>>, vector<2x16x128xf32>,
    } else {
    }
    %c1_i32_97 = arith.constant 1 : i32
    %282 = arith.cmpi eq, %arg0, %c1_i32_97 : i32
    %283 = arith.extui %282 : i1 to i32
    %c0_i32_98 = arith.constant 0 : i32
    %284 = arith.cmpi ne, %283, %c0_i32_98 : i32
    scf.if %284 {
      %c0_99 = arith.constant 0 : index
      %c0_100 = arith.constant 0 : index
      %285 = vector.load %arg14[%c0_99, %c0_100] : memref<1x128xf32, #tpu.memory_space<vmem>>, vector<1x128xf32>
      %c0_101 = arith.constant 0 : index
      %c0_102 = arith.constant 0 : index
      %286 = vector.load %arg15[%c0_101, %c0_102] : memref<1x128xf32, #tpu.memory_space<vmem>>, vector<1x128xf32>
      %cst_103 = arith.constant dense<0.000000e+00> : vector<32xf32>
      %287 = vector.multi_reduction <add>, %278, %cst_103 [1] : vector<32x128xf32> to vector<32xf32>
      %288 = vector.shape_cast %287 : vector<32xf32> to vector<32x1xf32>
      %cst_104 = arith.constant 1.280000e+02 : f32
      %289 = vector.broadcast %cst_104 : f32 to vector<32x1xf32>
      %290 = arith.divf %288, %289 : vector<32x1xf32>
      %291 = vector.broadcast %290 : vector<32x1xf32> to vector<32x128xf32>
      %292 = arith.subf %278, %291 : vector<32x128xf32>
      %293 = arith.mulf %292, %292 : vector<32x128xf32>
      %cst_105 = arith.constant dense<0.000000e+00> : vector<32xf32>
      %294 = vector.multi_reduction <add>, %293, %cst_105 [1] : vector<32x128xf32> to vector<32xf32>
      %295 = vector.shape_cast %294 : vector<32xf32> to vector<32x1xf32>
      %cst_106 = arith.constant 1.280000e+02 : f32
      %296 = vector.broadcast %cst_106 : f32 to vector<32x1xf32>
      %297 = arith.divf %295, %296 : vector<32x1xf32>
      %298 = vector.broadcast %290 : vector<32x1xf32> to vector<32x128xf32>
      %299 = arith.subf %278, %298 : vector<32x128xf32>
      %cst_107 = arith.constant 9.99999974E-6 : f32
      %300 = vector.broadcast %cst_107 : f32 to vector<32x1xf32>
      %301 = arith.addf %297, %300 : vector<32x1xf32>
      %302 = math.rsqrt %301 : vector<32x1xf32>
      %303 = vector.broadcast %302 : vector<32x1xf32> to vector<32x128xf32>
      %304 = arith.mulf %299, %303 : vector<32x128xf32>
      %305 = vector.broadcast %285 : vector<1x128xf32> to vector<32x128xf32>
      %306 = arith.mulf %304, %305 : vector<32x128xf32>
      %307 = vector.broadcast %286 : vector<1x128xf32> to vector<32x128xf32>
      %308 = arith.addf %306, %307 : vector<32x128xf32>
      %309 = vector.shape_cast %308 : vector<32x128xf32> to vector<2x16x128xf32>
      %c0_108 = arith.constant 0 : index
      %c0_109 = arith.constant 0 : index
      %c0_110 = arith.constant 0 : index
      %310 = vector.load %arg16[%c0_108, %c0_109, %c0_110] : memref<2x16x128xf32, #tpu.memory_space<vmem>>, vector<2x16x128xf32>
      tpu.vector_store %arg16[%c0_108, %c0_109, %c0_110], %309 {strides = array<i32>} : memref<2x16x128xf32, #tpu.memory_space<vmem>>, vector<2x16x128xf32>,
    } else {
    }
    return
  }
  func.func @transform_0(%arg0: i32) -> (i32, i32, i32) {
    %c0_i32 = arith.constant 0 : i32
    %c0_i32_0 = arith.constant 0 : i32
    %c0_i32_1 = arith.constant 0 : i32
    %c0_i32_2 = arith.constant 0 : i32
    return %c0_i32, %c0_i32_0, %c0_i32_1 : i32, i32, i32
  }
  func.func @transform_1(%arg0: i32) -> (i32, i32, i32) {
    %c0_i32 = arith.constant 0 : i32
    %c0_i32_0 = arith.constant 0 : i32
    %c0_i32_1 = arith.constant 0 : i32
    return %arg0, %c0_i32, %c0_i32_0 : i32, i32, i32
  }
  func.func @transform_2(%arg0: i32) -> (i32, i32, i32) {
    %c0_i32 = arith.constant 0 : i32
    %c0_i32_0 = arith.constant 0 : i32
    %c0_i32_1 = arith.constant 0 : i32
    return %arg0, %c0_i32, %c0_i32_0 : i32, i32, i32
  }
  func.func @transform_3(%arg0: i32) -> (i32, i32, i32) {
    %c0_i32 = arith.constant 0 : i32
    %c0_i32_0 = arith.constant 0 : i32
    %c0_i32_1 = arith.constant 0 : i32
    return %arg0, %c0_i32, %c0_i32_0 : i32, i32, i32
  }
  func.func @transform_4(%arg0: i32) -> (i32, i32, i32) {
    %c0_i32 = arith.constant 0 : i32
    %c0_i32_0 = arith.constant 0 : i32
    %c0_i32_1 = arith.constant 0 : i32
    return %arg0, %c0_i32, %c0_i32_0 : i32, i32, i32
  }
  func.func @transform_5(%arg0: i32) -> (i32, i32, i32) {
    %c0_i32 = arith.constant 0 : i32
    %c0_i32_0 = arith.constant 0 : i32
    %c0_i32_1 = arith.constant 0 : i32
    return %arg0, %c0_i32, %c0_i32_0 : i32, i32, i32
  }
  func.func @transform_6(%arg0: i32) -> (i32, i32, i32) {
    %c0_i32 = arith.constant 0 : i32
    %c0_i32_0 = arith.constant 0 : i32
    %c0_i32_1 = arith.constant 0 : i32
    return %arg0, %c0_i32, %c0_i32_0 : i32, i32, i32
  }
  func.func @transform_7(%arg0: i32) -> (i32, i32, i32) {
    %c0_i32 = arith.constant 0 : i32
    %c0_i32_0 = arith.constant 0 : i32
    %c0_i32_1 = arith.constant 0 : i32
    return %arg0, %c0_i32, %c0_i32_0 : i32, i32, i32
  }
  func.func @transform_8(%arg0: i32) -> (i32, i32, i32) {
    %c0_i32 = arith.constant 0 : i32
    %c0_i32_0 = arith.constant 0 : i32
    %c0_i32_1 = arith.constant 0 : i32
    return %arg0, %c0_i32, %c0_i32_0 : i32, i32, i32
  }
  func.func @transform_9(%arg0: i32) -> (i32, i32, i32) {
    %c0_i32 = arith.constant 0 : i32
    %c0_i32_0 = arith.constant 0 : i32
    %c0_i32_1 = arith.constant 0 : i32
    return %arg0, %c0_i32, %c0_i32_0 : i32, i32, i32
  }
  func.func @transform_10(%arg0: i32) -> (i32, i32, i32) {
    %c0_i32 = arith.constant 0 : i32
    %c0_i32_0 = arith.constant 0 : i32
    %c0_i32_1 = arith.constant 0 : i32
    return %arg0, %c0_i32, %c0_i32_0 : i32, i32, i32
  }
  func.func @transform_11(%arg0: i32) -> (i32, i32, i32) {
    %c0_i32 = arith.constant 0 : i32
    %c0_i32_0 = arith.constant 0 : i32
    %c0_i32_1 = arith.constant 0 : i32
    return %arg0, %c0_i32, %c0_i32_0 : i32, i32, i32
  }
  func.func @transform_12(%arg0: i32) -> (i32, i32, i32) {
    %c0_i32 = arith.constant 0 : i32
    %c0_i32_0 = arith.constant 0 : i32
    %c0_i32_1 = arith.constant 0 : i32
    return %arg0, %c0_i32, %c0_i32_0 : i32, i32, i32
  }
  func.func @transform_13(%arg0: i32) -> (i32, i32) {
    %c0_i32 = arith.constant 0 : i32
    %c0_i32_0 = arith.constant 0 : i32
    %c0_i32_1 = arith.constant 0 : i32
    return %c0_i32, %c0_i32_0 : i32, i32
  }
  func.func @transform_14(%arg0: i32) -> (i32, i32) {
    %c0_i32 = arith.constant 0 : i32
    %c0_i32_0 = arith.constant 0 : i32
    %c0_i32_1 = arith.constant 0 : i32
    return %c0_i32, %c0_i32_0 : i32, i32
  }
  func.func @transform_15(%arg0: i32) -> (i32, i32, i32) {
    %c0_i32 = arith.constant 0 : i32
    %c0_i32_0 = arith.constant 0 : i32
    %c0_i32_1 = arith.constant 0 : i32
    %c0_i32_2 = arith.constant 0 : i32
    return %c0_i32, %c0_i32_0, %c0_i32_1 : i32, i32, i32
  }
}

</mosaic_0001>

<bundles_post_ra>
// kernel: tpu_custom_call.1
= control target key start
LH: loop header
LB: loop body
LE: loop exit
PB: predicated region body
PF: predicated region fallthrough
CT: control target
= control target key end

     0   :  { %s5787_s0 = inlined_call_operand.hbm [shape: f32[2,16,128], index: 0, kind: input, shape index: {}]   ;;  %s5788_s1 = inlined_call_operand.hbm [shape: f32[2,1,128], index: 1, kind: input, shape index: {}]   ;;  %s5789_s2 = inlined_call_operand.hbm [shape: f32[2,1,128], index: 2, kind: input, shape index: {}]   ;;  %s5790_s3 = inlined_call_operand.hbm [shape: bf16[2,128,384], index: 3, kind: input, shape index: {}]   ;;  %s5791_s4 = inlined_call_operand.vmem [shape: f32[2,1,384], index: 4, kind: input, shape index: {}]   ;;  %s5792_s5 = inlined_call_operand.hbm [shape: bf16[2,128,128], index: 5, kind: input, shape index: {}]   ;;  %s5793_s6 = inlined_call_operand.vmem [shape: f32[2,1,128], index: 6, kind: input, shape index: {}]   ;;  %s5794_s7 = inlined_call_operand.vmem [shape: f32[2,1,128], index: 7, kind: input, shape index: {}]   ;;  %s5795_s8 = inlined_call_operand.vmem [shape: f32[2,1,128], index: 8, kind: input, shape index: {}]   ;;  %s5796_s9 = inlined_call_operand.hbm [shape: bf16[2,128,512], index: 9, kind: input, shape index: {}]   ;;  %s5797_s10 = inlined_call_operand.vmem [shape: f32[2,1,512], index: 10, kind: input, shape index: {}]   ;;  %s5798_s11 = inlined_call_operand.hbm [shape: bf16[2,512,128], index: 11, kind: input, shape index: {}]   ;;  %s5799_s12 = inlined_call_operand.vmem [shape: f32[2,1,128], index: 12, kind: input, shape index: {}]   ;;  %s5800_s13 = inlined_call_operand.vmem [shape: f32[1,128], index: 13, kind: input, shape index: {}]   ;;  %s5801_s14 = inlined_call_operand.vmem [shape: f32[1,128], index: 14, kind: input, shape index: {}]   ;;  %s5802_s15 = inlined_call_operand.hbm [shape: f32[2,16,128], index: 15, kind: output, shape index: {}]  }
   0x1   :  { %5817 = sst [smem:[#allocation23_spill]] %s5787_s0 }
   0x2   :  { %5818 = sst [smem:[#allocation24_spill]] %s5788_s1 }
   0x3   :  { %5819 = sst [smem:[#allocation25_spill]] %s5789_s2 }
   0x4   :  { %5820 = sst [smem:[#allocation26_spill]] %s5790_s3 }
   0x5   :  { %5821 = sst [smem:[#allocation27_spill]] %s5791_s4 }
   0x6   :  { %5822 = sst [smem:[#allocation28_spill]] %s5792_s5 }
   0x7   :  { %5823 = sst [smem:[#allocation29_spill]] %s5795_s8 }
   0x8   :  { %5824 = sst [smem:[#allocation30_spill]] %s5796_s9 }
   0x9   :  { %5825 = sst [smem:[#allocation31_spill]] %s5797_s10 }
   0xa   :  { %5826 = sst [smem:[#allocation32_spill]] %s5799_s12 }
   0xb   :  { %5827 = sst [smem:[#allocation33_spill]] %s5800_s13 }
   0xc   :  { %5828 = sst [smem:[#allocation34_spill]] %s5801_s14 }
   0xd   :  { %5829 = sst [smem:[#allocation35_spill]] %s5802_s15 }
   0xe   :  { %20 = vsyncpa [#allocation3], 0 }
   0xf   :  { %21 = vsyncpa [#allocation6], 0 }
  0x10   :  { %23 = vsyncpa [#allocation6 + $0x1], 0 }
  0x11   :  { %24 = vsyncpa [#allocation9], 0 }
  0x12   :  { %26 = vsyncpa [#allocation9 + $0x1], 0 }
  0x13   :  { %27 = vsyncpa [#allocation12], 0 }
  0x14   :  { %29 = vsyncpa [#allocation12 + $0x1], 0 }
  0x15   :  { %30 = vsyncpa [#allocation4], 0  ;;  %s4763_s18 = smov 0   ;;  %s4765_s19 = smov 0  }
  0x16   :  { %s4767_s20 = smov 0   ;;  %s4769_s21 = smov 0  }
  0x17 LB: > { %5830 = sst [smem:[#allocation20_spill]] %s4653_s20  ;;  %s4784_s22 = sadd.s32 1, %s4657_s21   ;;  %s4657_s21 = sphi %s4769_s21, %s5868_s21   ;;  %s4653_s20 = sphi %s4767_s20, %s5870_s20   ;;  %s4649_s19 = sphi %s4765_s19, %s5872_s19   ;;  %s4645_s18 = sphi %s4763_s18, %s5871_s18  }
  0x18   : > { %5831 = sst [smem:[#allocation21_spill]] %s4784_s22  ;;  %s64_s23 = sadd.s32 1, %s4653_s20 }
  0x19   : > { %s61_s24 = ssub.s32 %s4657_s21, %s4784_s22  ;;  %p71_p0 = scmp.ne.s32.totalorder %s4653_s20, %s4649_s19 }
  0x1a   : > { %p62_p1 = scmp.eq.s32.totalorder %s61_s24, 0  ;;  %p72_p2 = scmp.eq.s32.totalorder %s4657_s21, 0 }
  0x1b   : > { %p4013_p3 = scmp.lt.s32.totalorder %s4657_s21, 2  ;;  %s4797_s26 = sand.u32 1, %s4657_s21  }
  0x1c   : > { %s4794_s25 = scalar_select %p62_p1, %s4653_s20, %s64_s23  }
  0x1d   : > { %p73_p4 = por %p72_p2, %p71_p0  ;;  %s4800_s27 = sand.u32 1, %s4653_s20  }
  0x1e   : > { %5832 = sst [smem:[#allocation22_spill]] %s4794_s25  ;;  %s3557_s28 = sshll.u32 %s4657_s21, 4 }
  0x1f   : > { %s5833_s1 = sld [smem:[#allocation24_spill]]  ;;  %s472_s17 = scalar_lea.vmem [#allocation5], %s4800_s27 }
  0x20   : > { %s479_s23 = sshll.u32 %s472_s17, 4  ;;  %p4811_p5 = pnand %p4013_p3, %p73_p4  ;;  %s4809_s23 = int_to_ptr.vmem [resolvable:$true] %s479_s23 }
  0x21   : > { %s5835_s2 = sld [smem:[#allocation25_spill]]  ;;  %s5807_s29 = scalar_lea.sflag [#allocation6], %s4797_s26 }
  0x22   : > { %s5834_s24 = scalar_select %p4811_p5, 1, 0 }
  0x23   : > { %p4825_p7 = pneg %p4811_p5 }
  0x25   : > { %s4806_s16 = scalar_lea.hbm %s5833_s1, %s3557_s28  ;;  %s4378_s13 = scalar_lea.hbm %s5833_s1, 32 }
  0x26   : > { %s4373_s30 = scalar_lea.hbm %s4806_s16, 16  ;;  %p4379_p10 = scmp.lt.u32.totalorder %s4806_s16, %s5833_s1 }
  0x27   : > { %s4818_s22 = scalar_lea.hbm %s5835_s2, %s3557_s28  ;;  %p4374_p6 = scmp.ne.s32.totalorder %s4806_s16, %s4373_s30 }
  0x28   : > { %s5836_s15 = scalar_select %p4825_p7, 1, 0 }
  0x29   : > { %p4376_p8 = pnand %p4825_p7, %p4374_p6  ;;  %p4380_p11 = scmp.lt.u32.totalorder %s4378_s13, %s4373_s30 }
  0x2a   : > { %p4382_p13 = scmp.lt.u32.totalorder %s4373_s30, %s4806_s16 }
  0x2b   : > { %p4377_p9 = pneg %p4376_p8  ;;  %p4381_p12 = por %p4380_p11, %p4379_p10 }
  0x2d   : > { %p4383_p0 = por %p4382_p13, %p4381_p12 }
  0x2f   : > { %p4384_p1 = pnand %p4383_p0, %p4377_p9 }
  0x31   : > { %4387 = shalt.err (!%p4384_p1)
}
  0x32   : > { %s4388_s28 = scalar_lea.vmem %s4809_s23, 16  ;;  %s4659_s14 = smov [#allocation5]  }
  0x33   : > { %p4389_p2 = scmp.ne.s32.totalorder %s4809_s23, %s4388_s28  ;;  %s4393_s17 = sshll.u32 %s4659_s14, 4  ;;  %s4394_s17 = int_to_ptr.vmem [resolvable:$false] %s4393_s17 }
  0x34   : > { %s4395_s20 = scalar_lea.vmem %s4394_s17, 32  ;;  %p4396_p6 = scmp.lt.s32.totalorder %s4809_s23, %s4394_s17 }
  0x35   : > { %p4391_p3 = pnand %p4389_p2, %p4825_p7  ;;  %p4397_p8 = scmp.lt.s32.totalorder %s4395_s20, %s4388_s28 }
  0x37   : > { %p4392_p4 = pneg %p4391_p3  ;;  %p4398_p10 = por %p4397_p8, %p4396_p6 }
  0x39   : > { %p4399_p11 = pnand %p4398_p10, %p4392_p4 }
  0x3b   : > { %4402 = shalt.err (!%p4399_p11)
}
  0x3c   : > { %3996 = dma.hbm_to_vmem [thread:$0]  (!%p4811_p5), %s4806_s16, 16, %s4809_s23, %s5807_s29  }
  0x3d   : > { %s3965_s13 = smul.u32 192, %s4800_s27  ;;  %s3563_s25 = sshll.u32 %s4800_s27, 8 }
  0x3e   : > { %s3966_s30 = smul.u32 3072, %s4657_s21  ;;  %s5837_s3 = sld [smem:[#allocation26_spill]] }
  0x3f   : > { %s507_s20 = scalar_lea.vmem [#allocation8], %s3965_s13  ;;  %s5809_s12 = scalar_lea.sflag [#allocation9], %s4797_s26 }
  0x40   : > { %s514_s1 = sshll.u32 %s507_s20, 4  ;;  %s4858_s1 = int_to_ptr.vmem [resolvable:$true] %s514_s1 }
  0x44   : > { %s4856_s17 = scalar_lea.hbm %s5837_s3, %s3966_s30  ;;  %s4408_s14 = scalar_lea.hbm %s5837_s3, 6144 }
  0x45   : > { %s4403_s10 = scalar_lea.hbm %s4856_s17, 3072  ;;  %p4409_p0 = scmp.lt.u32.totalorder %s4856_s17, %s5837_s3 }
  0x46   : > { %p4404_p9 = scmp.ne.s32.totalorder %s4856_s17, %s4403_s10  ;;  %p4410_p1 = scmp.lt.u32.totalorder %s4408_s14, %s4403_s10 }
  0x47   : > { %p4412_p3 = scmp.lt.u32.totalorder %s4403_s10, %s4856_s17 }
  0x48   : > { %p4406_p12 = pnand %p4404_p9, %p4825_p7  ;;  %p4411_p2 = por %p4410_p1, %p4409_p0 }
  0x4a   : > { %p4407_p13 = pneg %p4406_p12  ;;  %p4413_p4 = por %p4412_p3, %p4411_p2 }
  0x4c   : > { %p4414_p6 = pnand %p4413_p4, %p4407_p13 }
  0x4e   : > { %4417 = shalt.err (!%p4414_p6)
}
  0x4f   : > { %s4418_s13 = scalar_lea.vmem %s4858_s1, 3072  ;;  %s4660_s20 = smov [#allocation8]  }
  0x50   : > { %p4419_p8 = scmp.ne.s32.totalorder %s4858_s1, %s4418_s13  ;;  %s4423_s16 = sshll.u32 %s4660_s20, 4  ;;  %s4424_s16 = int_to_ptr.vmem [resolvable:$false] %s4423_s16 }
  0x51   : > { %s4425_s23 = scalar_lea.vmem %s4424_s16, 6144  ;;  %p4426_p9 = scmp.lt.s32.totalorder %s4858_s1, %s4424_s16 }
  0x52   : > { %p4421_p10 = pnand %p4419_p8, %p4825_p7  ;;  %p4427_p12 = scmp.lt.s32.totalorder %s4425_s23, %s4418_s13 }
  0x54   : > { %p4422_p11 = pneg %p4421_p10  ;;  %p4428_p0 = por %p4427_p12, %p4426_p9 }
  0x56   : > { %p4429_p1 = pnand %p4428_p0, %p4422_p11 }
  0x58   : > { %4432 = shalt.err (!%p4429_p1)
}
  0x59   : > { %s4661_s10 = smov 192   ;;  %s4662_s14 = smov 12  }
  0x5a   : > { %4002 = dma.hbm_to_vmem [thread:$0]  (!%p4811_p5), %s4856_s17, 3072, %s4858_s1, %s5809_s12, %s4661_s10, %s4661_s10, %s4662_s14  }
  0x5b   : > { %s3719_s30 = sshll.u32 %s4657_s21, 12  ;;  %s574_s28 = scalar_lea.vmem [#allocation11], %s3563_s25 }
  0x5c   : > { %s581_s13 = sshll.u32 %s574_s28, 4  ;;  %s5838_s9 = sld [smem:[#allocation30_spill]]  ;;  %s4894_s13 = int_to_ptr.vmem [resolvable:$true] %s581_s13 }
  0x5d   : > { %s5808_s29 = scalar_lea.sflag [#allocation12], %s4797_s26 }
  0x62   : > { %s4892_s23 = scalar_lea.hbm %s5838_s9, %s3719_s30  ;;  %s4438_s10 = scalar_lea.hbm %s5838_s9, 8192 }
  0x63   : > { %s4433_s3 = scalar_lea.hbm %s4892_s23, 4096  ;;  %p4439_p4 = scmp.lt.u32.totalorder %s4892_s23, %s5838_s9 }
  0x64   : > { %p4434_p13 = scmp.ne.s32.totalorder %s4892_s23, %s4433_s3  ;;  %p4440_p6 = scmp.lt.u32.totalorder %s4438_s10, %s4433_s3 }
  0x65   : > { %p4442_p10 = scmp.lt.u32.totalorder %s4433_s3, %s4892_s23 }
  0x66   : > { %p4436_p2 = pnand %p4434_p13, %p4825_p7  ;;  %p4441_p8 = por %p4440_p6, %p4439_p4 }
  0x68   : > { %p4437_p3 = pneg %p4436_p2  ;;  %p4443_p11 = por %p4442_p10, %p4441_p8 }
  0x6a   : > { %p4444_p9 = pnand %p4443_p11, %p4437_p3 }
  0x6c   : > { %4447 = shalt.err (!%p4444_p9)
}
  0x6d   : > { %s4448_s20 = scalar_lea.vmem %s4894_s13, 4096  ;;  %s4663_s16 = smov [#allocation11]  }
  0x6e   : > { %p4449_p12 = scmp.ne.s32.totalorder %s4894_s13, %s4448_s20  ;;  %s4453_s1 = sshll.u32 %s4663_s16, 4  ;;  %s4454_s1 = int_to_ptr.vmem [resolvable:$false] %s4453_s1 }
  0x6f   : > { %s4455_s17 = scalar_lea.vmem %s4454_s1, 8192  ;;  %p4456_p13 = scmp.lt.s32.totalorder %s4894_s13, %s4454_s1 }
  0x70   : > { %p4451_p0 = pnand %p4449_p12, %p4825_p7  ;;  %p4457_p2 = scmp.lt.s32.totalorder %s4455_s17, %s4448_s20 }
  0x72   : > { %p4452_p1 = pneg %p4451_p0  ;;  %p4458_p4 = por %p4457_p2, %p4456_p13 }
  0x74   : > { %p4459_p6 = pnand %p4458_p4, %p4452_p1 }
  0x76   : > { %4462 = shalt.err (!%p4459_p6)
}
  0x77   : > { %s4664_s3 = smov 256   ;;  %s4665_s10 = smov 16  }
  0x78   : > { %4008 = dma.hbm_to_vmem [thread:$0]  (!%p4811_p5), %s4892_s23, 4096, %s4894_s13, %s5808_s29, %s4664_s3, %s4664_s3, %s4665_s10  }
  0x79   : > { %s4925_s20 = scalar_lea.hbm %s5798_s11, %s3719_s30  ;;  %s602_s16 = scalar_lea.vmem [#allocation13], %s3563_s25 }
  0x7a   : > { %s609_s1 = sshll.u32 %s602_s16, 4  ;;  %s4932_s17 = sadd.s32 4294967295, %s4657_s21   ;;  %s4929_s1 = int_to_ptr.vmem [resolvable:$true] %s609_s1 }
  0x7b   : > { %p77_p3 = scmp.ne.s32.totalorder %s4649_s19, %s4645_s18  ;;  %p5810_p8 = scmp.eq.s32.totalorder %s4932_s17, 0 }
  0x7c   : > { %p3554_p10 = scmp.ge.s32.totalorder %s4657_s21, 1  ;;  %p437_p11 = scmp.lt.s32.totalorder %s4657_s21, 3 }
  0x7d   : > { %p4942_p12 = por %p5810_p8, %p77_p3  ;;  %s4666_s13 = smov [#allocation2]  }
  0x7e   : > { %p4946_p0 = pnand %p3554_p10, %p437_p11  ;;  %s449_s23 = sshll.u32 %s4666_s13, 4  ;;  %s4950_s23 = int_to_ptr.vmem [resolvable:$true] %s449_s23 }
  0x7f   : > { %s5839_s30 = scalar_select %p4942_p12, 1, 0 }
  0x80   : > { %s5840_s25 = scalar_select %p4946_p0, 1, 0 }
  0x81   : > { %p3989_p1 = pneg %p4946_p0  ;;  %s489_s10 = scalar_lea.vmem [#allocation7], %s4800_s27 }
  0x82   : > { %s496_s14 = sshll.u32 %s489_s10, 4  ;;  %s5842_s0 = sld [smem:[#allocation23_spill]]  ;;  %s4962_s14 = int_to_ptr.vmem [resolvable:$true] %s496_s14 }
  0x83   : > { %p4957_p13 = pnand %p3989_p1, %p5810_p8 }
  0x85   : > { %p4465_p4 = pneg %p4957_p13 }
  0x88   : > { %s4463_s13 = scalar_lea.hbm %s5842_s0, 512 }
  0x89   : > { %p4464_p2 = scmp.ne.s32.totalorder %s5842_s0, %s4463_s13  ;;  %p4470_p10 = scmp.lt.u32.totalorder %s4463_s13, %s5842_s0 }
  0x8b   : > { %p4466_p6 = pnand %p4465_p4, %p4464_p2 }
  0x8d   : > { %p4467_p3 = pneg %p4466_p6 }
  0x8f   : > { %p4472_p11 = pnand %p4470_p10, %p4467_p3 }
  0x91   : > { %4475 = shalt.err (!%p4472_p11)
}
  0x92   : > { %s4476_s10 = scalar_lea.vmem %s4950_s23, 512  ;;  %p4484_p12 = scmp.lt.s32.totalorder %s4950_s23, %s4950_s23 }
  0x93   : > { %p4477_p1 = scmp.ne.s32.totalorder %s4950_s23, %s4476_s10  ;;  %p4485_p0 = scmp.lt.s32.totalorder %s4476_s10, %s4476_s10 }
  0x95   : > { %p4479_p9 = pnand %p4477_p1, %p4465_p4  ;;  %p4486_p5 = por %p4485_p0, %p4484_p12 }
  0x97   : > { %p4480_p8 = pneg %p4479_p9 }
  0x99   : > { %p4487_p7 = pnand %p4486_p5, %p4480_p8 }
  0x9b   : > { %4490 = shalt.err (!%p4487_p7)
}
  0x9c   : > { %s4667_s9 = smov 128   ;;  %s4668_s4 = smov 8  }
  0x9d   : > { %3992 = dma.hbm_to_vmem [thread:$0]  (!%p4957_p13), %s5842_s0, 512, %s4950_s23, [#allocation3], %s4667_s9, %s4667_s9, %s4668_s4  }
  0x9e   : > { %s4491_s18 = scalar_lea.hbm %s4818_s22, 16  ;;  %p5843_p2 = scmp.ne.s32.totalorder %s5836_s15, 0 }
  0x9f   : > { %p4492_p9 = scmp.ne.s32.totalorder %s4818_s22, %s4491_s18  ;;  %s4496_s10 = scalar_lea.hbm %s5835_s2, 32 }
  0xa0   : > { %p4497_p7 = scmp.lt.u32.totalorder %s4818_s22, %s5835_s2  ;;  %p4498_p8 = scmp.lt.u32.totalorder %s4496_s10, %s4491_s18 }
  0xa1   : > { %p4494_p12 = pnand %p4492_p9, %p5843_p2  ;;  %p4500_p4 = scmp.lt.u32.totalorder %s4491_s18, %s4818_s22 }
  0xa2   : > { %p4499_p0 = por %p4498_p8, %p4497_p7 }
  0xa3   : > { %p4495_p5 = pneg %p4494_p12 }
  0xa4   : > { %p4501_p6 = por %p4500_p4, %p4499_p0 }
  0xa6   : > { %p4502_p3 = pnand %p4501_p6, %p4495_p5 }
  0xa8   : > { %4505 = shalt.err (!%p4502_p3)
}
  0xa9   : > { %s4506_s23 = scalar_lea.vmem %s4962_s14, 16  ;;  %s4669_s3 = smov [#allocation7]  }
  0xaa   : > { %p4507_p13 = scmp.ne.s32.totalorder %s4962_s14, %s4506_s23  ;;  %s4511_s9 = sshll.u32 %s4669_s3, 4  ;;  %s4512_s9 = int_to_ptr.vmem [resolvable:$false] %s4511_s9 }
  0xab   : > { %s4513_s8 = scalar_lea.vmem %s4512_s9, 32  ;;  %p4514_p1 = scmp.lt.s32.totalorder %s4962_s14, %s4512_s9 }
  0xac   : > { %p4509_p10 = pnand %p4507_p13, %p5843_p2  ;;  %p4515_p9 = scmp.lt.s32.totalorder %s4513_s8, %s4506_s23 }
  0xae   : > { %p4510_p11 = pneg %p4509_p10  ;;  %p4516_p12 = por %p4515_p9, %p4514_p1 }
  0xb0   : > { %p4517_p7 = pnand %p4516_p12, %p4510_p11 }
  0xb2   : > { %4520 = shalt.err (!%p4517_p7)
}
  0xb3   : > { %p5844_p5 = scmp.ne.s32.totalorder %s5834_s24, 0  ;;  %s5845_s28 = scalar_lea.sflag [#allocation6], %s4797_s26 }
  0xb4   : > { %s5846_s4 = sshll.u32 %s4657_s21, 10  ;;  %s5847_s5 = sld [smem:[#allocation28_spill]] }
  0xb5   : > { %3999 = dma.hbm_to_vmem [thread:$0]  (!%p5844_p5), %s4818_s22, 16, %s4962_s14, %s5845_s28  }
  0xb6   : > { %s5848_s16 = sshll.u32 %s4800_s27, 6 }
  0xb7   : > { %s535_s13 = scalar_lea.vmem [#allocation10], %s5848_s16 }
  0xb8   : > { %s542_s10 = sshll.u32 %s535_s13, 4  ;;  %s5018_s10 = int_to_ptr.vmem [resolvable:$true] %s542_s10 }
  0xba   : > { %s5014_s18 = scalar_lea.hbm %s5847_s5, %s5846_s4  ;;  %s4526_s14 = scalar_lea.hbm %s5847_s5, 2048 }
  0xbb   : > { %s4521_s23 = scalar_lea.hbm %s5014_s18, 1024  ;;  %p4527_p6 = scmp.lt.u32.totalorder %s5014_s18, %s5847_s5 }
  0xbc   : > { %p4522_p8 = scmp.ne.s32.totalorder %s5014_s18, %s4521_s23  ;;  %p4528_p3 = scmp.lt.u32.totalorder %s4526_s14, %s4521_s23 }
  0xbd   : > { %p4530_p10 = scmp.lt.u32.totalorder %s4521_s23, %s5014_s18 }
  0xbe   : > { %p4524_p0 = pnand %p4522_p8, %p5843_p2  ;;  %p4529_p13 = por %p4528_p3, %p4527_p6 }
  0xc0   : > { %p4525_p4 = pneg %p4524_p0  ;;  %p4531_p11 = por %p4530_p10, %p4529_p13 }
  0xc2   : > { %p4532_p1 = pnand %p4531_p11, %p4525_p4 }
  0xc4   : > { %4535 = shalt.err (!%p4532_p1)
}
  0xc5   : > { %s4536_s27 = scalar_lea.vmem %s5018_s10, 1024  ;;  %s4670_s8 = smov [#allocation10]  }
  0xc6   : > { %p4537_p9 = scmp.ne.s32.totalorder %s5018_s10, %s4536_s27  ;;  %s4541_s28 = sshll.u32 %s4670_s8, 4  ;;  %s4542_s28 = int_to_ptr.vmem [resolvable:$false] %s4541_s28 }
  0xc7   : > { %s4543_s4 = scalar_lea.vmem %s4542_s28, 2048  ;;  %p4544_p8 = scmp.lt.s32.totalorder %s5018_s10, %s4542_s28 }
  0xc8   : > { %p4539_p12 = pnand %p4537_p9, %p5843_p2  ;;  %p4545_p0 = scmp.lt.s32.totalorder %s4543_s4, %s4536_s27 }
  0xca   : > { %p4540_p7 = pneg %p4539_p12  ;;  %p4546_p6 = por %p4545_p0, %p4544_p8 }
  0xcc   : > { %p4547_p3 = pnand %p4546_p6, %p4540_p7 }
  0xce   : > { %4550 = shalt.err (!%p4547_p3)
}
  0xcf   : > { %s4671_s12 = smov 64   ;;  %s4672_s29 = smov 4  }
  0xd0   : > { %s5849_s16 = scalar_lea.sflag [#allocation9], %s4797_s26  ;;  %s4551_s13 = scalar_lea.hbm %s4925_s20, 4096 }
  0xd1   : > { %4005 = dma.hbm_to_vmem [thread:$0]  (!%p5844_p5), %s5014_s18, 1024, %s5018_s10, %s5849_s16, %s4671_s12, %s4671_s12, %s4672_s29  }
  0xd2   : > { %p4552_p4 = scmp.ne.s32.totalorder %s4925_s20, %s4551_s13  ;;  %s4556_s22 = scalar_lea.hbm %s5798_s11, 8192 }
  0xd3   : > { %p4557_p11 = scmp.lt.u32.totalorder %s4925_s20, %s5798_s11  ;;  %p4558_p1 = scmp.lt.u32.totalorder %s4556_s22, %s4551_s13 }
  0xd4   : > { %p4554_p13 = pnand %p4552_p4, %p5843_p2  ;;  %p4560_p12 = scmp.lt.u32.totalorder %s4551_s13, %s4925_s20 }
  0xd5   : > { %p4559_p9 = por %p4558_p1, %p4557_p11 }
  0xd6   : > { %p4555_p10 = pneg %p4554_p13 }
  0xd7   : > { %p4561_p7 = por %p4560_p12, %p4559_p9 }
  0xd9   : > { %p4562_p8 = pnand %p4561_p7, %p4555_p10 }
  0xdb   : > { %4565 = shalt.err (!%p4562_p8)
}
  0xdc   : > { %s4566_s18 = scalar_lea.vmem %s4929_s1, 4096  ;;  %s4673_s10 = smov [#allocation13]  }
  0xdd   : > { %p4567_p0 = scmp.ne.s32.totalorder %s4929_s1, %s4566_s18  ;;  %s4571_s9 = sshll.u32 %s4673_s10, 4  ;;  %s4572_s9 = int_to_ptr.vmem [resolvable:$false] %s4571_s9 }
  0xde   : > { %s4573_s27 = scalar_lea.vmem %s4572_s9, 8192  ;;  %p4574_p4 = scmp.lt.s32.totalorder %s4929_s1, %s4572_s9 }
  0xdf   : > { %p4569_p6 = pnand %p4567_p0, %p5843_p2  ;;  %p4575_p13 = scmp.lt.s32.totalorder %s4573_s27, %s4566_s18 }
  0xe1   : > { %p4570_p3 = pneg %p4569_p6  ;;  %p4576_p11 = por %p4575_p13, %p4574_p4 }
  0xe3   : > { %p4577_p1 = pnand %p4576_p11, %p4570_p3 }
  0xe5   : > { %4580 = shalt.err (!%p4577_p1)
}
  0xe6   : > { %s5850_s8 = scalar_lea.sflag [#allocation12], %s4797_s26  ;;  %p5851_p2 = scmp.ne.s32.totalorder %s5840_s25, 0 }
  0xe7   : > { %4011 = dma.hbm_to_vmem [thread:$0]  (!%p5844_p5), %s4925_s20, 4096, %s4929_s1, %s5850_s8, %s4671_s12, %s4671_s12, %s4672_s29  }
  0xe8   : > { %627 = sbr.rel (%p5851_p2) target bundleno = 3262 (0xcbe), region = 80  ;;  %p5852_p10 = scmp.eq.s32.totalorder (!%p5851_p2), %s4932_s17, 0 }
  0xef   : > { %4624 = dma.done.wait (%p5852_p10), [#allocation3], 512   ;;  %p5853_p9 = pmov %p5852_p10 }
  0xf0   : > { %s633_s15 = sand.u32 1, %s4932_s17   ;;  %s5080_s24 = sand.u32 1, %s4649_s19  }
  0xf1   : > { %4626 = vsyncadd (%p5853_p9), [#allocation3], 4294966784  ;;  %s634_s26 = scalar_lea.sflag [#allocation6], %s633_s15  ;;  %p5854_p12 = scmp.ne.s32.totalorder %s5839_s30, 0 }
  0xf3   : > { %4628 = dma.done.wait (%p5854_p12), %s634_s26, 32  }
  0xf4   : > { %4630 = vsyncadd (%p5854_p12), %s634_s26, 4294967264  ;;  %s3967_s20 = smul.u32 192, %s5080_s24  ;;  %s650_s25 = scalar_lea.sflag [#allocation9], %s633_s15 }
  0xf6   : > { %s5089_s4 = scalar_lea.vmem [#allocation8], %s3967_s20 }
  0xf7   : > { %4632 = dma.done.wait (%p5854_p12), %s650_s25, 4096  }
  0xf8   : > { %4634 = vsyncadd (%p5854_p12), %s650_s25, 4294963200  ;;  %s3571_s12 = sshll.u32 %s5080_s24, 6  ;;  %s3572_s29 = sshll.u32 %s5080_s24, 8 }
  0xf9   : > { %s5097_s16 = scalar_lea.vmem [#allocation10], %s3571_s12  ;;  %s668_s13 = scalar_lea.sflag [#allocation12], %s633_s15 }
  0xfa   : > { %s5099_s23 = scalar_lea.vmem [#allocation11], %s3572_s29 }
  0xfb   : > { %4636 = dma.done.wait (%p5854_p12), %s668_s13, 8192  }
  0xfc   : > { %4638 = vsyncadd (%p5854_p12), %s668_s13, 4294959104  ;;  %p765_p5 = scmp.lt.s32.totalorder %s4932_s17, 1  ;;  %s5855_s15 = sld [smem:[#allocation29_spill]] }
  0xfd   : > { %s5856_s12 = sld [smem:[#allocation27_spill]]  ;;  %s5857_s2 = sld [smem:[#allocation31_spill]] }
  0xfe   : > { %s5107_s21 = scalar_select %p765_p5, %s4932_s17, 1 }
  0xff   : > { %s5858_s18 = sld [smem:[#allocation32_spill]]  ;;  %s5137_s9 = scalar_lea.vmem [#allocation13], %s3572_s29 }
 0x100   : > { %s3968_s22 = smul.u32 3, %s5107_s21  ;;  %s774_s30 = scalar_lea.vmem %s5794_s7, %s5107_s21 }
 0x101   : > { %s3574_s1 = sshll.u32 %s5107_s21, 2  ;;  %p5859_p7 = scmp.ne.s32.totalorder %s4932_s17, 0 }
 0x102   : > { %s777_s26 = scalar_lea.vmem %s5855_s15, %s5107_s21  ;;  %v790_v0 = vld [vmem:[#allocation2] sm:$0xff] (!%p5859_p7)  ;;  %v791_v1 = vld [vmem:[#allocation2 + $0x8] sm:$0xff] (!%p5859_p7)  ;;  %v792_v2 = vld [vmem:[#allocation2 + $0x10] sm:$0xff] (!%p5859_p7) }
 0x103   : > { %s5125_s13 = scalar_lea.vmem %s5856_s12, %s3968_s22  ;;  %s5131_s5 = scalar_lea.vmem %s5857_s2, %s3574_s1  ;;  %794 = vst [vmem:[#allocation14] sm:$0xff] (!%p5859_p7), %v790_v0  ;;  %795 = vst [vmem:[#allocation14 + $0x8] sm:$0xff] (!%p5859_p7), %v791_v1  ;;  %v793_v3 = vld [vmem:[#allocation2 + $0x18] sm:$0xff] (!%p5859_p7) }
 0x104   : > { %789 = sbr.rel (%p5859_p7) target bundleno = 267 (0x10b), region = 112  ;;  %796 = vst [vmem:[#allocation14 + $0x10] sm:$0xff] (!%p5859_p7), %v792_v2  ;;  %797 = vst [vmem:[#allocation14 + $0x18] sm:$0xff] (!%p5859_p7), %v793_v3 }
 0x105   : > { %s784_s10 = scalar_lea.vmem %s5858_s18, %s5107_s21 }
 0x10b PF: > { %v798_v4 = vld [vmem:[#allocation14] sm:$0xff]  ;;  %v800_v5 = vld [vmem:[#allocation14 + $0x10] sm:$0xff]  ;;  %v799_v6 = vld [vmem:[#allocation14 + $0x8] sm:$0xff]  ;;  %v4674_v43 = vmov 0   ;;  %s5860_s0 = scalar_lea.vmem [#allocation5], %s5080_s24  ;;  %s5861_s2 = scalar_lea.vmem [#allocation7], %s5080_s24 }
 0x10c   : > { %804 = vadd.xlane.f32.xlu0 %v798_v4  ;;  %808 = vadd.xlane.f32.xlu1 %v800_v5  ;;  %v801_v7 = vld [vmem:[#allocation14 + $0x18] sm:$0xff]  ;;  %v4097_v8 = vld [vmem:[%s5089_s4 + $0x4] ss:$12 sps:$4 sm:$0xff]   ;;  %v4099_v9 = vld [vmem:[%s5089_s4] ss:$12 sps:$4 sm:$0xff]   ;;  %vm4676_vm0 = vmmov 0  }
 0x10d   : > { %v4100_v10 = vld [vmem:[%s5089_s4 + $0x1c] ss:$12 sps:$4 sm:$0xff]   ;;  %1048 = vmatprep.subr.bf16.mxu0 %v4097_v8  ;;  %v4103_v28 = vld [vmem:[%s5089_s4 + $0x18] ss:$12 sps:$4 sm:$0xff]   ;;  %v4104_v29 = vld [vmem:[%s5089_s4 + $0x34] ss:$12 sps:$4 sm:$0xff]   ;;  %1080 = vmatprep.mubr.bf16.mxu0 %v4674_v43 }
 0x10e   : > { %v4102_v11 = vld [vmem:[%s5089_s4 + $0x8] ss:$12 sps:$4 sm:$0xff]   ;;  %1049 = vmatpush1.bf16.msra.mxu0 %v4099_v9  ;;  %v4106_v30 = vld [vmem:[%s5089_s4 + $0x20] ss:$12 sps:$4 sm:$0xff]   ;;  %v4107_v31 = vld [vmem:[%s5089_s4 + $0x30] ss:$12 sps:$4 sm:$0xff]  }
 0x10f   : > { %3829 = vmatprep.subr.bf16.mxu1 %v4102_v11  ;;  %1050 = vmatprep.subr.bf16.mxu0 %v4100_v10  ;;  %v4108_v32 = vld [vmem:[%s5089_s4 + $0x4c] ss:$12 sps:$4 sm:$0xff]   ;;  %v4111_v34 = vld [vmem:[%s5089_s4 + $0x48] ss:$12 sps:$4 sm:$0xff]   ;;  %v4112_v35 = vld [vmem:[%s5089_s4 + $0x64] ss:$12 sps:$4 sm:$0xff]  }
 0x110   : > { %806 = vadd.xlane.f32.xlu0 %v799_v6  ;;  %810 = vadd.xlane.f32.xlu1 %v801_v7  ;;  %v4110_v33 = vld [vmem:[%s5089_s4 + $0x38] ss:$12 sps:$4 sm:$0xff]   ;;  %v4114_v36 = vld [vmem:[%s5089_s4 + $0x50] ss:$12 sps:$4 sm:$0xff]   ;;  %v4115_v37 = vld [vmem:[%s5089_s4 + $0x60] ss:$12 sps:$4 sm:$0xff]  }
 0x111   : > { %3830 = vmatpush3.bf16.msra.mxu1 %v4102_v11  ;;  %v4116_v38 = vld [vmem:[%s5089_s4 + $0x7c] ss:$12 sps:$4 sm:$0xff]   ;;  %v4119_v40 = vld [vmem:[%s5089_s4 + $0x78] ss:$12 sps:$4 sm:$0xff]   ;;  %v4120_v41 = vld [vmem:[%s5089_s4 + $0x94] ss:$12 sps:$4 sm:$0xff]  }
 0x112   : > { %1051 = vmatpush1.bf16.msra.mxu0 %v4103_v28  ;;  %3831 = vmatprep.subr.bf16.mxu1 %v4106_v30  ;;  %v4118_v39 = vld [vmem:[%s5089_s4 + $0x68] ss:$12 sps:$4 sm:$0xff]   ;;  %v4122_v42 = vld [vmem:[%s5089_s4 + $0x80] ss:$12 sps:$4 sm:$0xff]   ;;  %v4123_v44 = vld [vmem:[%s5089_s4 + $0x90] ss:$12 sps:$4 sm:$0xff]  }
 0x113   : > { %1052 = vmatprep.subr.bf16.mxu0 %v4104_v29  ;;  %v4124_v45 = vld [vmem:[%s5089_s4 + $0xac] ss:$12 sps:$4 sm:$0xff]   ;;  %v4127_v47 = vld [vmem:[%s5089_s4 + $0xa8] ss:$12 sps:$4 sm:$0xff]   ;;  %v4128_v48 = vld [vmem:[%s5089_s4 + $0xb0] ss:$12 sps:$4 sm:$0xff]  }
 0x114   : > { %v4126_v46 = vld [vmem:[%s5089_s4 + $0x98] ss:$12 sps:$4 sm:$0xff]   ;;  %v3576_v63 = vld [vmem:[%s5860_s0] ss:$0 sm:$0xff]  ;;  %vm1162_vm1 = vcmask 261120   ;;  %s4677_s24 = smov 96  }
 0x115   : > { %3832 = vmatpush3.bf16.msra.mxu1 %v4106_v30  ;;  %s4678_s28 = smov 64   ;;  %s4679_s1 = smov 32   ;;  %vm1214_vm4 = vcmask 130048   ;;  %vm1686_vm5 = vcmask 523264   ;;  %vm1689_vm6 = vcmask 785408  }
 0x116   : > { %1053 = vmatpush1.bf16.msra.mxu0 %v4107_v31  ;;  %3833 = vmatprep.subr.bf16.mxu1 %v4110_v33  ;;  %p3710_p8 = scmp.ge.s32.totalorder %s4932_s17, 1 }
 0x117   : > { %1054 = vmatprep.subr.bf16.mxu0 %v4108_v32 }
 0x119   : > { %3834 = vmatpush3.bf16.msra.mxu1 %v4110_v33 }
 0x11a   : > { %1055 = vmatpush1.bf16.msra.mxu0 %v4111_v34  ;;  %3835 = vmatprep.subr.bf16.mxu1 %v4114_v36 }
 0x11b   : > { %1056 = vmatprep.subr.bf16.mxu0 %v4112_v35 }
 0x11d   : > { %3836 = vmatpush3.bf16.msra.mxu1 %v4114_v36 }
 0x11e   : > { %1057 = vmatpush1.bf16.msra.mxu0 %v4115_v37  ;;  %3837 = vmatprep.subr.bf16.mxu1 %v4118_v39 }
 0x11f   : > { %1058 = vmatprep.subr.bf16.mxu0 %v4116_v38 }
 0x121   : > { %3838 = vmatpush3.bf16.msra.mxu1 %v4118_v39 }
 0x122   : > { %1059 = vmatpush1.bf16.msra.mxu0 %v4119_v40  ;;  %3839 = vmatprep.subr.bf16.mxu1 %v4122_v42 }
 0x123   : > { %1060 = vmatprep.subr.bf16.mxu0 %v4120_v41 }
 0x125   : > { %3840 = vmatpush3.bf16.msra.mxu1 %v4122_v42 }
 0x126   : > { %1061 = vmatpush1.bf16.msra.mxu0 %v4123_v44  ;;  %3841 = vmatprep.subr.bf16.mxu1 %v4126_v46 }
 0x127   : > { %1062 = vmatprep.subr.bf16.mxu0 %v4124_v45 }
 0x129   : > { %3842 = vmatpush3.bf16.msra.mxu1 %v4126_v46 }
 0x12a   : > { %1063 = vmatpush1.bf16.msra.mxu0 %v4127_v47  ;;  %3843 = vmatprep.subr.bf16.mxu1 %v4128_v48 }
 0x12d   : > { %3844 = vmatpush3.bf16.msra.mxu1 %v4128_v48 }
 0x199   : > { %v805_v12 = vpop.xlane.xlu0 %804  ;;  %v809_v13 = vpop.xlane.xlu1 %808 }
 0x19a   : > { %v813_v14 = vmul.f32 0.0078125, %v805_v12  ;;  %v815_v15 = vmul.f32 0.0078125, %v809_v13 }
 0x19c   : > { %v5145_v16 = vsub.f32 %v798_v4, %v813_v14  ;;  %v5147_v17 = vsub.f32 %v800_v5, %v815_v15  ;;  %v3577_v4 = vld [vmem:[%s5861_s2] ss:$0 sm:$0xff] }
 0x19d   : > { %v807_v18 = vpop.xlane.xlu0 %806  ;;  %v811_v19 = vpop.xlane.xlu1 %810 }
 0x19e   : > { %v814_v20 = vmul.f32 0.0078125, %v807_v18  ;;  %v821_v21 = vmul.f32 %v5145_v16, %v5145_v16  ;;  %v816_v22 = vmul.f32 0.0078125, %v811_v19  ;;  %v823_v25 = vmul.f32 %v5147_v17, %v5147_v17 }
 0x19f   : > { %v905_v18 = vlaneseq }
 0x1a0   : > { %v5151_v23 = vsub.f32 %v799_v6, %v814_v20  ;;  %825 = vadd.xlane.f32.xlu0 %v821_v21  ;;  %v5153_v24 = vsub.f32 %v801_v7, %v816_v22  ;;  %v903_v21 = vld [vmem:[%s5125_s13] sm:$0x7] }
 0x1a1   : > { %v5198_v19 = vshrl.u32 %v905_v18, 7 }
 0x1a2   : > { %v822_v26 = vmul.f32 %v5151_v23, %v5151_v23  ;;  %v824_v27 = vmul.f32 %v5153_v24, %v5153_v24 }
 0x1a3   : > { %v907_v20 = vsub.s32 0, %v5198_v19  ;;  %v911_v22 = vsub.s32 1, %v5198_v19 }
 0x1a4   : > { %829 = vadd.xlane.f32.xlu0 %v823_v25  ;;  %827 = vadd.xlane.f32.xlu1 %v822_v26 }
 0x1a5   : > { %v912_v26 = vrot.slane %v903_v21, %v911_v22 }
 0x1a8   : > { %831 = vadd.xlane.f32.xlu1 %v824_v27 }
 0x22d   : > { %v826_v49 = vpop.xlane.xlu0 %825 }
 0x22e   : > { %v833_v50 = vmul.f32 0.0078125, %v826_v49 }
 0x230   : > { %v837_v51 = vadd.f32 1e-05, %v833_v50 }
 0x231   : > { %v828_v52 = vpop.xlane.xlu1 %827  ;;  %v830_v53 = vpop.xlane.xlu0 %829 }
 0x232   : > { %4217 = vrsqrt.f32 %v837_v51  ;;  %v834_v54 = vmul.f32 0.0078125, %v828_v52  ;;  %v835_v55 = vmul.f32 0.0078125, %v830_v53 }
 0x234   : > { %v838_v56 = vadd.f32 1e-05, %v834_v54  ;;  %v839_v57 = vadd.f32 1e-05, %v835_v55 }
 0x235   : > { %v832_v58 = vpop.xlane.xlu1 %831 }
 0x236   : > { %4219 = vrsqrt.f32 %v838_v56  ;;  %v836_v59 = vmul.f32 0.0078125, %v832_v58 }
 0x237   : > { %4221 = vrsqrt.f32 %v839_v57 }
 0x238   : > { %v840_v60 = vadd.f32 1e-05, %v836_v59 }
 0x23a   : > { %4223 = vrsqrt.f32 %v840_v60 }
 0x23c   : > { %v4218_v61 = vpop.eup %4217 }
 0x23d   : > { %v845_v62 = vmul.f32 %v4218_v61, %v5145_v16 }
 0x23f   : > { %v855_v3 = vmul.f32 %v3576_v63, %v845_v62 }
 0x240   : > { %v4220_v0 = vpop.eup %4219 }
 0x241   : > { %v4222_v1 = vpop.eup %4221  ;;  %v846_v2 = vmul.f32 %v4220_v0, %v5151_v23  ;;  %v865_v8 = vadd.f32 %v3577_v4, %v855_v3  ;;  %v915_v23 = vsub.s32 2, %v5198_v19 }
 0x242   : > { %v847_v5 = vmul.f32 %v4222_v1, %v5147_v17  ;;  %v4675_v17 = vmov 0.0  }
 0x243   : > { %v856_v6 = vmul.f32 %v3576_v63, %v846_v2  ;;  %3849 = vmatprep.subr.bf16.mxu0 %v4675_v17  ;;  %3861 = vmatprep.subr.bf16.mxu1 %v4675_v17  ;;  %v916_v28 = vrot.slane %v903_v21, %v915_v23 }
 0x244   : > { %v4224_v7 = vpop.eup %4223  ;;  %v857_v11 = vmul.f32 %v3576_v63, %v847_v5 }
 0x245   : > { %v866_v9 = vadd.f32 %v3577_v4, %v856_v6  ;;  %v848_v10 = vmul.f32 %v4224_v7, %v5153_v24  ;;  %v908_v24 = vrot.slane %v903_v21, %v907_v20 }
 0x246   : > { %v867_v14 = vadd.f32 %v3577_v4, %v857_v11 }
 0x247   : > { %v869_v12 = vpack.c.bf16 %v866_v9, %v865_v8  ;;  %v858_v13 = vmul.f32 %v3576_v63, %v848_v10 }
 0x249   : > { %1081 = vmatmul.mubr.bf16.vlgmr.msra.gmra.mrb[0].mxu0 %v869_v12  ;;  %3845 = vmatprep.mubr.bf16.mxu1 %v869_v12  ;;  %v868_v15 = vadd.f32 %v3577_v4, %v858_v13 }
 0x24a   : > { %1090 = vmatprep.mubr.bf16.mxu0 %v4674_v43 }
 0x24b   : > { %v870_v16 = vpack.c.bf16 %v868_v15, %v867_v14  ;;  %v1154_v14 = vand.u32 127, %v905_v18  ;;  %v1152_v15 = vadd.s32 8, %v5198_v19 }
 0x24d   : > { %3846 = vmatmul.mubr.bf16.vlgmr.msra.gmra.mrb[0].mxu1 %v870_v16  ;;  %vm1155_vm2 = vcmp.gt.s32.totalorder %v1154_v14, %v5198_v19  ;;  %vm1156_vm3 = vcmp.gt.s32.totalorder %v1154_v14, %v1152_v15 }
 0x24e   : > { %3863 = vmatprep.mubr.msk.bf16.mxu1 %vm4676_vm0, %v4675_v17  ;;  %v5269_v21 = vsel %vm1155_vm2, -1e+30, %v4675_v17 }
 0x251   : > { %1091 = vmatmul.mubr.bf16.gmra.mrb[4].mxu0 %v870_v16 }
 0x252   : > { %3851 = vmatprep.mubr.msk.bf16.mxu0 %vm4676_vm0, %v4675_v17 }
 0x31c   : > { %v1082_v25 = vpop.f32.mrb[0].mxu0 }
 0x31d   : > { %v1084_v27 = vpop.f32.mrb[1].mxu0  ;;  %v1083_v30 = vadd.f32 %v1082_v25, %v908_v24 }
 0x31e   : > { %v1086_v29 = vpop.f32.mrb[2].mxu0  ;;  %v1085_v33 = vadd.f32 %v1084_v27, %v912_v26  ;;  %v5272_v27 = vsel %vm1156_vm3, -1e+30, %v4675_v17 }
 0x31f   : > { %v1087_v31 = vadd.f32 %v1086_v29, %v908_v24  ;;  %v1088_v32 = vpop.f32.mrb[3].mxu0 }
 0x320   : > { %v1089_v34 = vadd.f32 %v1088_v32, %v912_v26  ;;  %v3847_v35 = vpop.f32.mrb[0].mxu1 }
 0x321   : > { %v1159_v36 = vpack.c.bf16 %v1087_v31, %v1083_v30  ;;  %v1144_v37 = vadd.f32 %v3847_v35, %v916_v28  ;;  %v1135_v38 = vpop.f32.mrb[1].mxu1 }
 0x322   : > { %v1160_v39 = vpack.c.bf16 %v1089_v34, %v1085_v33  ;;  %v3848_v40 = vpop.f32.mrb[2].mxu1  ;;  %v1136_v44 = vadd.f32 %v1135_v38, %v916_v28 }
 0x323   : > { %v1147_v41 = vadd.f32 %v3848_v40, %v916_v28  ;;  %1283 = vrot.lane.b32.xlu1 %v1159_v36, %s4677_s24  ;;  %v1138_v42 = vpop.f32.mrb[3].mxu1 }
 0x324   : > { %v1139_v45 = vadd.f32 %v1138_v42, %v916_v28  ;;  %1286 = vrot.lane.b32.xlu0 %v1160_v39, %s4677_s24  ;;  %v1092_v46 = vpop.f32.mrb[4].mxu0  ;;  %v1167_v47 = vsel %vm1162_vm1, %v1160_v39, 0 }
 0x325   : > { %v5213_v48 = vpack.c.bf16 %v1147_v41, %v1144_v37  ;;  %v1094_v49 = vpop.f32.mrb[5].mxu0  ;;  %3850 = vmatpush3.bf16.xpose.msra.mxu0 %v1167_v47  ;;  %v1093_v52 = vadd.f32 %v1092_v46, %v908_v24 }
 0x326   : > { %v5215_v50 = vpack.c.bf16 %v1139_v45, %v1136_v44  ;;  %v1096_v51 = vpop.f32.mrb[6].mxu0  ;;  %3855 = vmatprep.subr.bf16.mxu0 %v4675_v17  ;;  %v1095_v55 = vadd.f32 %v1094_v49, %v912_v26 }
 0x327   : > { %v1097_v53 = vadd.f32 %v1096_v51, %v908_v24  ;;  %1412 = vrot.lane.b32.xlu1 %v1160_v39, %s4678_s28  ;;  %v1098_v54 = vpop.f32.mrb[7].mxu0 }
 0x328   : > { %v1099_v56 = vadd.f32 %v1098_v54, %v912_v26  ;;  %1537 = vrot.lane.b32.xlu0 %v1160_v39, %s4679_s1 }
 0x329   : > { %v1692_v57 = vpack.c.bf16 %v1097_v53, %v1093_v52 }
 0x32a   : > { %v1693_v58 = vpack.c.bf16 %v1099_v56, %v1095_v55 }
 0x32b   : > { %1410 = vrot.lane.b32.xlu1 %v1159_v36, %s4678_s28 }
 0x32c   : > { %3852 = vmatmul.mubr.msk.bf16.vlgmr.msra.gmra.mrb[8].mxu0 %vm1162_vm1, %v1159_v36  ;;  %1817 = vrot.lane.b32.xlu0 %v1693_v58, %s4677_s24  ;;  %v1699_v4 = vsel %vm1162_vm1, %v1693_v58, 0 }
 0x32d   : > { %3856 = vmatpush3.bf16.msra.mxu0 %v5215_v50  ;;  %3857 = vmatprep.mubr.msk.bf16.mxu0 %vm4676_vm0, %v4675_v17 }
 0x32e   : > { %3867 = vmatprep.subr.bf16.mxu0 %v4675_v17 }
 0x32f   : > { %1535 = vrot.lane.b32.xlu1 %v1159_v36, %s4679_s1 }
 0x330   : > { %1943 = vrot.lane.b32.xlu0 %v1693_v58, %s4678_s28 }
 0x333   : > { %1814 = vrot.lane.b32.xlu1 %v1692_v57, %s4677_s24 }
 0x334   : > { %2068 = vrot.lane.b32.xlu0 %v1693_v58, %s4679_s1 }
 0x337   : > { %1941 = vrot.lane.b32.xlu1 %v1692_v57, %s4678_s28 }
 0x33b   : > { %2066 = vrot.lane.b32.xlu1 %v1692_v57, %s4679_s1 }
 0x395   : > { %v1284_v59 = vpop.permute.xlu1 %1283 }
 0x396   : > { %v1287_v60 = vpop.permute.xlu0 %1286 }
 0x397   : > { %v1292_v61 = vsel %vm1162_vm1, %v1287_v60, 0 }
 0x398   : > { %3862 = vmatpush3.bf16.xpose.msra.mxu1 %v1292_v61 }
 0x399   : > { %3873 = vmatprep.subr.bf16.mxu1 %v4675_v17  ;;  %v1413_v62 = vpop.permute.xlu1 %1412 }
 0x39a   : > { %v1418_v63 = vsel %vm1162_vm1, %v1413_v62, 0  ;;  %v1538_v0 = vpop.permute.xlu0 %1537 }
 0x39b   : > { %v1543_v2 = vsel %vm1162_vm1, %v1538_v0, 0 }
 0x39d   : > { %v1411_v1 = vpop.permute.xlu1 %1410 }
 0x39e   : > { %v1818_v5 = vpop.permute.xlu0 %1817 }
 0x39f   : > { %3864 = vmatmul.mubr.msk.bf16.vlgmr.msra.gmra.mrb[4].mxu1 %vm1162_vm1, %v1284_v59  ;;  %v1823_v6 = vsel %vm1162_vm1, %v1818_v5, 0 }
 0x3a0   : > { %3874 = vmatpush3.bf16.xpose.msra.mxu1 %v1418_v63  ;;  %3875 = vmatprep.mubr.msk.bf16.mxu1 %vm4676_vm0, %v4675_v17 }
 0x3a1   : > { %3885 = vmatprep.subr.bf16.mxu1 %v4675_v17  ;;  %v1536_v3 = vpop.permute.xlu1 %1535 }
 0x3a2   : > { %v1944_v7 = vpop.permute.xlu0 %1943 }
 0x3a3   : > { %v1949_v9 = vsel %vm1162_vm1, %v1944_v7, 0 }
 0x3a5   : > { %v1815_v8 = vpop.permute.xlu1 %1814 }
 0x3a6   : > { %v2069_v10 = vpop.permute.xlu0 %2068 }
 0x3a7   : > { %3876 = vmatmul.mubr.msk.bf16.vlgmr.msra.gmra.mrb[8].mxu1 %vm1162_vm1, %v1411_v1  ;;  %v2074_v12 = vsel %vm1162_vm1, %v2069_v10, 0 }
 0x3a8   : > { %3886 = vmatpush3.bf16.xpose.msra.mxu1 %v1543_v2  ;;  %3887 = vmatprep.mubr.msk.bf16.mxu1 %vm4676_vm0, %v4675_v17 }
 0x3a9   : > { %3897 = vmatprep.subr.bf16.mxu1 %v4675_v17  ;;  %v1942_v11 = vpop.permute.xlu1 %1941 }
 0x3ad   : > { %v2067_v13 = vpop.permute.xlu1 %2066 }
 0x3af   : > { %3888 = vmatmul.mubr.msk.bf16.vlgmr.msra.gmra.mrb[12].mxu1 %vm1162_vm1, %v1536_v3 }
 0x3b0   : > { %3898 = vmatpush3.bf16.xpose.msra.mxu1 %v1699_v4  ;;  %3899 = vmatprep.mubr.msk.bf16.mxu1 %vm4676_vm0, %v4675_v17 }
 0x3b1   : > { %3909 = vmatprep.subr.bf16.mxu1 %v4675_v17 }
 0x3b7   : > { %3900 = vmatmul.mubr.msk.bf16.vlgmr.msra.gmra.mrb[16].mxu1 %vm1162_vm1, %v1692_v57 }
 0x3b8   : > { %3910 = vmatpush3.bf16.xpose.msra.mxu1 %v1823_v6  ;;  %3911 = vmatprep.mubr.msk.bf16.mxu1 %vm4676_vm0, %v4675_v17 }
 0x3b9   : > { %3921 = vmatprep.subr.bf16.mxu1 %v4675_v17 }
 0x3bf   : > { %3912 = vmatmul.mubr.msk.bf16.vlgmr.msra.gmra.mrb[20].mxu1 %vm1162_vm1, %v1815_v8 }
 0x3c0   : > { %3922 = vmatpush3.bf16.xpose.msra.mxu1 %v1949_v9  ;;  %3923 = vmatprep.mubr.msk.bf16.mxu1 %vm4676_vm0, %v4675_v17 }
 0x3c1   : > { %3933 = vmatprep.subr.bf16.mxu1 %v4675_v17 }
 0x3c7   : > { %3924 = vmatmul.mubr.msk.bf16.vlgmr.msra.gmra.mrb[24].mxu1 %vm1162_vm1, %v1942_v11 }
 0x3c8   : > { %3934 = vmatpush3.bf16.xpose.msra.mxu1 %v2074_v12  ;;  %3935 = vmatprep.mubr.msk.bf16.mxu1 %vm4676_vm0, %v4675_v17 }
 0x3cf   : > { %3936 = vmatmul.mubr.msk.bf16.vlgmr.msra.gmra.mrb[28].mxu1 %vm1162_vm1, %v2067_v13 }
 0x3ff   : > { %v1203_v16 = vpop.f32.mrb[8].mxu0 }
 0x400   : > { %v1210_v24 = vmul.f32 0.17677669, %v1203_v16  ;;  %v3853_v25 = vpop.f32.mrb[9].mxu0 }
 0x401   : > { %v1206_v26 = vpop.f32.mrb[10].mxu0 }
 0x402   : > { %v1211_v28 = vmul.f32 0.17677669, %v1206_v26  ;;  %v3854_v29 = vpop.f32.mrb[11].mxu0  ;;  %v1212_v18 = vadd.f32 %v1210_v24, %v5269_v21 }
 0x404   : > { %v1215_v30 = vsel %vm1214_vm4, %v1212_v18, -inf  ;;  %v5277_v31 = vadd.f32 %v1211_v28, %v5272_v27 }
 0x405   : > { %1216 = vmax.xlane.f32.xlu0 %v1215_v30 }
 0x406   : > { %v1218_v32 = vsel %vm1214_vm4, %v5277_v31, -inf }
 0x407   : > { %1219 = vmax.xlane.f32.xlu1 %v1218_v32 }
 0x472   : > { %v1328_v33 = vpop.f32.mrb[4].mxu1 }
 0x473   : > { %v1335_v34 = vmul.f32 0.17677669, %v1328_v33  ;;  %v3865_v35 = vpop.f32.mrb[5].mxu1 }
 0x474   : > { %v1331_v36 = vpop.f32.mrb[6].mxu1 }
 0x475   : > { %v1336_v37 = vmul.f32 0.17677669, %v1331_v36  ;;  %v3866_v38 = vpop.f32.mrb[7].mxu1  ;;  %v5282_v39 = vadd.f32 %v1335_v34, %v5269_v21 }
 0x477   : > { %v1339_v40 = vsel %vm1214_vm4, %v5282_v39, -inf  ;;  %v5287_v41 = vadd.f32 %v1336_v37, %v5272_v27 }
 0x478   : > { %1340 = vmax.xlane.f32.xlu0 %v1339_v40 }
 0x479   : > { %v1342_v46 = vsel %vm1214_vm4, %v5287_v41, -inf }
 0x47a   : > { %v1454_v42 = vpop.f32.mrb[8].mxu1 }
 0x47b   : > { %v1461_v44 = vmul.f32 0.17677669, %v1454_v42  ;;  %v3877_v45 = vpop.f32.mrb[9].mxu1 }
 0x47c   : > { %1343 = vmax.xlane.f32.xlu0 %v1342_v46  ;;  %v1457_v47 = vpop.f32.mrb[10].mxu1 }
 0x47d   : > { %v1462_v49 = vmul.f32 0.17677669, %v1457_v47  ;;  %v3878_v51 = vpop.f32.mrb[11].mxu1  ;;  %v5292_v52 = vadd.f32 %v1461_v44, %v5269_v21 }
 0x47f   : > { %v1465_v53 = vsel %vm1214_vm4, %v5292_v52, -inf  ;;  %v5297_v54 = vadd.f32 %v1462_v49, %v5272_v27 }
 0x480   : > { %1466 = vmax.xlane.f32.xlu0 %v1465_v53 }
 0x481   : > { %v1468_v55 = vsel %vm1214_vm4, %v5297_v54, -inf }
 0x482   : > { %1469 = vmax.xlane.f32.xlu1 %v1468_v55  ;;  %v1579_v56 = vpop.f32.mrb[12].mxu1 }
 0x483   : > { %v1586_v57 = vmul.f32 0.17677669, %v1579_v56  ;;  %v3889_v58 = vpop.f32.mrb[13].mxu1 }
 0x484   : > { %v1582_v59 = vpop.f32.mrb[14].mxu1 }
 0x485   : > { %v1587_v60 = vmul.f32 0.17677669, %v1582_v59  ;;  %v3890_v61 = vpop.f32.mrb[15].mxu1  ;;  %v5302_v62 = vadd.f32 %v1586_v57, %v5269_v21 }
 0x487   : > { %v1590_v63 = vsel %vm1214_vm4, %v5302_v62, -inf  ;;  %v5307_v0 = vadd.f32 %v1587_v60, %v5272_v27 }
 0x488   : > { %1591 = vmax.xlane.f32.xlu0 %v1590_v63 }
 0x489   : > { %v1593_v1 = vsel %vm1214_vm4, %v5307_v0, -inf }
 0x48a   : > { %1594 = vmax.xlane.f32.xlu1 %v1593_v1  ;;  %v1735_v2 = vpop.f32.mrb[16].mxu1 }
 0x48b   : > { %v1742_v3 = vmul.f32 0.17677669, %v1735_v2  ;;  %v3901_v4 = vpop.f32.mrb[17].mxu1 }
 0x48c   : > { %v1738_v5 = vpop.f32.mrb[18].mxu1 }
 0x48d   : > { %v1743_v6 = vmul.f32 0.17677669, %v1738_v5  ;;  %v3902_v7 = vpop.f32.mrb[19].mxu1  ;;  %v5312_v8 = vadd.f32 %v1742_v3, %v5269_v21 }
 0x48f   : > { %v1746_v9 = vsel %vm1214_vm4, %v5312_v8, -inf  ;;  %v5317_v10 = vadd.f32 %v1743_v6, %v5272_v27 }
 0x490   : > { %1747 = vmax.xlane.f32.xlu0 %v1746_v9 }
 0x491   : > { %v1749_v11 = vsel %vm1214_vm4, %v5317_v10, -inf }
 0x492   : > { %1750 = vmax.xlane.f32.xlu1 %v1749_v11  ;;  %v1859_v12 = vpop.f32.mrb[20].mxu1  ;;  %v1217_v13 = vpop.xlane.xlu0 %1216 }
 0x493   : > { %v1866_v14 = vmul.f32 0.17677669, %v1859_v12  ;;  %v1221_v15 = vsub.f32 %v1212_v18, %v1217_v13  ;;  %v3913_v16 = vpop.f32.mrb[21].mxu1 }
 0x494   : > { %v1220_v24 = vpop.xlane.xlu1 %1219  ;;  %v1862_v25 = vpop.f32.mrb[22].mxu1 }
 0x495   : > { %v1223_v26 = vmul.f32 1.442695, %v1221_v15  ;;  %v1222_v28 = vsub.f32 %v5277_v31, %v1220_v24  ;;  %v1867_v29 = vmul.f32 0.17677669, %v1862_v25  ;;  %v3914_v30 = vpop.f32.mrb[23].mxu1  ;;  %v5323_v32 = vadd.f32 %v1866_v14, %v5269_v21 }
 0x497   : > { %4225 = vpow2.f32 %v1223_v26  ;;  %v1225_v33 = vmul.f32 1.442695, %v1222_v28  ;;  %v1870_v34 = vsel %vm1214_vm4, %v5323_v32, -inf  ;;  %v5328_v35 = vadd.f32 %v1867_v29, %v5272_v27 }
 0x498   : > { %1871 = vmax.xlane.f32.xlu0 %v1870_v34 }
 0x499   : > { %4227 = vpow2.f32 %v1225_v33  ;;  %v1873_v18 = vsel %vm1214_vm4, %v5328_v35, -inf }
 0x49a   : > { %1874 = vmax.xlane.f32.xlu1 %v1873_v18  ;;  %v1985_v31 = vpop.f32.mrb[24].mxu1 }
 0x49b   : > { %v1992_v36 = vmul.f32 0.17677669, %v1985_v31  ;;  %v3925_v37 = vpop.f32.mrb[25].mxu1 }
 0x49c   : > { %v1988_v38 = vpop.f32.mrb[26].mxu1 }
 0x49d   : > { %v1993_v40 = vmul.f32 0.17677669, %v1988_v38  ;;  %v3926_v42 = vpop.f32.mrb[27].mxu1  ;;  %v5333_v44 = vadd.f32 %v1992_v36, %v5269_v21 }
 0x49f   : > { %v1996_v45 = vsel %vm1214_vm4, %v5333_v44, -inf  ;;  %v5338_v46 = vadd.f32 %v1993_v40, %v5272_v27 }
 0x4a0   : > { %1997 = vmax.xlane.f32.xlu0 %v1996_v45 }
 0x4a1   : > { %v5340_v47 = vpop.eup %4225  ;;  %v1999_v49 = vsel %vm1214_vm4, %v5338_v46, -inf }
 0x4a2   : > { %2000 = vmax.xlane.f32.xlu1 %v1999_v49  ;;  %v2110_v51 = vpop.f32.mrb[28].mxu1  ;;  %v1227_v53 = vsel %vm1214_vm4, %v5340_v47, 0.0 }
 0x4a3   : > { %v5346_v55 = vpop.eup %4227  ;;  %v2117_v56 = vmul.f32 0.17677669, %v2110_v51  ;;  %v3937_v57 = vpop.f32.mrb[29].mxu1 }
 0x4a4   : > { %v2113_v58 = vpop.f32.mrb[30].mxu1  ;;  %1228 = vadd.xlane.f32.xlu0 %v1227_v53  ;;  %v1230_v59 = vsel %vm1214_vm4, %v5346_v55, 0.0 }
 0x4a5   : > { %v2118_v60 = vmul.f32 0.17677669, %v2113_v58  ;;  %v3938_v61 = vpop.f32.mrb[31].mxu1  ;;  %v5351_v63 = vadd.f32 %v2117_v56, %v5269_v21 }
 0x4a6   : > { %1231 = vadd.xlane.f32.xlu1 %v1230_v59 }
 0x4a7   : > { %v2121_v1 = vsel %vm1214_vm4, %v5351_v63, -inf  ;;  %v5356_v2 = vadd.f32 %v2118_v60, %v5272_v27 }
 0x4a8   : > { %2122 = vmax.xlane.f32.xlu0 %v2121_v1 }
 0x4a9   : > { %v2124_v3 = vsel %vm1214_vm4, %v5356_v2, -inf }
 0x4aa   : > { %2125 = vmax.xlane.f32.xlu1 %v2124_v3 }
 0x4bb   : > { %1488 = vrot.lane.b32.xlu1 %v5215_v50, %s4678_s28 }
 0x4be   : > { %1363 = vrot.lane.b32.xlu0 %v5215_v50, %s4677_s24 }
 0x505   : > { %v1341_v21 = vpop.xlane.xlu0 %1340 }
 0x506   : > { %v1345_v4 = vsub.f32 %v5282_v39, %v1341_v21 }
 0x508   : > { %v1347_v5 = vmul.f32 1.442695, %v1345_v4 }
 0x509   : > { %v1344_v6 = vpop.xlane.xlu0 %1343 }
 0x50a   : > { %4229 = vpow2.f32 %v1347_v5  ;;  %v1346_v27 = vsub.f32 %v5287_v41, %v1344_v6 }
 0x50c   : > { %v1349_v7 = vmul.f32 1.442695, %v1346_v27 }
 0x50d   : > { %v1467_v9 = vpop.xlane.xlu0 %1466 }
 0x50e   : > { %4231 = vpow2.f32 %v1349_v7  ;;  %v1471_v11 = vsub.f32 %v5292_v52, %v1467_v9 }
 0x50f   : > { %v1470_v12 = vpop.xlane.xlu1 %1469 }
 0x510   : > { %v1473_v13 = vmul.f32 1.442695, %v1471_v11  ;;  %v1472_v14 = vsub.f32 %v5297_v54, %v1470_v12 }
 0x512   : > { %4233 = vpow2.f32 %v1473_v13  ;;  %v1475_v15 = vmul.f32 1.442695, %v1472_v14 }
 0x514   : > { %v5368_v16 = vpop.eup %4229  ;;  %4235 = vpow2.f32 %v1475_v15 }
 0x515   : > { %v1592_v39 = vpop.xlane.xlu0 %1591  ;;  %v1351_v24 = vsel %vm1214_vm4, %v5368_v16, 0.0 }
 0x516   : > { %v1596_v41 = vsub.f32 %v5302_v62, %v1592_v39  ;;  %1352 = vadd.xlane.f32.xlu0 %v1351_v24 }
 0x517   : > { %v1595_v25 = vpop.xlane.xlu1 %1594 }
 0x518   : > { %v5373_v26 = vpop.eup %4231  ;;  %v1598_v52 = vmul.f32 1.442695, %v1596_v41  ;;  %v1597_v28 = vsub.f32 %v5307_v0, %v1595_v25 }
 0x519   : > { %v1354_v54 = vsel %vm1214_vm4, %v5373_v26, 0.0 }
 0x51a   : > { %4237 = vpow2.f32 %v1598_v52  ;;  %v1600_v29 = vmul.f32 1.442695, %v1597_v28  ;;  %1355 = vadd.xlane.f32.xlu1 %v1354_v54 }
 0x51c   : > { %v5378_v30 = vpop.eup %4233  ;;  %4239 = vpow2.f32 %v1600_v29 }
 0x51d   : > { %v1748_v33 = vpop.xlane.xlu0 %1747  ;;  %v1477_v62 = vsel %vm1214_vm4, %v5378_v30, 0.0 }
 0x51e   : > { %v5382_v34 = vpop.eup %4235  ;;  %v1752_v18 = vsub.f32 %v5312_v8, %v1748_v33  ;;  %1478 = vadd.xlane.f32.xlu0 %v1477_v62 }
 0x51f   : > { %v1751_v31 = vpop.xlane.xlu1 %1750  ;;  %v1480_v0 = vsel %vm1214_vm4, %v5382_v34, 0.0 }
 0x520   : > { %v1754_v36 = vmul.f32 1.442695, %v1752_v18  ;;  %v1753_v37 = vsub.f32 %v5317_v10, %v1751_v31  ;;  %1481 = vadd.xlane.f32.xlu1 %v1480_v0 }
 0x522   : > { %4241 = vpow2.f32 %v1754_v36  ;;  %v1756_v38 = vmul.f32 1.442695, %v1753_v37 }
 0x524   : > { %v5388_v40 = vpop.eup %4237  ;;  %4243 = vpow2.f32 %v1756_v38 }
 0x525   : > { %v1872_v42 = vpop.xlane.xlu0 %1871  ;;  %v1602_v45 = vsel %vm1214_vm4, %v5388_v40, 0.0 }
 0x526   : > { %v5392_v49 = vpop.eup %4239  ;;  %v1876_v8 = vsub.f32 %v5323_v32, %v1872_v42  ;;  %1603 = vadd.xlane.f32.xlu0 %v1602_v45 }
 0x527   : > { %v1875_v51 = vpop.xlane.xlu1 %1874  ;;  %v1605_v53 = vsel %vm1214_vm4, %v5392_v49, 0.0 }
 0x528   : > { %v1878_v10 = vmul.f32 1.442695, %v1876_v8  ;;  %v1877_v56 = vsub.f32 %v5328_v35, %v1875_v51  ;;  %1606 = vadd.xlane.f32.xlu1 %v1605_v53 }
 0x52a   : > { %4245 = vpow2.f32 %v1878_v10  ;;  %v1880_v57 = vmul.f32 1.442695, %v1877_v56 }
 0x52c   : > { %v5398_v58 = vpop.eup %4241  ;;  %4247 = vpow2.f32 %v1880_v57 }
 0x52d   : > { %v1998_v59 = vpop.xlane.xlu0 %1997  ;;  %v1758_v60 = vsel %vm1214_vm4, %v5398_v58, 0.0 }
 0x52e   : > { %v5402_v61 = vpop.eup %4243  ;;  %1759 = vadd.xlane.f32.xlu0 %v1758_v60  ;;  %v2002_v29 = vsub.f32 %v5333_v44, %v1998_v59 }
 0x52f   : > { %v2001_v32 = vpop.xlane.xlu1 %2000  ;;  %v1761_v1 = vsel %vm1214_vm4, %v5402_v61, 0.0 }
 0x530   : > { %v2003_v3 = vsub.f32 %v5338_v46, %v2001_v32  ;;  %1762 = vadd.xlane.f32.xlu1 %v1761_v1  ;;  %v2004_v33 = vmul.f32 1.442695, %v2002_v29 }
 0x531   : > { %v1229_v35 = vpop.xlane.xlu0 %1228 }
 0x532   : > { %v2006_v21 = vmul.f32 1.442695, %v2003_v3  ;;  %4249 = vrcp.f32 %v1229_v35 }
 0x533   : > { %v1232_v4 = vpop.xlane.xlu1 %1231 }
 0x534   : > { %v5407_v5 = vpop.eup %4245  ;;  %4251 = vpow2.f32 %v2006_v21 }
 0x535   : > { %4253 = vrcp.f32 %v1232_v4  ;;  %v2123_v6 = vpop.xlane.xlu0 %2122  ;;  %v1882_v27 = vsel %vm1214_vm4, %v5407_v5, 0.0 }
 0x536   : > { %v5411_v7 = vpop.eup %4247  ;;  %v2127_v9 = vsub.f32 %v5351_v63, %v2123_v6  ;;  %1883 = vadd.xlane.f32.xlu1 %v1882_v27 }
 0x537   : > { %v2126_v11 = vpop.xlane.xlu1 %2125  ;;  %v1885_v13 = vsel %vm1214_vm4, %v5411_v7, 0.0 }
 0x538   : > { %v2129_v46 = vmul.f32 1.442695, %v2127_v9  ;;  %v2128_v12 = vsub.f32 %v5356_v2, %v2126_v11 }
 0x539   : > { %v1364_v28 = vpop.permute.xlu0 %1363 }
 0x53a   : > { %4255 = vpow2.f32 %v2129_v46  ;;  %v2131_v14 = vmul.f32 1.442695, %v2128_v12  ;;  %1886 = vadd.xlane.f32.xlu1 %v1885_v13 }
 0x53b   : > { %v1489_v18 = vpop.permute.xlu1 %1488 }
 0x53c   : > { %4257 = vpow2.f32 %v2131_v14  ;;  %v4250_v15 = vpop.eup %4249 }
 0x53d   : > { %v1234_v63 = vmul.f32 %v4250_v15, %v5340_v47  ;;  %4259 = vpow2.f32 %v2004_v33 }
 0x53e   : > { %v5417_v39 = vpop.eup %4251 }
 0x53f   : > { %v4254_v24 = vpop.eup %4253  ;;  %v2011_v41 = vsel %vm1214_vm4, %v5417_v39, 0.0 }
 0x540   : > { %v1236_v25 = vmul.f32 %v4254_v24, %v5346_v55  ;;  %2012 = vadd.xlane.f32.xlu1 %v2011_v41 }
 0x542   : > { %v1237_v2 = vpack.c.bf16 %v1236_v25, %v1234_v63 }
 0x544   : > { %v5423_v52 = vpop.eup %4255  ;;  %3858 = vmatmul.mubr.msk.bf16.vlgmr.msra.gmra.mrb[12].mxu0 %vm1214_vm4, %v1237_v2  ;;  %1613 = vrot.lane.b32.xlu0 %v5215_v50, %s4679_s1 }
 0x545   : > { %3868 = vmatpush3.bf16.msra.mxu0 %v1364_v28  ;;  %v2133_v54 = vsel %vm1214_vm4, %v5423_v52, 0.0  ;;  %3869 = vmatprep.mubr.msk.bf16.mxu0 %vm4676_vm0, %v4675_v17 }
 0x546   : > { %v5432_v47 = vpop.eup %4257  ;;  %2134 = vadd.xlane.f32.xlu1 %v2133_v54  ;;  %3879 = vmatprep.subr.bf16.mxu0 %v4675_v17 }
 0x547   : > { %v2136_v55 = vsel %vm1214_vm4, %v5432_v47, 0.0  ;;  %v5440_v50 = vpop.eup %4259 }
 0x548   : > { %v2008_v62 = vsel %vm1214_vm4, %v5440_v50, 0.0 }
 0x54a   : > { %2137 = vadd.xlane.f32.xlu1 %v2136_v55 }
 0x55b   : > { %1894 = vrot.lane.b32.xlu1 %v5213_v48, %s4677_s24 }
 0x563   : > { %2009 = vadd.xlane.f32.xlu0 %v2008_v62 }
 0x579   : > { %2019 = vrot.lane.b32.xlu0 %v5213_v48, %s4678_s28 }
 0x57d   : > { %2144 = vrot.lane.b32.xlu0 %v5213_v48, %s4679_s1 }
 0x5a3   : > { %v1353_v31 = vpop.xlane.xlu0 %1352 }
 0x5a4   : > { %4261 = vrcp.f32 %v1353_v31 }
 0x5a7   : > { %v1356_v44 = vpop.xlane.xlu1 %1355 }
 0x5a8   : > { %4263 = vrcp.f32 %v1356_v44 }
 0x5ab   : > { %v1479_v0 = vpop.xlane.xlu0 %1478 }
 0x5ac   : > { %4265 = vrcp.f32 %v1479_v0 }
 0x5ad   : > { %v1482_v36 = vpop.xlane.xlu1 %1481 }
 0x5ae   : > { %4267 = vrcp.f32 %v1482_v36  ;;  %v4262_v37 = vpop.eup %4261 }
 0x5af   : > { %v1358_v42 = vmul.f32 %v4262_v37, %v5368_v16 }
 0x5b2   : > { %v4264_v38 = vpop.eup %4263 }
 0x5b3   : > { %v1360_v45 = vmul.f32 %v4264_v38, %v5373_v26  ;;  %v1604_v8 = vpop.xlane.xlu0 %1603 }
 0x5b4   : > { %4269 = vrcp.f32 %v1604_v8 }
 0x5b5   : > { %v1607_v51 = vpop.xlane.xlu1 %1606  ;;  %v1361_v53 = vpack.c.bf16 %v1360_v45, %v1358_v42 }
 0x5b6   : > { %4271 = vrcp.f32 %v1607_v51  ;;  %v4266_v10 = vpop.eup %4265 }
 0x5b7   : > { %3870 = vmatmul.mubr.msk.bf16.vlgmr.msra.gmra.mrb[16].mxu0 %vm1214_vm4, %v1361_v53  ;;  %v1484_v16 = vmul.f32 %v4266_v10, %v5378_v30 }
 0x5b8   : > { %v4268_v56 = vpop.eup %4267  ;;  %3880 = vmatpush3.bf16.msra.mxu0 %v1489_v18  ;;  %3881 = vmatprep.mubr.msk.bf16.mxu0 %vm4676_vm0, %v4675_v17 }
 0x5b9   : > { %v1486_v57 = vmul.f32 %v4268_v56, %v5382_v34  ;;  %3891 = vmatprep.subr.bf16.mxu0 %v4675_v17 }
 0x5bb   : > { %v1760_v26 = vpop.xlane.xlu0 %1759  ;;  %v1487_v60 = vpack.c.bf16 %v1486_v57, %v1484_v16 }
 0x5bc   : > { %4273 = vrcp.f32 %v1760_v26 }
 0x5bd   : > { %v1763_v59 = vpop.xlane.xlu1 %1762 }
 0x5be   : > { %4275 = vrcp.f32 %v1763_v59  ;;  %v4270_v32 = vpop.eup %4269 }
 0x5bf   : > { %3882 = vmatmul.mubr.msk.bf16.vlgmr.msra.gmra.mrb[20].mxu0 %vm1214_vm4, %v1487_v60  ;;  %v1614_v1 = vpop.permute.xlu0 %1613  ;;  %v1609_v30 = vmul.f32 %v4270_v32, %v5388_v40  ;;  %v4129_v60 = vld [vmem:[%s5097_s16] sm:$0xff]   ;;  %v4130_v32 = vld [vmem:[%s5097_s16 + $0x8] sm:$0xff]  }
 0x5c0   : > { %v4272_v3 = vpop.eup %4271  ;;  %3892 = vmatpush3.bf16.msra.mxu0 %v1614_v1  ;;  %3893 = vmatprep.mubr.msk.bf16.mxu0 %vm4676_vm0, %v4675_v17  ;;  %v4131_v1 = vld [vmem:[%s5097_s16 + $0x10] sm:$0xff]  }
 0x5c1   : > { %v1611_v34 = vmul.f32 %v4272_v3, %v5392_v49  ;;  %3903 = vmatprep.subr.bf16.mxu0 %v4675_v17  ;;  %3945 = vmatprep.subr.bf16.mxu1 %v4129_v60 }
 0x5c2   : > { %3946 = vmatpush3.bf16.msra.mxu1 %v4129_v60 }
 0x5c3   : > { %v1884_v35 = vpop.xlane.xlu1 %1883  ;;  %v1612_v21 = vpack.c.bf16 %v1611_v34, %v1609_v30  ;;  %3947 = vmatprep.subr.bf16.mxu1 %v4130_v32 }
 0x5c6   : > { %v4274_v4 = vpop.eup %4273  ;;  %3948 = vmatpush3.bf16.msra.mxu1 %v4130_v32 }
 0x5c7   : > { %3894 = vmatmul.mubr.msk.bf16.vlgmr.msra.gmra.mrb[24].mxu0 %vm1214_vm4, %v1612_v21  ;;  %v1887_v9 = vpop.xlane.xlu1 %1886  ;;  %v1765_v49 = vmul.f32 %v4274_v4, %v5398_v58  ;;  %3949 = vmatprep.subr.bf16.mxu1 %v4131_v1 }
 0x5c8   : > { %v4276_v6 = vpop.eup %4275  ;;  %3904 = vmatpush3.bf16.msra.mxu0 %v5213_v48  ;;  %3905 = vmatprep.mubr.msk.bf16.mxu0 %vm4676_vm0, %v4675_v17  ;;  %4277 = vrcp.f32 %v1887_v9  ;;  %v4135_v9 = vld [vmem:[%s5097_s16 + $0x30] sm:$0xff]  }
 0x5c9   : > { %v1767_v27 = vmul.f32 %v4276_v6, %v5402_v61  ;;  %3915 = vmatprep.subr.bf16.mxu0 %v4675_v17  ;;  %4279 = vrcp.f32 %v1884_v35  ;;  %v4132_v35 = vld [vmem:[%s5097_s16 + $0x18] sm:$0xff]   ;;  %v4133_v6 = vld [vmem:[%s5097_s16 + $0x20] sm:$0xff]  }
 0x5ca   : > { %3950 = vmatpush3.bf16.msra.mxu1 %v4131_v1 }
 0x5cb   : > { %v1768_v40 = vpack.c.bf16 %v1767_v27, %v1765_v49  ;;  %3951 = vmatprep.subr.bf16.mxu1 %v4132_v35  ;;  %v4134_v27 = vld [vmem:[%s5097_s16 + $0x28] sm:$0xff]  }
 0x5cd   : > { %v2013_v11 = vpop.xlane.xlu1 %2012 }
 0x5ce   : > { %4281 = vrcp.f32 %v2013_v11  ;;  %3952 = vmatpush3.bf16.msra.mxu1 %v4132_v35  ;;  %v4136_v11 = vld [vmem:[%s5097_s16 + $0x38] sm:$0xff]   ;;  %s5862_s16 = scalar_lea.vmem %s5793_s6, %s5107_s21  ;;  %v4363_v35 = vld [vmem:[#allocation14 + $0x8] sm:$0xff] }
 0x5cf   : > { %3906 = vmatmul.mubr.msk.bf16.vlgmr.msra.gmra.mrb[28].mxu0 %vm1214_vm4, %v1768_v40  ;;  %3953 = vmatprep.subr.bf16.mxu1 %v4133_v6 }
 0x5d0   : > { %3917 = vmatprep.mubr.msk.bf16.mxu0 %vm4676_vm0, %v4675_v17 }
 0x5d2   : > { %v4278_v46 = vpop.eup %4277  ;;  %3954 = vmatpush3.bf16.msra.mxu1 %v4133_v6 }
 0x5d3   : > { %v2135_v48 = vpop.xlane.xlu1 %2134  ;;  %v4280_v13 = vpop.eup %4279  ;;  %v1891_v61 = vmul.f32 %v4278_v46, %v5411_v7  ;;  %3955 = vmatprep.subr.bf16.mxu1 %v4134_v27 }
 0x5d4   : > { %v1889_v14 = vmul.f32 %v4280_v13, %v5407_v5 }
 0x5d6   : > { %v1892_v58 = vpack.c.bf16 %v1891_v61, %v1889_v14  ;;  %3956 = vmatpush3.bf16.msra.mxu1 %v4134_v27  ;;  %v4364_v27 = vld [vmem:[#allocation14 + $0x18] sm:$0xff] }
 0x5d7   : > { %v2138_v12 = vpop.xlane.xlu1 %2137  ;;  %3957 = vmatprep.subr.bf16.mxu1 %v4135_v9 }
 0x5d8   : > { %v4282_v5 = vpop.eup %4281 }
 0x5d9   : > { %v2017_v63 = vmul.f32 %v4282_v5, %v5417_v39 }
 0x5da   : > { %3958 = vmatpush3.bf16.msra.mxu1 %v4135_v9 }
 0x5db   : > { %v1895_v15 = vpop.permute.xlu1 %1894  ;;  %3959 = vmatprep.subr.bf16.mxu1 %v4136_v11 }
 0x5dc   : > { %3916 = vmatpush3.bf16.msra.mxu0 %v1895_v15 }
 0x5dd   : > { %3927 = vmatprep.subr.bf16.mxu0 %v4675_v17 }
 0x5de   : > { %3960 = vmatpush3.bf16.msra.mxu1 %v4136_v11  ;;  %v4139_v11 = vld [vmem:[%s5099_s23 + $0x4] ss:$16 sps:$4 sm:$0xff]  }
 0x5df   : > { %3918 = vmatmul.mubr.msk.bf16.vlgmr.msra.gmra.mrb[32].mxu0 %vm1214_vm4, %v1892_v58 }
 0x5e0   : > { %3929 = vmatprep.mubr.msk.bf16.mxu0 %vm4676_vm0, %v4675_v17 }
 0x5f0   : > { %v2010_v24 = vpop.xlane.xlu0 %2009 }
 0x5f1   : > { %4283 = vrcp.f32 %v2010_v24 }
 0x5f2   : > { %4285 = vrcp.f32 %v2138_v12 }
 0x5f3   : > { %4287 = vrcp.f32 %v2135_v48 }
 0x5f4   : > { %v2020_v41 = vpop.permute.xlu0 %2019 }
 0x5f5   : > { %3928 = vmatpush3.bf16.msra.mxu0 %v2020_v41 }
 0x5f6   : > { %3939 = vmatprep.subr.bf16.mxu0 %v4675_v17 }
 0x5f8   : > { %v2145_v54 = vpop.permute.xlu0 %2144 }
 0x5fb   : > { %v4284_v7 = vpop.eup %4283 }
 0x5fc   : > { %v2015_v25 = vmul.f32 %v4284_v7, %v5440_v50  ;;  %v4286_v28 = vpop.eup %4285 }
 0x5fd   : > { %v4288_v55 = vpop.eup %4287  ;;  %v2142_v29 = vmul.f32 %v4286_v28, %v5432_v47 }
 0x5fe   : > { %v2018_v2 = vpack.c.bf16 %v2017_v63, %v2015_v25  ;;  %v2140_v33 = vmul.f32 %v4288_v55, %v5423_v52 }
 0x600   : > { %3930 = vmatmul.mubr.msk.bf16.vlgmr.msra.gmra.mrb[36].mxu0 %vm1214_vm4, %v2018_v2  ;;  %v2143_v62 = vpack.c.bf16 %v2142_v29, %v2140_v33 }
 0x601   : > { %3940 = vmatpush3.bf16.msra.mxu0 %v2145_v54  ;;  %3941 = vmatprep.mubr.msk.bf16.mxu0 %vm4676_vm0, %v4675_v17 }
 0x602   : > { %2633 = vmatprep.subr.bf16.mxu0 %v4139_v11 }
 0x608   : > { %3942 = vmatmul.mubr.msk.bf16.vlgmr.msra.gmra.mrb[40].mxu0 %vm1214_vm4, %v2143_v62 }
 0x609   : > { %2665 = vmatprep.mubr.bf16.mxu0 %v4674_v43 }
 0x617   : > { %v5488_v39 = vpop.f32.mrb[12].mxu0 }
 0x618   : > { %v3859_v50 = vpop.f32.mrb[13].mxu0 }
 0x619   : > { %v5490_v18 = vpop.f32.mrb[14].mxu0 }
 0x61a   : > { %v3860_v31 = vpop.f32.mrb[15].mxu0 }
 0x68a   : > { %v1403_v44 = vpop.f32.mrb[16].mxu0 }
 0x68b   : > { %v3871_v0 = vpop.f32.mrb[17].mxu0 }
 0x68c   : > { %v1406_v36 = vpop.f32.mrb[18].mxu0 }
 0x68d   : > { %v4067_v37 = vpack.i.bf16 %v1406_v36, %v1403_v44  ;;  %v3872_v17 = vpop.f32.mrb[19].mxu0 }
 0x68f   : > { %4068 = vrot.lane.b32.xlu0 %v4067_v37, %s4679_s1 }
 0x692   : > { %v1528_v47 = vpop.f32.mrb[20].mxu0 }
 0x693   : > { %v3883_v52 = vpop.f32.mrb[21].mxu0 }
 0x694   : > { %v1531_v38 = vpop.f32.mrb[22].mxu0 }
 0x695   : > { %v4072_v42 = vpack.i.bf16 %v1531_v38, %v1528_v47  ;;  %v3884_v45 = vpop.f32.mrb[23].mxu0 }
 0x697   : > { %4073 = vrot.lane.b32.xlu1 %v4072_v42, %s4678_s28 }
 0x69a   : > { %v1653_v8 = vpop.f32.mrb[24].mxu0 }
 0x69b   : > { %v3895_v51 = vpop.f32.mrb[25].mxu0 }
 0x69c   : > { %v1656_v53 = vpop.f32.mrb[26].mxu0 }
 0x69d   : > { %v4077_v10 = vpack.i.bf16 %v1656_v53, %v1653_v8  ;;  %v3896_v56 = vpop.f32.mrb[27].mxu0 }
 0x69f   : > { %4078 = vrot.lane.b32.xlu1 %v4077_v10, %s4677_s24 }
 0x6a2   : > { %v5495_v57 = vpop.f32.mrb[28].mxu0 }
 0x6a3   : > { %v3907_v16 = vpop.f32.mrb[29].mxu0 }
 0x6a4   : > { %v5497_v26 = vpop.f32.mrb[30].mxu0 }
 0x6a5   : > { %v3908_v59 = vpop.f32.mrb[31].mxu0 }
 0x6a6   : > { %v4361_v59 = vld [vmem:[#allocation14] sm:$0xff] }
 0x6b2   : > { %v1934_v3 = vpop.f32.mrb[32].mxu0 }
 0x6b3   : > { %v3919_v34 = vpop.f32.mrb[33].mxu0 }
 0x6b4   : > { %v1937_v30 = vpop.f32.mrb[34].mxu0 }
 0x6b5   : > { %v4082_v21 = vpack.i.bf16 %v1937_v30, %v1934_v3  ;;  %v3920_v4 = vpop.f32.mrb[35].mxu0  ;;  %v4362_v3 = vld [vmem:[#allocation14 + $0x10] sm:$0xff] }
 0x6b7   : > { %4083 = vrot.lane.b32.xlu0 %v4082_v21, %s4679_s1 }
 0x6d3   : > { %v2059_v49 = vpop.f32.mrb[36].mxu0 }
 0x6d4   : > { %v3931_v40 = vpop.f32.mrb[37].mxu0 }
 0x6d5   : > { %v2062_v48 = vpop.f32.mrb[38].mxu0  ;;  %v4137_v40 = vld [vmem:[%s5099_s23] ss:$16 sps:$4 sm:$0xff]  }
 0x6d6   : > { %v4087_v46 = vpack.i.bf16 %v2062_v48, %v2059_v49  ;;  %v3932_v12 = vpop.f32.mrb[39].mxu0  ;;  %v4140_v48 = vld [vmem:[%s5099_s23 + $0x8] ss:$16 sps:$4 sm:$0xff]   ;;  %2634 = vmatpush1.bf16.msra.mxu0 %v4137_v40 }
 0x6d7   : > { %v4145_v12 = vld [vmem:[%s5099_s23 + $0x24] ss:$16 sps:$4 sm:$0xff]  }
 0x6d8   : > { %4088 = vrot.lane.b32.xlu0 %v4087_v46, %s4678_s28  ;;  %v4142_v46 = vld [vmem:[%s5099_s23 + $0xc] ss:$16 sps:$4 sm:$0xff]   ;;  %2635 = vmatprep.subr.bf16.mxu0 %v4145_v12 }
 0x6d9   : > { %2686 = vmatprep.subr.bf16.mxu1 %v4142_v46 }
 0x6db   : > { %v2184_v13 = vpop.f32.mrb[40].mxu0 }
 0x6dc   : > { %v3943_v61 = vpop.f32.mrb[41].mxu0 }
 0x6dd   : > { %v2187_v14 = vpop.f32.mrb[42].mxu0  ;;  %v4143_v61 = vld [vmem:[%s5099_s23 + $0x20] ss:$16 sps:$4 sm:$0xff]  }
 0x6de   : > { %v4092_v15 = vpack.i.bf16 %v2187_v14, %v2184_v13  ;;  %v3944_v58 = vpop.f32.mrb[43].mxu0  ;;  %v4148_v13 = vld [vmem:[%s5099_s23 + $0x2c] ss:$16 sps:$4 sm:$0xff]   ;;  %v4146_v14 = vld [vmem:[%s5099_s23 + $0x28] ss:$16 sps:$4 sm:$0xff]   ;;  %2636 = vmatpush1.bf16.msra.mxu0 %v4143_v61 }
 0x6df   : > { %v3627_v61 = vld [vmem:[%s774_s30] ss:$0 sm:$0xff] }
 0x6e0   : > { %4093 = vrot.lane.b32.xlu1 %v4092_v15, %s4677_s24 }
 0x701   : > { %v4069_v24 = vpop.permute.xlu0 %4068 }
 0x702   : > { %v4071_v5 = vunpack.i.h.bf16 %v4069_v24  ;;  %v4070_v7 = vunpack.i.l.bf16 %v4069_v24 }
 0x704   : > { %v1685_v28 = vsel %vm1162_vm1, %v5490_v18, %v4071_v5  ;;  %v1684_v54 = vsel %vm1162_vm1, %v5488_v39, %v4070_v7 }
 0x709   : > { %v4074_v41 = vpop.permute.xlu1 %4073 }
 0x70a   : > { %v4076_v63 = vunpack.i.h.bf16 %v4074_v41  ;;  %v4075_v25 = vunpack.i.l.bf16 %v4074_v41 }
 0x70c   : > { %v1687_v33 = vsel %vm1686_vm5, %v1684_v54, %v4075_v25  ;;  %v1688_v62 = vsel %vm1686_vm5, %v1685_v28, %v4076_v63 }
 0x711   : > { %v4079_v2 = vpop.permute.xlu1 %4078 }
 0x712   : > { %v4081_v55 = vunpack.i.h.bf16 %v4079_v2  ;;  %v4080_v29 = vunpack.i.l.bf16 %v4079_v2 }
 0x714   : > { %v1690_v50 = vsel %vm1689_vm6, %v1687_v33, %v4080_v29  ;;  %v1691_v31 = vsel %vm1689_vm6, %v1688_v62, %v4081_v55 }
 0x715   : > { %v2221_v44 = vpack.c.bf16 %v1691_v31, %v1690_v50  ;;  %v4151_v31 = vld [vmem:[%s5099_s23 + $0x44] ss:$16 sps:$4 sm:$0xff]  }
 0x716   : > { %2637 = vmatprep.subr.bf16.mxu0 %v4151_v31 }
 0x717   : > { %3961 = vmatprep.mubr.bf16.mxu1 %v2221_v44  ;;  %v4154_v44 = vld [vmem:[%s5099_s23 + $0x4c] ss:$16 sps:$4 sm:$0xff]  }
 0x729   : > { %v4084_v0 = vpop.permute.xlu0 %4083 }
 0x72a   : > { %v4086_v37 = vunpack.i.h.bf16 %v4084_v0  ;;  %v4085_v17 = vunpack.i.l.bf16 %v4084_v0  ;;  %v4149_v0 = vld [vmem:[%s5099_s23 + $0x40] ss:$16 sps:$4 sm:$0xff]  }
 0x72b   : > { %2638 = vmatpush1.bf16.msra.mxu0 %v4149_v0  ;;  %v4185_v0 = vld [vmem:[%s5137_s9 + $0x40] sm:$0xff]  }
 0x72c   : > { %v2216_v52 = vsel %vm1162_vm1, %v5497_v26, %v4086_v37  ;;  %v2215_v38 = vsel %vm1162_vm1, %v5495_v57, %v4085_v17  ;;  %v3626_v57 = vld [vmem:[%s5862_s16] ss:$0 sm:$0xff]  ;;  %v4157_v37 = vld [vmem:[%s5099_s23 + $0x64] ss:$16 sps:$4 sm:$0xff]  }
 0x72d   : > { %v4160_v17 = vld [vmem:[%s5099_s23 + $0x6c] ss:$16 sps:$4 sm:$0xff]   ;;  %2639 = vmatprep.subr.bf16.mxu0 %v4157_v37  ;;  %v4188_v37 = vld [vmem:[%s5137_s9 + $0x80] sm:$0xff]  }
 0x74a   : > { %v4089_v36 = vpop.permute.xlu0 %4088 }
 0x74b   : > { %v4091_v18 = vunpack.i.h.bf16 %v4089_v36  ;;  %v4090_v47 = vunpack.i.l.bf16 %v4089_v36  ;;  %v4152_v36 = vld [vmem:[%s5099_s23 + $0x48] ss:$16 sps:$4 sm:$0xff]  }
 0x74d   : > { %v2217_v8 = vsel %vm1686_vm5, %v2215_v38, %v4090_v47  ;;  %v2218_v51 = vsel %vm1686_vm5, %v2216_v52, %v4091_v18  ;;  %v4155_v18 = vld [vmem:[%s5099_s23 + $0x60] ss:$16 sps:$4 sm:$0xff]   ;;  %v4158_v47 = vld [vmem:[%s5099_s23 + $0x68] ss:$16 sps:$4 sm:$0xff]   ;;  %v4166_v52 = vld [vmem:[%s5099_s23 + $0x8c] ss:$16 sps:$4 sm:$0xff]  }
 0x74e   : > { %2640 = vmatpush1.bf16.msra.mxu0 %v4155_v18  ;;  %v4161_v38 = vld [vmem:[%s5099_s23 + $0x80] ss:$16 sps:$4 sm:$0xff]   ;;  %v4191_v18 = vld [vmem:[%s5137_s9 + $0x8] sm:$0xff]  }
 0x752   : > { %v4094_v39 = vpop.permute.xlu1 %4093 }
 0x753   : > { %v4096_v42 = vunpack.i.h.bf16 %v4094_v39  ;;  %v4095_v45 = vunpack.i.l.bf16 %v4094_v39  ;;  %v4163_v39 = vld [vmem:[%s5099_s23 + $0x84] ss:$16 sps:$4 sm:$0xff]  }
 0x754   : > { %2641 = vmatprep.subr.bf16.mxu0 %v4163_v39  ;;  %v4193_v39 = vld [vmem:[%s5137_s9 + $0x50] sm:$0xff]  }
 0x755   : > { %v2219_v53 = vsel %vm1689_vm6, %v2217_v8, %v4095_v45  ;;  %v2220_v10 = vsel %vm1689_vm6, %v2218_v51, %v4096_v42  ;;  %v4164_v42 = vld [vmem:[%s5099_s23 + $0x88] ss:$16 sps:$4 sm:$0xff]   ;;  %2642 = vmatpush1.bf16.msra.mxu0 %v4161_v38  ;;  %v4169_v45 = vld [vmem:[%s5099_s23 + $0xa4] ss:$16 sps:$4 sm:$0xff]   ;;  %v4172_v8 = vld [vmem:[%s5099_s23 + $0xac] ss:$16 sps:$4 sm:$0xff]  }
 0x756   : > { %v2222_v56 = vpack.c.bf16 %v2220_v10, %v2219_v53  ;;  %v4167_v51 = vld [vmem:[%s5099_s23 + $0xa0] ss:$16 sps:$4 sm:$0xff]   ;;  %v4170_v53 = vld [vmem:[%s5099_s23 + $0xa8] ss:$16 sps:$4 sm:$0xff]   ;;  %2643 = vmatprep.subr.bf16.mxu0 %v4169_v45 }
 0x757   : > { %v4173_v10 = vld [vmem:[%s5099_s23 + $0xc0] ss:$16 sps:$4 sm:$0xff]   ;;  %v4197_v45 = vld [vmem:[%s5137_s9 + $0x58] sm:$0xff]  }
 0x758   : > { %3962 = vmatmul.mubr.bf16.vlgmr.msra.gmra.mrb[32].mxu1 %v2222_v56  ;;  %v4175_v56 = vld [vmem:[%s5099_s23 + $0xc4] ss:$16 sps:$4 sm:$0xff]  }
 0x759   : > { %2718 = vmatprep.mubr.bf16.mxu1 %v4674_v43  ;;  %2687 = vmatpush1.bf16.msra.mxu1 %v4140_v48  ;;  %v4195_v38 = vld [vmem:[%s5137_s9 + $0x10] sm:$0xff]  }
 0x75a   : > { %2688 = vmatprep.subr.bf16.mxu1 %v4148_v13  ;;  %2644 = vmatpush1.bf16.msra.mxu0 %v4167_v51  ;;  %v4199_v51 = vld [vmem:[%s5137_s9 + $0x18] sm:$0xff]  }
 0x75b   : > { %2645 = vmatprep.subr.bf16.mxu0 %v4175_v56  ;;  %v4202_v56 = vld [vmem:[%s5137_s9 + $0xe0] sm:$0xff]  }
 0x75d   : > { %2689 = vmatpush1.bf16.msra.mxu1 %v4146_v14 }
 0x75e   : > { %2690 = vmatprep.subr.bf16.mxu1 %v4154_v44  ;;  %2646 = vmatpush1.bf16.msra.mxu0 %v4173_v10  ;;  %v4201_v10 = vld [vmem:[%s5137_s9 + $0x60] sm:$0xff]  }
 0x761   : > { %2691 = vmatpush1.bf16.msra.mxu1 %v4152_v36  ;;  %v4187_v36 = vld [vmem:[%s5137_s9] sm:$0xff]  }
 0x762   : > { %2692 = vmatprep.subr.bf16.mxu1 %v4160_v17  ;;  %v4190_v17 = vld [vmem:[%s5137_s9 + $0xc8] sm:$0xff]  }
 0x765   : > { %2693 = vmatpush1.bf16.msra.mxu1 %v4158_v47  ;;  %v4192_v47 = vld [vmem:[%s5137_s9 + $0x88] sm:$0xff]  }
 0x766   : > { %2694 = vmatprep.subr.bf16.mxu1 %v4166_v52  ;;  %v4194_v52 = vld [vmem:[%s5137_s9 + $0xd0] sm:$0xff]  }
 0x769   : > { %2695 = vmatpush1.bf16.msra.mxu1 %v4164_v42  ;;  %v4196_v42 = vld [vmem:[%s5137_s9 + $0x90] sm:$0xff]  }
 0x76a   : > { %2696 = vmatprep.subr.bf16.mxu1 %v4172_v8  ;;  %v4198_v8 = vld [vmem:[%s5137_s9 + $0xd8] sm:$0xff]  }
 0x76d   : > { %2697 = vmatpush1.bf16.msra.mxu1 %v4170_v53  ;;  %v4200_v53 = vld [vmem:[%s5137_s9 + $0x98] sm:$0xff]  }
 0x82b   : > { %v3963_v16 = vpop.f32.mrb[32].mxu1 }
 0x82c   : > { %v2321_v26 = vpop.f32.mrb[33].mxu1  ;;  %v2338_v34 = vadd.f32 %v4362_v3, %v3963_v16  ;;  %v4176_v16 = vld [vmem:[%s5099_s23 + $0xc8] ss:$16 sps:$4 sm:$0xff]  }
 0x82d   : > { %v2336_v60 = vadd.f32 %v4361_v59, %v2321_v26  ;;  %v3964_v32 = vpop.f32.mrb[34].mxu1  ;;  %v4181_v26 = vld [vmem:[%s5099_s23 + $0xe4] ss:$16 sps:$4 sm:$0xff]   ;;  %v4184_v59 = vld [vmem:[%s5099_s23 + $0xec] ss:$16 sps:$4 sm:$0xff]  }
 0x82e   : > { %v2324_v1 = vpop.f32.mrb[35].mxu1  ;;  %v5537_v6 = vadd.f32 %v3626_v57, %v2338_v34  ;;  %v2339_v9 = vadd.f32 %v4364_v27, %v3964_v32  ;;  %2647 = vmatprep.subr.bf16.mxu0 %v4181_v26  ;;  %v4182_v32 = vld [vmem:[%s5099_s23 + $0xe8] ss:$16 sps:$4 sm:$0xff]  }
 0x82f   : > { %v5532_v30 = vadd.f32 %v3626_v57, %v2336_v60  ;;  %v2337_v21 = vadd.f32 %v4363_v35, %v2324_v1  ;;  %v4179_v60 = vld [vmem:[%s5099_s23 + $0xe0] ss:$16 sps:$4 sm:$0xff]   ;;  %v4205_v26 = vld [vmem:[%s5137_s9 + $0x68] sm:$0xff]  }
 0x830   : > { %v5541_v49 = vadd.f32 %v3626_v57, %v2339_v9  ;;  %2648 = vmatpush1.bf16.msra.mxu0 %v4179_v60  ;;  %v4207_v60 = vld [vmem:[%s5137_s9 + $0x28] sm:$0xff]  }
 0x831   : > { %v5534_v4 = vadd.f32 %v3626_v57, %v2337_v21  ;;  %2353 = vadd.xlane.f32.xlu0 %v5532_v30  ;;  %v4178_v57 = vld [vmem:[%s5099_s23 + $0xcc] ss:$16 sps:$4 sm:$0xff]   ;;  %3773 = vmatprep.subr.bf16.mxu0 %v4185_v0 }
 0x832   : > { %2698 = vmatprep.subr.bf16.mxu1 %v4178_v57  ;;  %v4204_v57 = vld [vmem:[%s5137_s9 + $0xa0] sm:$0xff]  }
 0x833   : > { %2355 = vadd.xlane.f32.xlu1 %v5534_v4  ;;  %2699 = vmatpush1.bf16.msra.mxu1 %v4176_v16  ;;  %v4203_v16 = vld [vmem:[%s5137_s9 + $0x20] sm:$0xff]  }
 0x834   : > { %2700 = vmatprep.subr.bf16.mxu1 %v4184_v59  ;;  %v4206_v59 = vld [vmem:[%s5137_s9 + $0xe8] sm:$0xff]  }
 0x835   : > { %2357 = vadd.xlane.f32.xlu0 %v5537_v6 }
 0x837   : > { %2701 = vmatpush1.bf16.msra.mxu1 %v4182_v32  ;;  %v4208_v32 = vld [vmem:[%s5137_s9 + $0xa8] sm:$0xff]  }
 0x839   : > { %2359 = vadd.xlane.f32.xlu0 %v5541_v49 }
 0x8be   : > { %v2354_v15 = vpop.xlane.xlu0 %2353 }
 0x8bf   : > { %v2361_v58 = vmul.f32 0.0078125, %v2354_v15 }
 0x8c0   : > { %v2356_v24 = vpop.xlane.xlu1 %2355 }
 0x8c1   : > { %v5553_v41 = vsub.f32 %v5532_v30, %v2361_v58  ;;  %v2362_v5 = vmul.f32 0.0078125, %v2356_v24 }
 0x8c2   : > { %v2358_v7 = vpop.xlane.xlu0 %2357 }
 0x8c3   : > { %v5556_v63 = vsub.f32 %v5534_v4, %v2362_v5  ;;  %v2363_v25 = vmul.f32 0.0078125, %v2358_v7  ;;  %v2369_v2 = vmul.f32 %v5553_v41, %v5553_v41  ;;  %v3628_v7 = vld [vmem:[%s777_s26] ss:$0 sm:$0xff] }
 0x8c5   : > { %v5561_v28 = vsub.f32 %v5537_v6, %v2363_v25  ;;  %2373 = vadd.xlane.f32.xlu0 %v2369_v2  ;;  %v2370_v54 = vmul.f32 %v5556_v63, %v5556_v63 }
 0x8c6   : > { %v2360_v55 = vpop.xlane.xlu0 %2359 }
 0x8c7   : > { %v2364_v29 = vmul.f32 0.0078125, %v2360_v55  ;;  %2375 = vadd.xlane.f32.xlu1 %v2370_v54  ;;  %v2371_v33 = vmul.f32 %v5561_v28, %v5561_v28 }
 0x8c9   : > { %v5568_v62 = vsub.f32 %v5541_v49, %v2364_v29  ;;  %2377 = vadd.xlane.f32.xlu0 %v2371_v33 }
 0x8cb   : > { %v2372_v50 = vmul.f32 %v5568_v62, %v5568_v62 }
 0x8cd   : > { %2379 = vadd.xlane.f32.xlu1 %v2372_v50 }
 0x952   : > { %v2374_v1 = vpop.xlane.xlu0 %2373 }
 0x953   : > { %v2381_v3 = vmul.f32 0.0078125, %v2374_v1  ;;  %v4209_v1 = vld [vmem:[%s5137_s9 + $0x70] sm:$0xff]  }
 0x954   : > { %v2376_v34 = vpop.xlane.xlu1 %2375 }
 0x955   : > { %v2385_v35 = vadd.f32 1e-05, %v2381_v3  ;;  %v2382_v21 = vmul.f32 0.0078125, %v2376_v34  ;;  %v4210_v3 = vld [vmem:[%s5137_s9 + $0xf0] sm:$0xff]  }
 0x956   : > { %v2378_v27 = vpop.xlane.xlu0 %2377  ;;  %v4211_v34 = vld [vmem:[%s5137_s9 + $0x30] sm:$0xff]  }
 0x957   : > { %4289 = vrsqrt.f32 %v2385_v35  ;;  %v2386_v9 = vadd.f32 1e-05, %v2382_v21  ;;  %v2383_v40 = vmul.f32 0.0078125, %v2378_v27  ;;  %v4212_v35 = vld [vmem:[%s5137_s9 + $0xb0] sm:$0xff]   ;;  %v4213_v21 = vld [vmem:[%s5137_s9 + $0x78] sm:$0xff]  }
 0x958   : > { %v4214_v27 = vld [vmem:[%s5137_s9 + $0xf8] sm:$0xff]  }
 0x959   : > { %4291 = vrsqrt.f32 %v2386_v9  ;;  %v2387_v11 = vadd.f32 1e-05, %v2383_v40  ;;  %v4215_v9 = vld [vmem:[%s5137_s9 + $0x38] sm:$0xff]  }
 0x95a   : > { %v2380_v48 = vpop.xlane.xlu1 %2379  ;;  %v4216_v40 = vld [vmem:[%s5137_s9 + $0xb8] sm:$0xff]  }
 0x95b   : > { %4293 = vrsqrt.f32 %v2387_v11  ;;  %v2384_v46 = vmul.f32 0.0078125, %v2380_v48  ;;  %v2451_v11 = vld [vmem:[%s5131_s5] sm:$0xf]  ;;  %v2467_v48 = vsub.s32 3, %v5198_v19 }
 0x95d   : > { %v2388_v12 = vadd.f32 1e-05, %v2384_v46  ;;  %v2456_v46 = vrot.slane %v2451_v11, %v907_v20 }
 0x95f   : > { %4295 = vrsqrt.f32 %v2388_v12  ;;  %v5650_v12 = vrot.slane %v2451_v11, %v915_v23 }
 0x961   : > { %v4290_v13 = vpop.eup %4289 }
 0x962   : > { %v2393_v14 = vmul.f32 %v4290_v13, %v5553_v41  ;;  %v5654_v13 = vrot.slane %v2451_v11, %v911_v22 }
 0x963   : > { %v4292_v15 = vpop.eup %4291 }
 0x964   : > { %v2394_v58 = vmul.f32 %v4292_v15, %v5556_v63  ;;  %v2403_v24 = vmul.f32 %v3627_v61, %v2393_v14 }
 0x965   : > { %v4294_v5 = vpop.eup %4293 }
 0x966   : > { %v2404_v25 = vmul.f32 %v3627_v61, %v2394_v58  ;;  %v2413_v2 = vadd.f32 %v3628_v7, %v2403_v24  ;;  %v2395_v55 = vmul.f32 %v4294_v5, %v5561_v28 }
 0x968   : > { %v2414_v54 = vadd.f32 %v3628_v7, %v2404_v25  ;;  %v2405_v33 = vmul.f32 %v3627_v61, %v2395_v55 }
 0x969   : > { %v4296_v29 = vpop.eup %4295 }
 0x96a   : > { %v2417_v41 = vpack.c.bf16 %v2414_v54, %v2413_v2  ;;  %v2396_v63 = vmul.f32 %v4296_v29, %v5568_v62  ;;  %v2415_v28 = vadd.f32 %v3628_v7, %v2405_v33  ;;  %v4186_v62 = vld [vmem:[%s5137_s9 + $0xc0] sm:$0xff]  }
 0x96b   : > { %3801 = vmatprep.subr.bf16.mxu1 %v4186_v62 }
 0x96c   : > { %2666 = vmatmul.mubr.bf16.vlgmr.msra.gmra.mrb[44].mxu0 %v2417_v41  ;;  %2719 = vmatmul.mubr.bf16.vlgmr.msra.gmra.mrb[36].mxu1 %v2417_v41  ;;  %v2406_v50 = vmul.f32 %v3627_v61, %v2396_v63  ;;  %v5656_v61 = vrot.slane %v2451_v11, %v2467_v48 }
 0x96d   : > { %2675 = vmatprep.mubr.bf16.mxu0 %v4674_v43  ;;  %2728 = vmatprep.mubr.bf16.mxu1 %v4674_v43  ;;  %v4189_v43 = vld [vmem:[%s5137_s9 + $0x48] sm:$0xff]  }
 0x96e   : > { %v2416_v31 = vadd.f32 %v3628_v7, %v2406_v50  ;;  %3774 = vmatpush3.bf16.msra.mxu0 %v4187_v36  ;;  %3802 = vmatpush3.bf16.msra.mxu1 %v4188_v37 }
 0x96f   : > { %3775 = vmatprep.subr.bf16.mxu0 %v4189_v43  ;;  %3803 = vmatprep.subr.bf16.mxu1 %v4190_v17 }
 0x970   : > { %v2418_v44 = vpack.c.bf16 %v2416_v31, %v2415_v28 }
 0x972   : > { %3776 = vmatpush3.bf16.msra.mxu0 %v4191_v18  ;;  %3804 = vmatpush3.bf16.msra.mxu1 %v4192_v47 }
 0x973   : > { %3777 = vmatprep.subr.bf16.mxu0 %v4193_v39  ;;  %3805 = vmatprep.subr.bf16.mxu1 %v4194_v52 }
 0x974   : > { %2676 = vmatmul.mubr.bf16.gmra.mrb[48].mxu0 %v2418_v44  ;;  %2729 = vmatmul.mubr.bf16.gmra.mrb[40].mxu1 %v2418_v44 }
 0x976   : > { %3778 = vmatpush3.bf16.msra.mxu0 %v4195_v38  ;;  %3806 = vmatpush3.bf16.msra.mxu1 %v4196_v42 }
 0x977   : > { %3779 = vmatprep.subr.bf16.mxu0 %v4197_v45  ;;  %3807 = vmatprep.subr.bf16.mxu1 %v4198_v8 }
 0x97a   : > { %3780 = vmatpush3.bf16.msra.mxu0 %v4199_v51  ;;  %3808 = vmatpush3.bf16.msra.mxu1 %v4200_v53 }
 0x97b   : > { %3781 = vmatprep.subr.bf16.mxu0 %v4201_v10  ;;  %3809 = vmatprep.subr.bf16.mxu1 %v4202_v56 }
 0x97e   : > { %3782 = vmatpush3.bf16.msra.mxu0 %v4203_v16  ;;  %3810 = vmatpush3.bf16.msra.mxu1 %v4204_v57 }
 0x97f   : > { %3783 = vmatprep.subr.bf16.mxu0 %v4205_v26  ;;  %3811 = vmatprep.subr.bf16.mxu1 %v4206_v59 }
 0x982   : > { %3784 = vmatpush3.bf16.msra.mxu0 %v4207_v60  ;;  %3812 = vmatpush3.bf16.msra.mxu1 %v4208_v32 }
 0x983   : > { %3785 = vmatprep.subr.bf16.mxu0 %v4209_v1  ;;  %3813 = vmatprep.subr.bf16.mxu1 %v4210_v3 }
 0x986   : > { %3786 = vmatpush3.bf16.msra.mxu0 %v4211_v34  ;;  %3814 = vmatpush3.bf16.msra.mxu1 %v4212_v35 }
 0x987   : > { %3787 = vmatprep.subr.bf16.mxu0 %v4213_v21  ;;  %3815 = vmatprep.subr.bf16.mxu1 %v4214_v27 }
 0x98a   : > { %3788 = vmatpush3.bf16.msra.mxu0 %v4215_v9  ;;  %3816 = vmatpush3.bf16.msra.mxu1 %v4216_v40 }
 0xa3f   : > { %v2667_v14 = vpop.f32.mrb[44].mxu0  ;;  %v2720_v15 = vpop.f32.mrb[36].mxu1 }
 0xa40   : > { %v5658_v58 = vadd.f32 %v2667_v14, %v2456_v46  ;;  %v5661_v24 = vadd.f32 %v2720_v15, %v5650_v12  ;;  %v2669_v5 = vpop.f32.mrb[45].mxu0  ;;  %v2722_v7 = vpop.f32.mrb[37].mxu1 }
 0xa41   : > { %v5664_v20 = vadd.f32 %v2669_v5, %v5654_v13  ;;  %v5667_v23 = vadd.f32 %v2722_v7, %v5656_v61  ;;  %v2671_v19 = vpop.f32.mrb[46].mxu0  ;;  %v2724_v22 = vpop.f32.mrb[38].mxu1 }
 0xa42   : > { %v3661_v25 = vmul.f32 -1.702, %v5658_v58  ;;  %v3663_v2 = vmul.f32 -1.702, %v5661_v24  ;;  %v5671_v54 = vadd.f32 %v2671_v19, %v2456_v46  ;;  %v5674_v55 = vadd.f32 %v2724_v22, %v5650_v12  ;;  %v2673_v29 = vpop.f32.mrb[47].mxu0  ;;  %v2726_v41 = vpop.f32.mrb[39].mxu1 }
 0xa43   : > { %v3662_v63 = vmul.f32 -1.702, %v5664_v20  ;;  %v3664_v33 = vmul.f32 -1.702, %v5667_v23  ;;  %v5679_v50 = vadd.f32 %v2673_v29, %v5654_v13  ;;  %v5682_v31 = vadd.f32 %v2726_v41, %v5656_v61 }
 0xa44   : > { %v2771_v28 = vmul.f32 1.442695, %v3661_v25  ;;  %v2775_v44 = vmul.f32 1.442695, %v3663_v2  ;;  %v3665_v0 = vmul.f32 -1.702, %v5671_v54 }
 0xa45   : > { %v2773_v62 = vmul.f32 1.442695, %v3662_v63  ;;  %v2777_v36 = vmul.f32 1.442695, %v3664_v33  ;;  %v3667_v37 = vmul.f32 -1.702, %v5674_v55 }
 0xa46   : > { %4297 = vpow2.f32 %v2771_v28  ;;  %v2779_v43 = vmul.f32 1.442695, %v3665_v0  ;;  %v3666_v17 = vmul.f32 -1.702, %v5679_v50  ;;  %v3668_v18 = vmul.f32 -1.702, %v5682_v31 }
 0xa47   : > { %4299 = vpow2.f32 %v2775_v44  ;;  %v2783_v47 = vmul.f32 1.442695, %v3667_v37  ;;  %v2677_v39 = vpop.f32.mrb[48].mxu0  ;;  %v2730_v52 = vpop.f32.mrb[40].mxu1 }
 0xa48   : > { %4301 = vpow2.f32 %v2773_v62  ;;  %v2781_v38 = vmul.f32 1.442695, %v3666_v17  ;;  %v5688_v42 = vadd.f32 %v2677_v39, %v2456_v46  ;;  %v2679_v45 = vpop.f32.mrb[49].mxu0  ;;  %v2732_v8 = vpop.f32.mrb[41].mxu1  ;;  %v2785_v51 = vmul.f32 1.442695, %v3668_v18 }
 0xa49   : > { %4303 = vpow2.f32 %v2777_v36  ;;  %v5691_v53 = vadd.f32 %v2730_v52, %v5650_v12  ;;  %v5694_v10 = vadd.f32 %v2679_v45, %v5654_v13  ;;  %v2681_v56 = vpop.f32.mrb[50].mxu0  ;;  %v2734_v16 = vpop.f32.mrb[42].mxu1  ;;  %v5703_v9 = vadd.f32 %v2732_v8, %v5656_v61 }
 0xa4a   : > { %4305 = vpow2.f32 %v2779_v43  ;;  %v3669_v57 = vmul.f32 -1.702, %v5688_v42  ;;  %v5697_v26 = vadd.f32 %v2681_v56, %v2456_v46  ;;  %v2683_v59 = vpop.f32.mrb[51].mxu0  ;;  %v2736_v60 = vpop.f32.mrb[43].mxu1  ;;  %v5707_v25 = vadd.f32 %v2734_v16, %v5650_v12 }
 0xa4b   : > { %4307 = vpow2.f32 %v2783_v47  ;;  %v3671_v32 = vmul.f32 -1.702, %v5691_v53  ;;  %v3670_v1 = vmul.f32 -1.702, %v5694_v10  ;;  %v3672_v7 = vmul.f32 -1.702, %v5703_v9 }
 0xa4c   : > { %4309 = vpow2.f32 %v2781_v38  ;;  %v2787_v3 = vmul.f32 1.442695, %v3669_v57  ;;  %v3673_v34 = vmul.f32 -1.702, %v5697_v26  ;;  %v5710_v41 = vadd.f32 %v2683_v59, %v5654_v13 }
 0xa4d   : > { %4311 = vpow2.f32 %v2785_v51  ;;  %v2791_v35 = vmul.f32 1.442695, %v3671_v32  ;;  %v2789_v21 = vmul.f32 1.442695, %v3670_v1  ;;  %v5713_v28 = vadd.f32 %v2736_v60, %v5656_v61 }
 0xa4e   : > { %4313 = vpow2.f32 %v2787_v3  ;;  %v2795_v27 = vmul.f32 1.442695, %v3673_v34  ;;  %v2793_v62 = vmul.f32 1.442695, %v3672_v7  ;;  %v3675_v37 = vmul.f32 -1.702, %v5707_v25 }
 0xa4f   : > { %4315 = vpow2.f32 %v2791_v35  ;;  %v3674_v13 = vmul.f32 -1.702, %v5710_v41  ;;  %v3676_v18 = vmul.f32 -1.702, %v5713_v28 }
 0xa50   : > { %v4298_v40 = vpop.eup %4297  ;;  %4317 = vpow2.f32 %v2789_v21  ;;  %v2799_v39 = vmul.f32 1.442695, %v3675_v37 }
 0xa51   : > { %v4300_v11 = vpop.eup %4299  ;;  %v2803_v48 = vadd.f32 1.0, %v4298_v40  ;;  %4319 = vpow2.f32 %v2795_v27  ;;  %v2797_v45 = vmul.f32 1.442695, %v3674_v13  ;;  %v2801_v51 = vmul.f32 1.442695, %v3676_v18 }
 0xa52   : > { %v4302_v46 = vpop.eup %4301  ;;  %v2805_v14 = vadd.f32 1.0, %v4300_v11 }
 0xa53   : > { %v4304_v15 = vpop.eup %4303  ;;  %4321 = vrcp.f32 %v2803_v48  ;;  %v2804_v5 = vadd.f32 1.0, %v4302_v46 }
 0xa54   : > { %v4306_v19 = vpop.eup %4305  ;;  %4323 = vrcp.f32 %v2805_v14  ;;  %v2806_v22 = vadd.f32 1.0, %v4304_v15 }
 0xa55   : > { %v4308_v2 = vpop.eup %4307  ;;  %4325 = vrcp.f32 %v2804_v5  ;;  %v2807_v29 = vadd.f32 1.0, %v4306_v19 }
 0xa56   : > { %v4310_v63 = vpop.eup %4309  ;;  %4327 = vrcp.f32 %v2806_v22  ;;  %v2809_v33 = vadd.f32 1.0, %v4308_v2 }
 0xa57   : > { %v4312_v44 = vpop.eup %4311  ;;  %4329 = vrcp.f32 %v2807_v29  ;;  %v2808_v0 = vadd.f32 1.0, %v4310_v63 }
 0xa58   : > { %v4314_v36 = vpop.eup %4313  ;;  %4331 = vrcp.f32 %v2809_v33  ;;  %v2810_v12 = vadd.f32 1.0, %v4312_v44 }
 0xa59   : > { %4333 = vrcp.f32 %v2808_v0  ;;  %v2811_v43 = vadd.f32 1.0, %v4314_v36  ;;  %v4316_v17 = vpop.eup %4315 }
 0xa5a   : > { %4335 = vrcp.f32 %v2810_v12  ;;  %v4318_v47 = vpop.eup %4317  ;;  %v2813_v14 = vadd.f32 1.0, %v4316_v17 }
 0xa5b   : > { %4337 = vpow2.f32 %v2793_v62  ;;  %v4320_v61 = vpop.eup %4319  ;;  %v2812_v5 = vadd.f32 1.0, %v4318_v47 }
 0xa5c   : > { %4339 = vrcp.f32 %v2811_v43  ;;  %v2815_v38 = vadd.f32 1.0, %v4320_v61 }
 0xa5d   : > { %v4322_v52 = vpop.eup %4321 }
 0xa5e   : > { %v4324_v8 = vpop.eup %4323  ;;  %4341 = vrcp.f32 %v2815_v38  ;;  %v2851_v60 = vmul.f32 %v4322_v52, %v5658_v58 }
 0xa5f   : > { %v4326_v56 = vpop.eup %4325  ;;  %4343 = vpow2.f32 %v2799_v39  ;;  %v2853_v3 = vmul.f32 %v4324_v8, %v5661_v24 }
 0xa60   : > { %v4328_v16 = vpop.eup %4327  ;;  %4345 = vpow2.f32 %v2797_v45  ;;  %v2852_v21 = vmul.f32 %v4326_v56, %v5664_v20 }
 0xa61   : > { %v4330_v57 = vpop.eup %4329  ;;  %4347 = vpow2.f32 %v2801_v51  ;;  %v2854_v48 = vmul.f32 %v4328_v16, %v5667_v23 }
 0xa62   : > { %v4332_v59 = vpop.eup %4331  ;;  %v2855_v32 = vmul.f32 %v4330_v57, %v5671_v54  ;;  %4349 = vrcp.f32 %v2813_v14 }
 0xa63   : > { %v4334_v1 = vpop.eup %4333  ;;  %v2857_v34 = vmul.f32 %v4332_v59, %v5674_v55  ;;  %4351 = vrcp.f32 %v2812_v5 }
 0xa64   : > { %v4336_v35 = vpop.eup %4335  ;;  %v2867_v27 = vpack.c.bf16 %v2855_v32, %v2851_v60  ;;  %v2856_v40 = vmul.f32 %v4334_v1, %v5679_v50 }
 0xa65   : > { %v4338_v11 = vpop.eup %4337  ;;  %v2869_v46 = vpack.c.bf16 %v2857_v34, %v2853_v3  ;;  %v2858_v58 = vmul.f32 %v4336_v35, %v5682_v31 }
 0xa66   : > { %v2868_v54 = vpack.c.bf16 %v2856_v40, %v2852_v21  ;;  %v4340_v15 = vpop.eup %4339  ;;  %v2814_v24 = vadd.f32 1.0, %v4338_v11 }
 0xa67   : > { %v2870_v7 = vpack.c.bf16 %v2858_v58, %v2854_v48  ;;  %v2859_v19 = vmul.f32 %v4340_v15, %v5688_v42 }
 0xa68   : > { %3170 = vmatprep.mubr.bf16.mxu0 %v2868_v54  ;;  %v4342_v55 = vpop.eup %4341  ;;  %4353 = vrcp.f32 %v2814_v24 }
 0xa69   : > { %3219 = vmatprep.mubr.bf16.mxu1 %v2870_v7  ;;  %3171 = vmatmul.mubr.bf16.vlgmr.msra.gmra.mrb[52].mxu0 %v2867_v27  ;;  %v4344_v20 = vpop.eup %4343  ;;  %v2863_v50 = vmul.f32 %v4342_v55, %v5697_v26 }
 0xa6a   : > { %3220 = vmatmul.mubr.bf16.vlgmr.msra.gmra.mrb[44].mxu1 %v2869_v46  ;;  %v4346_v23 = vpop.eup %4345  ;;  %v2817_v31 = vadd.f32 1.0, %v4344_v20 }
 0xa6b   : > { %v4348_v22 = vpop.eup %4347  ;;  %v2816_v2 = vadd.f32 1.0, %v4346_v23  ;;  %v2871_v29 = vpack.c.bf16 %v2863_v50, %v2859_v19 }
 0xa6c   : > { %4355 = vrcp.f32 %v2817_v31  ;;  %v2818_v63 = vadd.f32 1.0, %v4348_v22  ;;  %v4350_v33 = vpop.eup %4349 }
 0xa6d   : > { %4357 = vrcp.f32 %v2816_v2  ;;  %v4352_v44 = vpop.eup %4351  ;;  %v2861_v36 = vmul.f32 %v4350_v33, %v5691_v53 }
 0xa6e   : > { %4359 = vrcp.f32 %v2818_v63  ;;  %v2860_v37 = vmul.f32 %v4352_v44, %v5694_v10  ;;  %v3677_v10 = vld [vmem:[%s784_s10] ss:$0 sm:$0xff] }
 0xa72   : > { %v4354_v0 = vpop.eup %4353 }
 0xa73   : > { %v2862_v13 = vmul.f32 %v4354_v0, %v5703_v9 }
 0xa76   : > { %v4356_v62 = vpop.eup %4355 }
 0xa77   : > { %v4358_v42 = vpop.eup %4357  ;;  %v2865_v26 = vmul.f32 %v4356_v62, %v5707_v25 }
 0xa78   : > { %v4360_v12 = vpop.eup %4359  ;;  %v2864_v43 = vmul.f32 %v4358_v42, %v5710_v41 }
 0xa79   : > { %v2866_v17 = vmul.f32 %v4360_v12, %v5713_v28  ;;  %v2873_v18 = vpack.c.bf16 %v2865_v26, %v2861_v36 }
 0xa7a   : > { %v2872_v47 = vpack.c.bf16 %v2864_v43, %v2860_v37 }
 0xa7b   : > { %v2874_v61 = vpack.c.bf16 %v2866_v17, %v2862_v13 }
 0xa7c   : > { %3178 = vmatprep.mubr.bf16.mxu0 %v2872_v47 }
 0xa7d   : > { %3227 = vmatprep.mubr.bf16.mxu1 %v2874_v61  ;;  %3179 = vmatmul.mubr.bf16.gmra.mrb[56].mxu0 %v2871_v29 }
 0xa7e   : > { %3228 = vmatmul.mubr.bf16.gmra.mrb[48].mxu1 %v2873_v18 }
 0xb3c   : > { %v3789_v53 = vpop.f32.mrb[52].mxu0 }
 0xb3d   : > { %v3817_v39 = vpop.f32.mrb[44].mxu1  ;;  %v3790_v25 = vpop.f32.mrb[53].mxu0 }
 0xb3e   : > { %v3791_v41 = vadd.f32 %v3790_v25, %v3789_v53  ;;  %v3818_v52 = vpop.f32.mrb[45].mxu1  ;;  %v3792_v9 = vpop.f32.mrb[54].mxu0 }
 0xb3f   : > { %v3819_v38 = vadd.f32 %v3818_v52, %v3817_v39  ;;  %v3820_v28 = vpop.f32.mrb[46].mxu1  ;;  %v3793_v45 = vpop.f32.mrb[55].mxu0 }
 0xb40   : > { %v3173_v8 = vadd.f32 %v3791_v41, %v3677_v10  ;;  %v3794_v51 = vadd.f32 %v3793_v45, %v3792_v9  ;;  %v3821_v56 = vpop.f32.mrb[47].mxu1 }
 0xb41   : > { %v3822_v16 = vadd.f32 %v3821_v56, %v3820_v28 }
 0xb42   : > { %v3222_v57 = vadd.f32 %v3819_v38, %v3173_v8  ;;  %v3176_v59 = vadd.f32 %v3794_v51, %v3677_v10 }
 0xb44   : > { %v3236_v60 = vadd.f32 %v3222_v57, %v5532_v30  ;;  %v3225_v32 = vadd.f32 %v3822_v16, %v3176_v59 }
 0xb46   : > { %v3237_v1 = vadd.f32 %v3225_v32, %v5534_v4  ;;  %3244 = vst [vmem:[#allocation14] sm:$0xff] (!%p3710_p8), %v3236_v60 }
 0xb48   : > { %3245 = vst [vmem:[#allocation14 + $0x8] sm:$0xff] (!%p3710_p8), %v3237_v1 }
 0xb50   : > { %v3795_v3 = vpop.f32.mrb[56].mxu0 }
 0xb51   : > { %v3823_v34 = vpop.f32.mrb[48].mxu1  ;;  %v3796_v35 = vpop.f32.mrb[57].mxu0 }
 0xb52   : > { %v3797_v21 = vadd.f32 %v3796_v35, %v3795_v3  ;;  %v3824_v27 = vpop.f32.mrb[49].mxu1  ;;  %v3798_v40 = vpop.f32.mrb[58].mxu0 }
 0xb53   : > { %v3825_v11 = vadd.f32 %v3824_v27, %v3823_v34  ;;  %v3826_v48 = vpop.f32.mrb[50].mxu1  ;;  %v3799_v46 = vpop.f32.mrb[59].mxu0 }
 0xb54   : > { %v3181_v58 = vadd.f32 %v3797_v21, %v3677_v10  ;;  %v3800_v14 = vadd.f32 %v3799_v46, %v3798_v40  ;;  %v3827_v54 = vpop.f32.mrb[51].mxu1  ;;  %3243 = sbr.rel (%p3710_p8) target bundleno = 2909 (0xb5d), region = 116 }
 0xb55   : > { %v3828_v15 = vadd.f32 %v3827_v54, %v3826_v48 }
 0xb56   : > { %v3230_v5 = vadd.f32 %v3825_v11, %v3181_v58  ;;  %v3184_v7 = vadd.f32 %v3800_v14, %v3677_v10 }
 0xb58   : > { %v3238_v30 = vadd.f32 %v3230_v5, %v5537_v6  ;;  %v3233_v24 = vadd.f32 %v3828_v15, %v3184_v7 }
 0xb5a   : > { %v3239_v4 = vadd.f32 %v3233_v24, %v5541_v49  ;;  %3246 = vst [vmem:[#allocation14 + $0x10] sm:$0xff] (!%p3710_p8), %v3238_v30 }
 0xb5c   : > { %3247 = vst [vmem:[#allocation14 + $0x18] sm:$0xff] %v3239_v4 }
 0xb5d PF: > { %p3711_p0 = scmp.ne.s32.totalorder %s4932_s17, 1 }
 0xb5e   : > { %3254 = vadd.xlane.f32.xlu0 (!%p3711_p0), %v3236_v60  ;;  %3258 = vadd.xlane.f32.xlu1 (!%p3711_p0), %v3238_v30  ;;  %s5865_s20 = sld [smem:[#allocation33_spill]] (!%p3711_p0)  ;;  %s5866_s13 = sld [smem:[#allocation34_spill]] (!%p3711_p0) }
 0xb5f   : > { %3251 = sbr.rel (%p3711_p0) target bundleno = 3230 (0xc9e), region = 120 }
 0xb62   : > { %3256 = vadd.xlane.f32.xlu0 (!%p3711_p0), %v3237_v1  ;;  %3260 = vadd.xlane.f32.xlu1 (!%p3711_p0), %v3239_v4 }
 0xb64   : > { %v3712_v10 = vld [vmem:[%s5865_s20] ss:$0 sm:$0xff] (!%p3711_p0) }
 0xb65   : > { %v3713_v41 = vld [vmem:[%s5866_s13] ss:$0 sm:$0xff] (!%p3711_p0) }
 0xbeb   : > { %v3255_v55 = vpop.xlane.xlu0 %3254  ;;  %v3259_v6 = vpop.xlane.xlu1 %3258 }
 0xbec   : > { %v3262_v20 = vmul.f32 0.0078125, %v3255_v55  ;;  %v3264_v19 = vmul.f32 0.0078125, %v3259_v6 }
 0xbee   : > { %v3266_v49 = vsub.f32 %v3236_v60, %v3262_v20  ;;  %v3268_v50 = vsub.f32 %v3238_v30, %v3264_v19 }
 0xbef   : > { %v3257_v23 = vpop.xlane.xlu0 %3256  ;;  %v3261_v31 = vpop.xlane.xlu1 %3260 }
 0xbf0   : > { %v3263_v22 = vmul.f32 0.0078125, %v3257_v23  ;;  %v3270_v2 = vmul.f32 %v3266_v49, %v3266_v49  ;;  %v3265_v29 = vmul.f32 0.0078125, %v3261_v31  ;;  %v3272_v44 = vmul.f32 %v3268_v50, %v3268_v50 }
 0xbf2   : > { %v3267_v63 = vsub.f32 %v3237_v1, %v3263_v22  ;;  %3274 = vadd.xlane.f32.xlu0 %v3270_v2  ;;  %v3269_v33 = vsub.f32 %v3239_v4, %v3265_v29 }
 0xbf4   : > { %v3271_v0 = vmul.f32 %v3267_v63, %v3267_v63  ;;  %v3273_v62 = vmul.f32 %v3269_v33, %v3269_v33 }
 0xbf6   : > { %3278 = vadd.xlane.f32.xlu0 %v3272_v44  ;;  %3276 = vadd.xlane.f32.xlu1 %v3271_v0 }
 0xbfa   : > { %3280 = vadd.xlane.f32.xlu1 %v3273_v62 }
 0xc7f   : > { %v3275_v42 = vpop.xlane.xlu0 %3274 }
 0xc80   : > { %v3282_v36 = vmul.f32 0.0078125, %v3275_v42 }
 0xc82   : > { %v3286_v26 = vadd.f32 1e-05, %v3282_v36 }
 0xc83   : > { %v3277_v12 = vpop.xlane.xlu1 %3276  ;;  %v3279_v37 = vpop.xlane.xlu0 %3278 }
 0xc84   : > { %4365 = vrsqrt.f32 %v3286_v26  ;;  %v3283_v43 = vmul.f32 0.0078125, %v3277_v12  ;;  %v3284_v13 = vmul.f32 0.0078125, %v3279_v37 }
 0xc86   : > { %v3287_v17 = vadd.f32 1e-05, %v3283_v43  ;;  %v3288_v18 = vadd.f32 1e-05, %v3284_v13 }
 0xc87   : > { %v3281_v47 = vpop.xlane.xlu1 %3280 }
 0xc88   : > { %4367 = vrsqrt.f32 %v3287_v17  ;;  %v3285_v61 = vmul.f32 0.0078125, %v3281_v47 }
 0xc89   : > { %4369 = vrsqrt.f32 %v3288_v18 }
 0xc8a   : > { %v3289_v53 = vadd.f32 1e-05, %v3285_v61 }
 0xc8c   : > { %4371 = vrsqrt.f32 %v3289_v53 }
 0xc8e   : > { %v4366_v39 = vpop.eup %4365 }
 0xc8f   : > { %v3294_v25 = vmul.f32 %v4366_v39, %v3266_v49 }
 0xc91   : > { %v3304_v52 = vmul.f32 %v3712_v10, %v3294_v25 }
 0xc92   : > { %v4368_v9 = vpop.eup %4367 }
 0xc93   : > { %v4370_v38 = vpop.eup %4369  ;;  %v3314_v28 = vadd.f32 %v3713_v41, %v3304_v52  ;;  %v3295_v45 = vmul.f32 %v4368_v9, %v3267_v63 }
 0xc94   : > { %v3296_v8 = vmul.f32 %v4370_v38, %v3268_v50 }
 0xc95   : > { %3318 = vst [vmem:[#allocation14] sm:$0xff] %v3314_v28  ;;  %v3305_v51 = vmul.f32 %v3712_v10, %v3295_v45 }
 0xc96   : > { %v4372_v56 = vpop.eup %4371  ;;  %v3306_v16 = vmul.f32 %v3712_v10, %v3296_v8 }
 0xc97   : > { %v3315_v57 = vadd.f32 %v3713_v41, %v3305_v51  ;;  %v3297_v59 = vmul.f32 %v4372_v56, %v3269_v33 }
 0xc98   : > { %v3316_v60 = vadd.f32 %v3713_v41, %v3306_v16 }
 0xc99   : > { %3319 = vst [vmem:[#allocation14 + $0x8] sm:$0xff] %v3315_v57  ;;  %v3307_v32 = vmul.f32 %v3712_v10, %v3297_v59 }
 0xc9a   : > { %3320 = vst [vmem:[#allocation14 + $0x10] sm:$0xff] %v3316_v60 }
 0xc9b   : > { %v3317_v1 = vadd.f32 %v3713_v41, %v3307_v32 }
 0xc9d   : > { %3321 = vst [vmem:[#allocation14 + $0x18] sm:$0xff] %v3317_v1 }
 0xc9e PF: > { %p4015_p6 = scmp.eq.s32.totalorder %s4932_s17, 1  ;;  %s4680_s14 = smov [#allocation14]  }
 0xc9f   : > { %s3328_s3 = sshll.u32 %s4680_s14, 4  ;;  %s3329_s3 = int_to_ptr.vmem [resolvable:$true] %s3328_s3 }
 0xca0   : > { %s4581_s10 = scalar_lea.vmem %s3329_s3, 512  ;;  %p4588_p11 = scmp.lt.s32.totalorder %s3329_s3, %s3329_s3 }
 0xca1   : > { %p4582_p3 = scmp.ne.s32.totalorder %s3329_s3, %s4581_s10  ;;  %p4589_p1 = scmp.lt.s32.totalorder %s4581_s10, %s4581_s10 }
 0xca3   : > { %p4583_p4 = pnand %p4582_p3, %p4015_p6  ;;  %p4590_p2 = por %p4589_p1, %p4588_p11 }
 0xca5   : > { %p4584_p13 = pneg %p4583_p4 }
 0xca7   : > { %p4591_p10 = pnand %p4590_p2, %p4584_p13 }
 0xca9   : > { %4594 = shalt.err (!%p4591_p10)
}
 0xcaa   : > { %s5867_s2 = sld [smem:[#allocation35_spill]] }
 0xcb0   : > { %s4595_s24 = scalar_lea.hbm %s5867_s2, 512 }
 0xcb1   : > { %p4596_p9 = scmp.ne.s32.totalorder %s5867_s2, %s4595_s24  ;;  %p4601_p7 = scmp.lt.u32.totalorder %s4595_s24, %s5867_s2 }
 0xcb3   : > { %p4597_p12 = pnand %p4596_p9, %p4015_p6 }
 0xcb5   : > { %p4598_p5 = pneg %p4597_p12 }
 0xcb7   : > { %p4603_p8 = pnand %p4601_p7, %p4598_p5 }
 0xcb9   : > { %4606 = shalt.err (!%p4603_p8)
}
 0xcba   : > { %s4681_s16 = smov 128   ;;  %s4682_s23 = smov 8  }
 0xcbb   : > { %3986 = dma.vmem_to_hbm [thread:$0]  (%p4015_p6), %s3329_s3, 512, %s5867_s2, [#allocation4], %s4681_s16, %s4681_s16, %s4682_s23  }
 0xcbc   : > { %4640 = dma.done.wait (%p4015_p6), [#allocation4], 512  }
 0xcbd   : > { %4642 = vsyncadd (%p4015_p6), [#allocation4], 4294966784 }
 0xcbe PF: > { %s5868_s21 = sld [smem:[#allocation21_spill]]  ;;  %s5869_s27 = sld [smem:[#allocation20_spill]] }
 0xcbf   : > { %s5870_s20 = sld [smem:[#allocation22_spill]]  ;;  %s5871_s18 = smov %s4649_s19 }
 0xcc4   : > { %p33_p0 = scmp.ge.s32.totalorder %s5868_s21, 4   ;;  %s5872_s19 = smov %s5869_s27 }
 0xcc6   :  { %35 = sbr.rel (!%p33_p0) target bundleno = 23 (0x17), region = 211 }
 0xccd   :  { %3344 = vsyncpa [#allocation3], 1 }
 0xcce   :  { %3346 = vsyncpa [#allocation3 + $0x1], 1 }
 0xccf   :  { %3347 = vsyncpa [#allocation6], 1 }
 0xcd0   :  { %3349 = vsyncpa [#allocation6 + $0x1], 1 }
 0xcd1   :  { %3350 = vsyncpa [#allocation9], 1 }
 0xcd2   :  { %3352 = vsyncpa [#allocation9 + $0x1], 1 }
 0xcd3   :  { %3353 = vsyncpa [#allocation12], 1 }
 0xcd4   :  { %3355 = vsyncpa [#allocation12 + $0x1], 1 }
 0xcd5   :  { %3356 = vsyncpa [#allocation4], 1 }
 0xcd6   :  { %3358 = vsyncpa [#allocation4 + $0x1], 1 }

</bundles_post_ra>
